<compile_context>
chip_gen: v5e
topology: v5e:2x2
jax: 0.10.0
libtpu: 0.0.40
codegen_flags: <defaults>
</compile_context>

<pallas_src>
import math

import jax
import jax.numpy as jnp
from jax.experimental import pallas as pl
from jax.experimental.pallas import tpu as pltpu

# ----- bert-tiny-consistent config (small synthetic shapes) -----
B, S = 2, 8           # batch, sequence length
BS = B * S
D = 128               # hidden size
H, DH = 2, 64         # heads, head dim
FF = 512              # FFN intermediate
L = 2                 # encoder layers
VOCAB = 512           # shrunk vocab (synthetic weights; fits easily in VMEM)
NCLS = 3              # n_classes
LN_EPS = 1e-12
MASK_BIAS = -1e9      # large-but-finite additive mask (avoids NaN for fully-masked rows)


def _layer_norm(x, g, b):
    mean = jnp.mean(x, axis=-1, keepdims=True)
    xc = x - mean
    var = jnp.mean(xc * xc, axis=-1, keepdims=True)
    return xc * jax.lax.rsqrt(var + LN_EPS) * g + b


# ---------------------------------------------------------------- fused kernel

def _bert_fused_kernel(
    idx_ref,                      # (BS, 1) int32
    wemb_ref,                     # (VOCAB, D) f32
    pos_ref,                      # (S, D)
    type_ref,                     # (2, D)   (row 0 used: token_type_ids == 0)
    mask_ref,                     # (B, S) int32
    embg_ref, embb_ref,           # (1, D)
    wqkv_ref, bqkv_ref,           # (L, D, 3D), (L, 1, 3D)
    wo_ref, bo_ref,               # (L, D, D),  (L, 1, D)
    ln1g_ref, ln1b_ref,           # (L, 1, D)
    w1_ref, b1_ref,               # (L, D, FF), (L, 1, FF)
    w2_ref, b2_ref,               # (L, FF, D), (L, 1, D)
    ln2g_ref, ln2b_ref,           # (L, 1, D)
    wc1_ref, bc1_ref,             # (D, D), (1, D)
    wc2_ref, bc2_ref,             # (D, NCLS), (1, NCLS)
    o_ref,                        # (B, NCLS) output
):
    # ---- word-embedding gather as a single one-hot MXU matmul (no per-row DMAs) ----
    iota = jax.lax.broadcasted_iota(jnp.int32, (BS, VOCAB), 1)
    onehot = (iota == idx_ref[...]).astype(jnp.float32)              # (BS, VOCAB)
    word = jnp.dot(onehot, wemb_ref[...], preferred_element_type=jnp.float32)  # (BS, D)

    # ---- embeddings: word + position + token_type(0), LayerNorm ----
    pos_tiled = jnp.concatenate([pos_ref[...]] * B, axis=0)          # (BS, D)
    type0 = type_ref[...][0:1, :]                                    # (1, D)
    x = _layer_norm(word + pos_tiled + type0, embg_ref[...], embb_ref[...])

    # additive attention bias built in-kernel from the binary mask
    bias = (1.0 - mask_ref[...].astype(jnp.float32)) * MASK_BIAS     # (B, S)
    scale = 1.0 / math.sqrt(DH)

    # ---- L transformer encoder layers, fully VMEM-resident ----
    for l in range(L):
        # fused QKV projection: one (BS, D) x (D, 3D) matmul
        qkv = jnp.dot(x, wqkv_ref[l], preferred_element_type=jnp.float32) + bqkv_ref[l]
        q = qkv[:, 0:D]
        k = qkv[:, D:2 * D]
        v = qkv[:, 2 * D:3 * D]

        ctx_rows = []
        for b in range(B):
            r0, r1 = b * S, (b + 1) * S
            bias_b = bias[b:b + 1, :]                                # (1, S)
            head_parts = []
            for h in range(H):
                c0, c1 = h * DH, (h + 1) * DH
                qh = q[r0:r1, c0:c1]                                 # (S, DH)
                kh = k[r0:r1, c0:c1]
                vh = v[r0:r1, c0:c1]
                s = jax.lax.dot_general(                             # (S, S) = qh @ kh.T
                    qh, kh, (((1,), (1,)), ((), ())),
                    preferred_element_type=jnp.float32)
                s = s * scale + bias_b
                s = s - jnp.max(s, axis=-1, keepdims=True)
                p = jnp.exp(s)
                p = p * pl.reciprocal(jnp.sum(p, axis=-1, keepdims=True), approx=True)
                head_parts.append(
                    jnp.dot(p, vh, preferred_element_type=jnp.float32))       # (S, DH)
            ctx_rows.append(jnp.concatenate(head_parts, axis=1))              # (S, D)
        ctx = jnp.concatenate(ctx_rows, axis=0)                               # (BS, D)

        attn_out = jnp.dot(ctx, wo_ref[l], preferred_element_type=jnp.float32) + bo_ref[l]
        x = _layer_norm(attn_out + x, ln1g_ref[l], ln1b_ref[l])

        # FFN — the (BS, FF) GELU intermediate never leaves VMEM
        ff = jnp.dot(x, w1_ref[l], preferred_element_type=jnp.float32) + b1_ref[l]
        ff = jax.nn.gelu(ff, approximate=True)
        ff = jnp.dot(ff, w2_ref[l], preferred_element_type=jnp.float32) + b2_ref[l]
        x = _layer_norm(ff + x, ln2g_ref[l], ln2b_ref[l])

    # ---- pooled head: sum over sequence dim, Linear -> Tanh -> Linear ----
    pooled = jnp.concatenate(
        [jnp.sum(x[b * S:(b + 1) * S, :], axis=0, keepdims=True) for b in range(B)],
        axis=0)                                                               # (B, D)
    z = jnp.tanh(jnp.dot(pooled, wc1_ref[...], preferred_element_type=jnp.float32)
                 + bc1_ref[...])
    o_ref[...] = (jnp.dot(z, wc2_ref[...], preferred_element_type=jnp.float32)
                  + bc2_ref[...])


def _build_fused_call():
    vmem = pltpu.MemorySpace.VMEM
    n_inputs = 23
    return pl.pallas_call(
        _bert_fused_kernel,
        out_shape=jax.ShapeDtypeStruct((B, NCLS), jnp.float32),
        in_specs=[pl.BlockSpec(memory_space=vmem)] * n_inputs,
        out_specs=pl.BlockSpec(memory_space=vmem),
    )


# ---------------------------------------------------------------- parameters

def init_params(key):
    def nrm(k, shape):
        return 0.02 * jax.random.normal(k, shape, jnp.float32)

    keys = iter(jax.random.split(key, 16))
    return {
        "word_emb": nrm(next(keys), (VOCAB, D)),
        "pos_emb":  nrm(next(keys), (S, D)),
        "type_emb": nrm(next(keys), (2, D)),
        "emb_ln_g": jnp.ones((1, D), jnp.float32),
        "emb_ln_b": jnp.zeros((1, D), jnp.float32),
        # per-layer weights stacked along a leading L axis; QKV fused into (D, 3D)
        "wqkv": nrm(next(keys), (L, D, 3 * D)),
        "bqkv": jnp.zeros((L, 1, 3 * D), jnp.float32),
        "wo":   nrm(next(keys), (L, D, D)),
        "bo":   jnp.zeros((L, 1, D), jnp.float32),
        "ln1_g": jnp.ones((L, 1, D), jnp.float32),
        "ln1_b": jnp.zeros((L, 1, D), jnp.float32),
        "w1":   nrm(next(keys), (L, D, FF)),
        "b1":   jnp.zeros((L, 1, FF), jnp.float32),
        "w2":   nrm(next(keys), (L, FF, D)),
        "b2":   jnp.zeros((L, 1, D), jnp.float32),
        "ln2_g": jnp.ones((L, 1, D), jnp.float32),
        "ln2_b": jnp.zeros((L, 1, D), jnp.float32),
        "cls_w1": nrm(next(keys), (D, D)),
        "cls_b1": jnp.zeros((1, D), jnp.float32),
        "cls_w2": nrm(next(keys), (D, NCLS)),
        "cls_b2": jnp.zeros((1, NCLS), jnp.float32),
    }


# ---------------------------------------------------------------- forward

def bert_classifier_forward(params, indices, mask):
    idx = indices.reshape(BS, 1).astype(jnp.int32)        # (BS, 1) for one-hot compare
    fused = _build_fused_call()
    return fused(
        idx, params["word_emb"], params["pos_emb"], params["type_emb"],
        mask.astype(jnp.int32),
        params["emb_ln_g"], params["emb_ln_b"],
        params["wqkv"], params["bqkv"], params["wo"], params["bo"],
        params["ln1_g"], params["ln1_b"],
        params["w1"], params["b1"], params["w2"], params["b2"],
        params["ln2_g"], params["ln2_b"],
        params["cls_w1"], params["cls_b1"], params["cls_w2"], params["cls_b2"],
    )


# ---------------------------------------------------------------- main

if __name__ == "__main__":
    key = jax.random.PRNGKey(0)
    kp, ki = jax.random.split(key)
    params = init_params(kp)

    indices = jax.random.randint(ki, (B, S), 0, VOCAB, dtype=jnp.int32)
    mask = jnp.array([[1, 1, 1, 1, 1, 1, 1, 1],
                      [1, 1, 1, 1, 1, 0, 0, 0]], dtype=jnp.int32)

    fwd = jax.jit(bert_classifier_forward)
    logits = fwd(params, indices, mask)
    jax.block_until_ready(logits)
    assert logits.shape == (B, NCLS) and logits.dtype == jnp.float32
    assert bool(jnp.all(jnp.isfinite(logits)))
    print("KERNEL_OK")
</pallas_src>

<mosaic_0001>
module attributes {stable_mosaic.version = 11 : i64} {
  func.func @_bert_fused_kernel(%arg0: memref<16x1xi32, #tpu.memory_space<vmem>>, %arg1: memref<512x128xf32, #tpu.memory_space<vmem>>, %arg2: memref<8x128xf32, #tpu.memory_space<vmem>>, %arg3: memref<2x128xf32, #tpu.memory_space<vmem>>, %arg4: memref<2x8xi32, #tpu.memory_space<vmem>>, %arg5: memref<1x128xf32, #tpu.memory_space<vmem>>, %arg6: memref<1x128xf32, #tpu.memory_space<vmem>>, %arg7: memref<2x128x384xf32, #tpu.memory_space<vmem>>, %arg8: memref<2x1x384xf32, #tpu.memory_space<vmem>>, %arg9: memref<2x128x128xf32, #tpu.memory_space<vmem>>, %arg10: memref<2x1x128xf32, #tpu.memory_space<vmem>>, %arg11: memref<2x1x128xf32, #tpu.memory_space<vmem>>, %arg12: memref<2x1x128xf32, #tpu.memory_space<vmem>>, %arg13: memref<2x128x512xf32, #tpu.memory_space<vmem>>, %arg14: memref<2x1x512xf32, #tpu.memory_space<vmem>>, %arg15: memref<2x512x128xf32, #tpu.memory_space<vmem>>, %arg16: memref<2x1x128xf32, #tpu.memory_space<vmem>>, %arg17: memref<2x1x128xf32, #tpu.memory_space<vmem>>, %arg18: memref<2x1x128xf32, #tpu.memory_space<vmem>>, %arg19: memref<128x128xf32, #tpu.memory_space<vmem>>, %arg20: memref<1x128xf32, #tpu.memory_space<vmem>>, %arg21: memref<128x3xf32, #tpu.memory_space<vmem>>, %arg22: memref<1x3xf32, #tpu.memory_space<vmem>>, %arg23: memref<2x3xf32, #tpu.memory_space<vmem>>) attributes {dimension_semantics = [], scalar_prefetch = 0 : i64, scratch_operands = 0 : i64, tpu.core_type = #tpu.core_type<tc>} {
    %0 = tpu.iota {dimensions = array<i32: 1>} : vector<16x512xi32>
    %c0 = arith.constant 0 : index
    %c0_0 = arith.constant 0 : index
    %1 = vector.load %arg0[%c0, %c0_0] : memref<16x1xi32, #tpu.memory_space<vmem>>, vector<16x1xi32>
    %2 = vector.broadcast %1 : vector<16x1xi32> to vector<16x512xi32>
    %3 = arith.cmpi eq, %0, %2 : vector<16x512xi32>
    %4 = arith.extui %3 : vector<16x512xi1> to vector<16x512xi32>
    %5 = arith.sitofp %4 : vector<16x512xi32> to vector<16x512xf32>
    %c0_1 = arith.constant 0 : index
    %c0_2 = arith.constant 0 : index
    %6 = vector.load %arg1[%c0_1, %c0_2] : memref<512x128xf32, #tpu.memory_space<vmem>>, vector<512x128xf32>
    %cst = arith.constant dense<0.000000e+00> : vector<16x128xf32>
    %7 = tpu.matmul %5, %6, %cst {dimension_numbers = #tpu.dot_dimension_numbers<[1], [0], [0], [1], [0, 0, 1, 1], [], []>} : vector<16x512xf32>, vector<512x128xf32>, vector<16x128xf32> -> vector<16x128xf32>
    %c0_3 = arith.constant 0 : index
    %c0_4 = arith.constant 0 : index
    %8 = vector.load %arg2[%c0_3, %c0_4] : memref<8x128xf32, #tpu.memory_space<vmem>>, vector<8x128xf32>
    %9 = tpu.concatenate %8, %8 in 0 : vector<8x128xf32>, vector<8x128xf32> -> vector<16x128xf32>
    %c0_5 = arith.constant 0 : index
    %c0_6 = arith.constant 0 : index
    %10 = vector.load %arg3[%c0_5, %c0_6] : memref<2x128xf32, #tpu.memory_space<vmem>>, vector<2x128xf32>
    %11 = vector.extract_strided_slice %10 {offsets = [0, 0], sizes = [1, 128], strides = [1, 1]} : vector<2x128xf32> to vector<1x128xf32>
    %12 = arith.addf %7, %9 : vector<16x128xf32>
    %13 = vector.broadcast %11 : vector<1x128xf32> to vector<16x128xf32>
    %14 = arith.addf %12, %13 : vector<16x128xf32>
    %c0_7 = arith.constant 0 : index
    %c0_8 = arith.constant 0 : index
    %15 = vector.load %arg5[%c0_7, %c0_8] : memref<1x128xf32, #tpu.memory_space<vmem>>, vector<1x128xf32>
    %c0_9 = arith.constant 0 : index
    %c0_10 = arith.constant 0 : index
    %16 = vector.load %arg6[%c0_9, %c0_10] : memref<1x128xf32, #tpu.memory_space<vmem>>, vector<1x128xf32>
    %cst_11 = arith.constant dense<0.000000e+00> : vector<16xf32>
    %17 = vector.multi_reduction <add>, %14, %cst_11 [1] : vector<16x128xf32> to vector<16xf32>
    %18 = vector.shape_cast %17 : vector<16xf32> to vector<16x1xf32>
    %cst_12 = arith.constant 1.280000e+02 : f32
    %19 = vector.broadcast %cst_12 : f32 to vector<16x1xf32>
    %20 = arith.divf %18, %19 : vector<16x1xf32>
    %21 = vector.broadcast %20 : vector<16x1xf32> to vector<16x128xf32>
    %22 = arith.subf %14, %21 : vector<16x128xf32>
    %23 = arith.mulf %22, %22 : vector<16x128xf32>
    %cst_13 = arith.constant dense<0.000000e+00> : vector<16xf32>
    %24 = vector.multi_reduction <add>, %23, %cst_13 [1] : vector<16x128xf32> to vector<16xf32>
    %25 = vector.shape_cast %24 : vector<16xf32> to vector<16x1xf32>
    %cst_14 = arith.constant 1.280000e+02 : f32
    %26 = vector.broadcast %cst_14 : f32 to vector<16x1xf32>
    %27 = arith.divf %25, %26 : vector<16x1xf32>
    %cst_15 = arith.constant 9.99999996E-13 : f32
    %28 = vector.broadcast %cst_15 : f32 to vector<16x1xf32>
    %29 = arith.addf %27, %28 : vector<16x1xf32>
    %30 = math.rsqrt %29 : vector<16x1xf32>
    %31 = vector.broadcast %30 : vector<16x1xf32> to vector<16x128xf32>
    %32 = arith.mulf %22, %31 : vector<16x128xf32>
    %33 = vector.broadcast %15 : vector<1x128xf32> to vector<16x128xf32>
    %34 = arith.mulf %32, %33 : vector<16x128xf32>
    %35 = vector.broadcast %16 : vector<1x128xf32> to vector<16x128xf32>
    %36 = arith.addf %34, %35 : vector<16x128xf32>
    %c0_16 = arith.constant 0 : index
    %c0_17 = arith.constant 0 : index
    %37 = vector.load %arg4[%c0_16, %c0_17] : memref<2x8xi32, #tpu.memory_space<vmem>>, vector<2x8xi32>
    %38 = arith.sitofp %37 : vector<2x8xi32> to vector<2x8xf32>
    %cst_18 = arith.constant 1.000000e+00 : f32
    %39 = vector.broadcast %cst_18 : f32 to vector<2x8xf32>
    %40 = arith.subf %39, %38 : vector<2x8xf32>
    %cst_19 = arith.constant -1.000000e+09 : f32
    %41 = vector.broadcast %cst_19 : f32 to vector<2x8xf32>
    %42 = arith.mulf %40, %41 : vector<2x8xf32>
    %c0_20 = arith.constant 0 : index
    %c0_21 = arith.constant 0 : index
    %c0_22 = arith.constant 0 : index
    %43 = vector.load %arg7[%c0_20, %c0_21, %c0_22] : memref<2x128x384xf32, #tpu.memory_space<vmem>>, vector<1x128x384xf32>
    %44 = vector.shape_cast %43 : vector<1x128x384xf32> to vector<128x384xf32>
    %cst_23 = arith.constant dense<0.000000e+00> : vector<16x384xf32>
    %45 = tpu.matmul %36, %44, %cst_23 {dimension_numbers = #tpu.dot_dimension_numbers<[1], [0], [0], [1], [0, 0, 1, 1], [], []>} : vector<16x128xf32>, vector<128x384xf32>, vector<16x384xf32> -> vector<16x384xf32>
    %c0_24 = arith.constant 0 : index
    %c0_25 = arith.constant 0 : index
    %c0_26 = arith.constant 0 : index
    %46 = vector.load %arg8[%c0_24, %c0_25, %c0_26] : memref<2x1x384xf32, #tpu.memory_space<vmem>>, vector<1x1x384xf32>
    %47 = vector.shape_cast %46 : vector<1x1x384xf32> to vector<1x384xf32>
    %48 = vector.broadcast %47 : vector<1x384xf32> to vector<16x384xf32>
    %49 = arith.addf %45, %48 : vector<16x384xf32>
    %50 = vector.extract_strided_slice %49 {offsets = [0, 0], sizes = [16, 128], strides = [1, 1]} : vector<16x384xf32> to vector<16x128xf32>
    %51 = vector.extract_strided_slice %49 {offsets = [0, 128], sizes = [16, 128], strides = [1, 1]} : vector<16x384xf32> to vector<16x128xf32>
    %52 = vector.extract_strided_slice %49 {offsets = [0, 256], sizes = [16, 128], strides = [1, 1]} : vector<16x384xf32> to vector<16x128xf32>
    %53 = vector.extract_strided_slice %42 {offsets = [0, 0], sizes = [1, 8], strides = [1, 1]} : vector<2x8xf32> to vector<1x8xf32>
    %54 = vector.extract_strided_slice %50 {offsets = [0, 0], sizes = [8, 64], strides = [1, 1]} : vector<16x128xf32> to vector<8x64xf32>
    %55 = vector.extract_strided_slice %51 {offsets = [0, 0], sizes = [8, 64], strides = [1, 1]} : vector<16x128xf32> to vector<8x64xf32>
    %56 = vector.extract_strided_slice %52 {offsets = [0, 0], sizes = [8, 64], strides = [1, 1]} : vector<16x128xf32> to vector<8x64xf32>
    %cst_27 = arith.constant dense<0.000000e+00> : vector<8x8xf32>
    %57 = tpu.matmul %54, %55, %cst_27 {dimension_numbers = #tpu.dot_dimension_numbers<[1], [1], [0], [0], [0, 0, 1, 0], [], []>} : vector<8x64xf32>, vector<8x64xf32>, vector<8x8xf32> -> vector<8x8xf32>
    %cst_28 = arith.constant 1.250000e-01 : f32
    %58 = vector.broadcast %cst_28 : f32 to vector<8x8xf32>
    %59 = arith.mulf %57, %58 : vector<8x8xf32>
    %60 = vector.broadcast %53 : vector<1x8xf32> to vector<8x8xf32>
    %61 = arith.addf %59, %60 : vector<8x8xf32>
    %cst_29 = arith.constant dense<0xFF800000> : vector<8xf32>
    %62 = vector.multi_reduction <maximumf>, %61, %cst_29 [1] : vector<8x8xf32> to vector<8xf32>
    %63 = vector.shape_cast %62 : vector<8xf32> to vector<8x1xf32>
    %64 = vector.broadcast %63 : vector<8x1xf32> to vector<8x8xf32>
    %65 = arith.subf %61, %64 : vector<8x8xf32>
    %66 = math.exp %65 : vector<8x8xf32>
    %cst_30 = arith.constant dense<0.000000e+00> : vector<8xf32>
    %67 = vector.multi_reduction <add>, %66, %cst_30 [1] : vector<8x8xf32> to vector<8xf32>
    %68 = vector.shape_cast %67 : vector<8xf32> to vector<8x1xf32>
    %69 = tpu.reciprocal %68 {approx = true} : vector<8x1xf32> -> vector<8x1xf32>
    %70 = vector.broadcast %69 : vector<8x1xf32> to vector<8x8xf32>
    %71 = arith.mulf %66, %70 : vector<8x8xf32>
    %cst_31 = arith.constant dense<0.000000e+00> : vector<8x64xf32>
    %72 = tpu.matmul %71, %56, %cst_31 {dimension_numbers = #tpu.dot_dimension_numbers<[1], [0], [0], [1], [0, 0, 1, 1], [], []>} : vector<8x8xf32>, vector<8x64xf32>, vector<8x64xf32> -> vector<8x64xf32>
    %73 = vector.extract_strided_slice %50 {offsets = [0, 64], sizes = [8, 64], strides = [1, 1]} : vector<16x128xf32> to vector<8x64xf32>
    %74 = vector.extract_strided_slice %51 {offsets = [0, 64], sizes = [8, 64], strides = [1, 1]} : vector<16x128xf32> to vector<8x64xf32>
    %75 = vector.extract_strided_slice %52 {offsets = [0, 64], sizes = [8, 64], strides = [1, 1]} : vector<16x128xf32> to vector<8x64xf32>
    %cst_32 = arith.constant dense<0.000000e+00> : vector<8x8xf32>
    %76 = tpu.matmul %73, %74, %cst_32 {dimension_numbers = #tpu.dot_dimension_numbers<[1], [1], [0], [0], [0, 0, 1, 0], [], []>} : vector<8x64xf32>, vector<8x64xf32>, vector<8x8xf32> -> vector<8x8xf32>
    %cst_33 = arith.constant 1.250000e-01 : f32
    %77 = vector.broadcast %cst_33 : f32 to vector<8x8xf32>
    %78 = arith.mulf %76, %77 : vector<8x8xf32>
    %79 = vector.broadcast %53 : vector<1x8xf32> to vector<8x8xf32>
    %80 = arith.addf %78, %79 : vector<8x8xf32>
    %cst_34 = arith.constant dense<0xFF800000> : vector<8xf32>
    %81 = vector.multi_reduction <maximumf>, %80, %cst_34 [1] : vector<8x8xf32> to vector<8xf32>
    %82 = vector.shape_cast %81 : vector<8xf32> to vector<8x1xf32>
    %83 = vector.broadcast %82 : vector<8x1xf32> to vector<8x8xf32>
    %84 = arith.subf %80, %83 : vector<8x8xf32>
    %85 = math.exp %84 : vector<8x8xf32>
    %cst_35 = arith.constant dense<0.000000e+00> : vector<8xf32>
    %86 = vector.multi_reduction <add>, %85, %cst_35 [1] : vector<8x8xf32> to vector<8xf32>
    %87 = vector.shape_cast %86 : vector<8xf32> to vector<8x1xf32>
    %88 = tpu.reciprocal %87 {approx = true} : vector<8x1xf32> -> vector<8x1xf32>
    %89 = vector.broadcast %88 : vector<8x1xf32> to vector<8x8xf32>
    %90 = arith.mulf %85, %89 : vector<8x8xf32>
    %cst_36 = arith.constant dense<0.000000e+00> : vector<8x64xf32>
    %91 = tpu.matmul %90, %75, %cst_36 {dimension_numbers = #tpu.dot_dimension_numbers<[1], [0], [0], [1], [0, 0, 1, 1], [], []>} : vector<8x8xf32>, vector<8x64xf32>, vector<8x64xf32> -> vector<8x64xf32>
    %92 = tpu.concatenate %72, %91 in 1 : vector<8x64xf32>, vector<8x64xf32> -> vector<8x128xf32>
    %93 = vector.extract_strided_slice %42 {offsets = [1, 0], sizes = [1, 8], strides = [1, 1]} : vector<2x8xf32> to vector<1x8xf32>
    %94 = vector.extract_strided_slice %50 {offsets = [8, 0], sizes = [8, 64], strides = [1, 1]} : vector<16x128xf32> to vector<8x64xf32>
    %95 = vector.extract_strided_slice %51 {offsets = [8, 0], sizes = [8, 64], strides = [1, 1]} : vector<16x128xf32> to vector<8x64xf32>
    %96 = vector.extract_strided_slice %52 {offsets = [8, 0], sizes = [8, 64], strides = [1, 1]} : vector<16x128xf32> to vector<8x64xf32>
    %cst_37 = arith.constant dense<0.000000e+00> : vector<8x8xf32>
    %97 = tpu.matmul %94, %95, %cst_37 {dimension_numbers = #tpu.dot_dimension_numbers<[1], [1], [0], [0], [0, 0, 1, 0], [], []>} : vector<8x64xf32>, vector<8x64xf32>, vector<8x8xf32> -> vector<8x8xf32>
    %cst_38 = arith.constant 1.250000e-01 : f32
    %98 = vector.broadcast %cst_38 : f32 to vector<8x8xf32>
    %99 = arith.mulf %97, %98 : vector<8x8xf32>
    %100 = vector.broadcast %93 : vector<1x8xf32> to vector<8x8xf32>
    %101 = arith.addf %99, %100 : vector<8x8xf32>
    %cst_39 = arith.constant dense<0xFF800000> : vector<8xf32>
    %102 = vector.multi_reduction <maximumf>, %101, %cst_39 [1] : vector<8x8xf32> to vector<8xf32>
    %103 = vector.shape_cast %102 : vector<8xf32> to vector<8x1xf32>
    %104 = vector.broadcast %103 : vector<8x1xf32> to vector<8x8xf32>
    %105 = arith.subf %101, %104 : vector<8x8xf32>
    %106 = math.exp %105 : vector<8x8xf32>
    %cst_40 = arith.constant dense<0.000000e+00> : vector<8xf32>
    %107 = vector.multi_reduction <add>, %106, %cst_40 [1] : vector<8x8xf32> to vector<8xf32>
    %108 = vector.shape_cast %107 : vector<8xf32> to vector<8x1xf32>
    %109 = tpu.reciprocal %108 {approx = true} : vector<8x1xf32> -> vector<8x1xf32>
    %110 = vector.broadcast %109 : vector<8x1xf32> to vector<8x8xf32>
    %111 = arith.mulf %106, %110 : vector<8x8xf32>
    %cst_41 = arith.constant dense<0.000000e+00> : vector<8x64xf32>
    %112 = tpu.matmul %111, %96, %cst_41 {dimension_numbers = #tpu.dot_dimension_numbers<[1], [0], [0], [1], [0, 0, 1, 1], [], []>} : vector<8x8xf32>, vector<8x64xf32>, vector<8x64xf32> -> vector<8x64xf32>
    %113 = vector.extract_strided_slice %50 {offsets = [8, 64], sizes = [8, 64], strides = [1, 1]} : vector<16x128xf32> to vector<8x64xf32>
    %114 = vector.extract_strided_slice %51 {offsets = [8, 64], sizes = [8, 64], strides = [1, 1]} : vector<16x128xf32> to vector<8x64xf32>
    %115 = vector.extract_strided_slice %52 {offsets = [8, 64], sizes = [8, 64], strides = [1, 1]} : vector<16x128xf32> to vector<8x64xf32>
    %cst_42 = arith.constant dense<0.000000e+00> : vector<8x8xf32>
    %116 = tpu.matmul %113, %114, %cst_42 {dimension_numbers = #tpu.dot_dimension_numbers<[1], [1], [0], [0], [0, 0, 1, 0], [], []>} : vector<8x64xf32>, vector<8x64xf32>, vector<8x8xf32> -> vector<8x8xf32>
    %cst_43 = arith.constant 1.250000e-01 : f32
    %117 = vector.broadcast %cst_43 : f32 to vector<8x8xf32>
    %118 = arith.mulf %116, %117 : vector<8x8xf32>
    %119 = vector.broadcast %93 : vector<1x8xf32> to vector<8x8xf32>
    %120 = arith.addf %118, %119 : vector<8x8xf32>
    %cst_44 = arith.constant dense<0xFF800000> : vector<8xf32>
    %121 = vector.multi_reduction <maximumf>, %120, %cst_44 [1] : vector<8x8xf32> to vector<8xf32>
    %122 = vector.shape_cast %121 : vector<8xf32> to vector<8x1xf32>
    %123 = vector.broadcast %122 : vector<8x1xf32> to vector<8x8xf32>
    %124 = arith.subf %120, %123 : vector<8x8xf32>
    %125 = math.exp %124 : vector<8x8xf32>
    %cst_45 = arith.constant dense<0.000000e+00> : vector<8xf32>
    %126 = vector.multi_reduction <add>, %125, %cst_45 [1] : vector<8x8xf32> to vector<8xf32>
    %127 = vector.shape_cast %126 : vector<8xf32> to vector<8x1xf32>
    %128 = tpu.reciprocal %127 {approx = true} : vector<8x1xf32> -> vector<8x1xf32>
    %129 = vector.broadcast %128 : vector<8x1xf32> to vector<8x8xf32>
    %130 = arith.mulf %125, %129 : vector<8x8xf32>
    %cst_46 = arith.constant dense<0.000000e+00> : vector<8x64xf32>
    %131 = tpu.matmul %130, %115, %cst_46 {dimension_numbers = #tpu.dot_dimension_numbers<[1], [0], [0], [1], [0, 0, 1, 1], [], []>} : vector<8x8xf32>, vector<8x64xf32>, vector<8x64xf32> -> vector<8x64xf32>
    %132 = tpu.concatenate %112, %131 in 1 : vector<8x64xf32>, vector<8x64xf32> -> vector<8x128xf32>
    %133 = tpu.concatenate %92, %132 in 0 : vector<8x128xf32>, vector<8x128xf32> -> vector<16x128xf32>
    %c0_47 = arith.constant 0 : index
    %c0_48 = arith.constant 0 : index
    %c0_49 = arith.constant 0 : index
    %134 = vector.load %arg9[%c0_47, %c0_48, %c0_49] : memref<2x128x128xf32, #tpu.memory_space<vmem>>, vector<1x128x128xf32>
    %135 = vector.shape_cast %134 : vector<1x128x128xf32> to vector<128x128xf32>
    %cst_50 = arith.constant dense<0.000000e+00> : vector<16x128xf32>
    %136 = tpu.matmul %133, %135, %cst_50 {dimension_numbers = #tpu.dot_dimension_numbers<[1], [0], [0], [1], [0, 0, 1, 1], [], []>} : vector<16x128xf32>, vector<128x128xf32>, vector<16x128xf32> -> vector<16x128xf32>
    %c0_51 = arith.constant 0 : index
    %c0_52 = arith.constant 0 : index
    %c0_53 = arith.constant 0 : index
    %137 = vector.load %arg10[%c0_51, %c0_52, %c0_53] : memref<2x1x128xf32, #tpu.memory_space<vmem>>, vector<1x1x128xf32>
    %138 = vector.shape_cast %137 : vector<1x1x128xf32> to vector<1x128xf32>
    %139 = vector.broadcast %138 : vector<1x128xf32> to vector<16x128xf32>
    %140 = arith.addf %136, %139 : vector<16x128xf32>
    %141 = arith.addf %140, %36 : vector<16x128xf32>
    %c0_54 = arith.constant 0 : index
    %c0_55 = arith.constant 0 : index
    %c0_56 = arith.constant 0 : index
    %142 = vector.load %arg11[%c0_54, %c0_55, %c0_56] : memref<2x1x128xf32, #tpu.memory_space<vmem>>, vector<1x1x128xf32>
    %143 = vector.shape_cast %142 : vector<1x1x128xf32> to vector<1x128xf32>
    %c0_57 = arith.constant 0 : index
    %c0_58 = arith.constant 0 : index
    %c0_59 = arith.constant 0 : index
    %144 = vector.load %arg12[%c0_57, %c0_58, %c0_59] : memref<2x1x128xf32, #tpu.memory_space<vmem>>, vector<1x1x128xf32>
    %145 = vector.shape_cast %144 : vector<1x1x128xf32> to vector<1x128xf32>
    %cst_60 = arith.constant dense<0.000000e+00> : vector<16xf32>
    %146 = vector.multi_reduction <add>, %141, %cst_60 [1] : vector<16x128xf32> to vector<16xf32>
    %147 = vector.shape_cast %146 : vector<16xf32> to vector<16x1xf32>
    %cst_61 = arith.constant 1.280000e+02 : f32
    %148 = vector.broadcast %cst_61 : f32 to vector<16x1xf32>
    %149 = arith.divf %147, %148 : vector<16x1xf32>
    %150 = vector.broadcast %149 : vector<16x1xf32> to vector<16x128xf32>
    %151 = arith.subf %141, %150 : vector<16x128xf32>
    %152 = arith.mulf %151, %151 : vector<16x128xf32>
    %cst_62 = arith.constant dense<0.000000e+00> : vector<16xf32>
    %153 = vector.multi_reduction <add>, %152, %cst_62 [1] : vector<16x128xf32> to vector<16xf32>
    %154 = vector.shape_cast %153 : vector<16xf32> to vector<16x1xf32>
    %cst_63 = arith.constant 1.280000e+02 : f32
    %155 = vector.broadcast %cst_63 : f32 to vector<16x1xf32>
    %156 = arith.divf %154, %155 : vector<16x1xf32>
    %cst_64 = arith.constant 9.99999996E-13 : f32
    %157 = vector.broadcast %cst_64 : f32 to vector<16x1xf32>
    %158 = arith.addf %156, %157 : vector<16x1xf32>
    %159 = math.rsqrt %158 : vector<16x1xf32>
    %160 = vector.broadcast %159 : vector<16x1xf32> to vector<16x128xf32>
    %161 = arith.mulf %151, %160 : vector<16x128xf32>
    %162 = vector.broadcast %143 : vector<1x128xf32> to vector<16x128xf32>
    %163 = arith.mulf %161, %162 : vector<16x128xf32>
    %164 = vector.broadcast %145 : vector<1x128xf32> to vector<16x128xf32>
    %165 = arith.addf %163, %164 : vector<16x128xf32>
    %c0_65 = arith.constant 0 : index
    %c0_66 = arith.constant 0 : index
    %c0_67 = arith.constant 0 : index
    %166 = vector.load %arg13[%c0_65, %c0_66, %c0_67] : memref<2x128x512xf32, #tpu.memory_space<vmem>>, vector<1x128x512xf32>
    %167 = vector.shape_cast %166 : vector<1x128x512xf32> to vector<128x512xf32>
    %cst_68 = arith.constant dense<0.000000e+00> : vector<16x512xf32>
    %168 = tpu.matmul %165, %167, %cst_68 {dimension_numbers = #tpu.dot_dimension_numbers<[1], [0], [0], [1], [0, 0, 1, 1], [], []>} : vector<16x128xf32>, vector<128x512xf32>, vector<16x512xf32> -> vector<16x512xf32>
    %c0_69 = arith.constant 0 : index
    %c0_70 = arith.constant 0 : index
    %c0_71 = arith.constant 0 : index
    %169 = vector.load %arg14[%c0_69, %c0_70, %c0_71] : memref<2x1x512xf32, #tpu.memory_space<vmem>>, vector<1x1x512xf32>
    %170 = vector.shape_cast %169 : vector<1x1x512xf32> to vector<1x512xf32>
    %171 = vector.broadcast %170 : vector<1x512xf32> to vector<16x512xf32>
    %172 = arith.addf %168, %171 : vector<16x512xf32>
    %173 = arith.mulf %172, %172 : vector<16x512xf32>
    %174 = arith.mulf %172, %173 : vector<16x512xf32>
    %cst_72 = arith.constant 4.471500e-02 : f32
    %175 = vector.broadcast %cst_72 : f32 to vector<16x512xf32>
    %176 = arith.mulf %175, %174 : vector<16x512xf32>
    %177 = arith.addf %172, %176 : vector<16x512xf32>
    %cst_73 = arith.constant 0.797884583 : f32
    %178 = vector.broadcast %cst_73 : f32 to vector<16x512xf32>
    %179 = arith.mulf %178, %177 : vector<16x512xf32>
    %180 = math.tanh %179 : vector<16x512xf32>
    %cst_74 = arith.constant 1.000000e+00 : f32
    %181 = vector.broadcast %cst_74 : f32 to vector<16x512xf32>
    %182 = arith.addf %181, %180 : vector<16x512xf32>
    %cst_75 = arith.constant 5.000000e-01 : f32
    %183 = vector.broadcast %cst_75 : f32 to vector<16x512xf32>
    %184 = arith.mulf %183, %182 : vector<16x512xf32>
    %185 = arith.mulf %172, %184 : vector<16x512xf32>
    %c0_76 = arith.constant 0 : index
    %c0_77 = arith.constant 0 : index
    %c0_78 = arith.constant 0 : index
    %186 = vector.load %arg15[%c0_76, %c0_77, %c0_78] : memref<2x512x128xf32, #tpu.memory_space<vmem>>, vector<1x512x128xf32>
    %187 = vector.shape_cast %186 : vector<1x512x128xf32> to vector<512x128xf32>
    %cst_79 = arith.constant dense<0.000000e+00> : vector<16x128xf32>
    %188 = tpu.matmul %185, %187, %cst_79 {dimension_numbers = #tpu.dot_dimension_numbers<[1], [0], [0], [1], [0, 0, 1, 1], [], []>} : vector<16x512xf32>, vector<512x128xf32>, vector<16x128xf32> -> vector<16x128xf32>
    %c0_80 = arith.constant 0 : index
    %c0_81 = arith.constant 0 : index
    %c0_82 = arith.constant 0 : index
    %189 = vector.load %arg16[%c0_80, %c0_81, %c0_82] : memref<2x1x128xf32, #tpu.memory_space<vmem>>, vector<1x1x128xf32>
    %190 = vector.shape_cast %189 : vector<1x1x128xf32> to vector<1x128xf32>
    %191 = vector.broadcast %190 : vector<1x128xf32> to vector<16x128xf32>
    %192 = arith.addf %188, %191 : vector<16x128xf32>
    %193 = arith.addf %192, %165 : vector<16x128xf32>
    %c0_83 = arith.constant 0 : index
    %c0_84 = arith.constant 0 : index
    %c0_85 = arith.constant 0 : index
    %194 = vector.load %arg17[%c0_83, %c0_84, %c0_85] : memref<2x1x128xf32, #tpu.memory_space<vmem>>, vector<1x1x128xf32>
    %195 = vector.shape_cast %194 : vector<1x1x128xf32> to vector<1x128xf32>
    %c0_86 = arith.constant 0 : index
    %c0_87 = arith.constant 0 : index
    %c0_88 = arith.constant 0 : index
    %196 = vector.load %arg18[%c0_86, %c0_87, %c0_88] : memref<2x1x128xf32, #tpu.memory_space<vmem>>, vector<1x1x128xf32>
    %197 = vector.shape_cast %196 : vector<1x1x128xf32> to vector<1x128xf32>
    %cst_89 = arith.constant dense<0.000000e+00> : vector<16xf32>
    %198 = vector.multi_reduction <add>, %193, %cst_89 [1] : vector<16x128xf32> to vector<16xf32>
    %199 = vector.shape_cast %198 : vector<16xf32> to vector<16x1xf32>
    %cst_90 = arith.constant 1.280000e+02 : f32
    %200 = vector.broadcast %cst_90 : f32 to vector<16x1xf32>
    %201 = arith.divf %199, %200 : vector<16x1xf32>
    %202 = vector.broadcast %201 : vector<16x1xf32> to vector<16x128xf32>
    %203 = arith.subf %193, %202 : vector<16x128xf32>
    %204 = arith.mulf %203, %203 : vector<16x128xf32>
    %cst_91 = arith.constant dense<0.000000e+00> : vector<16xf32>
    %205 = vector.multi_reduction <add>, %204, %cst_91 [1] : vector<16x128xf32> to vector<16xf32>
    %206 = vector.shape_cast %205 : vector<16xf32> to vector<16x1xf32>
    %cst_92 = arith.constant 1.280000e+02 : f32
    %207 = vector.broadcast %cst_92 : f32 to vector<16x1xf32>
    %208 = arith.divf %206, %207 : vector<16x1xf32>
    %cst_93 = arith.constant 9.99999996E-13 : f32
    %209 = vector.broadcast %cst_93 : f32 to vector<16x1xf32>
    %210 = arith.addf %208, %209 : vector<16x1xf32>
    %211 = math.rsqrt %210 : vector<16x1xf32>
    %212 = vector.broadcast %211 : vector<16x1xf32> to vector<16x128xf32>
    %213 = arith.mulf %203, %212 : vector<16x128xf32>
    %214 = vector.broadcast %195 : vector<1x128xf32> to vector<16x128xf32>
    %215 = arith.mulf %213, %214 : vector<16x128xf32>
    %216 = vector.broadcast %197 : vector<1x128xf32> to vector<16x128xf32>
    %217 = arith.addf %215, %216 : vector<16x128xf32>
    %c1 = arith.constant 1 : index
    %c0_94 = arith.constant 0 : index
    %c0_95 = arith.constant 0 : index
    %218 = vector.load %arg7[%c1, %c0_94, %c0_95] : memref<2x128x384xf32, #tpu.memory_space<vmem>>, vector<1x128x384xf32>
    %219 = vector.shape_cast %218 : vector<1x128x384xf32> to vector<128x384xf32>
    %cst_96 = arith.constant dense<0.000000e+00> : vector<16x384xf32>
    %220 = tpu.matmul %217, %219, %cst_96 {dimension_numbers = #tpu.dot_dimension_numbers<[1], [0], [0], [1], [0, 0, 1, 1], [], []>} : vector<16x128xf32>, vector<128x384xf32>, vector<16x384xf32> -> vector<16x384xf32>
    %c1_97 = arith.constant 1 : index
    %c0_98 = arith.constant 0 : index
    %c0_99 = arith.constant 0 : index
    %221 = vector.load %arg8[%c1_97, %c0_98, %c0_99] : memref<2x1x384xf32, #tpu.memory_space<vmem>>, vector<1x1x384xf32>
    %222 = vector.shape_cast %221 : vector<1x1x384xf32> to vector<1x384xf32>
    %223 = vector.broadcast %222 : vector<1x384xf32> to vector<16x384xf32>
    %224 = arith.addf %220, %223 : vector<16x384xf32>
    %225 = vector.extract_strided_slice %224 {offsets = [0, 0], sizes = [16, 128], strides = [1, 1]} : vector<16x384xf32> to vector<16x128xf32>
    %226 = vector.extract_strided_slice %224 {offsets = [0, 128], sizes = [16, 128], strides = [1, 1]} : vector<16x384xf32> to vector<16x128xf32>
    %227 = vector.extract_strided_slice %224 {offsets = [0, 256], sizes = [16, 128], strides = [1, 1]} : vector<16x384xf32> to vector<16x128xf32>
    %228 = vector.extract_strided_slice %42 {offsets = [0, 0], sizes = [1, 8], strides = [1, 1]} : vector<2x8xf32> to vector<1x8xf32>
    %229 = vector.extract_strided_slice %225 {offsets = [0, 0], sizes = [8, 64], strides = [1, 1]} : vector<16x128xf32> to vector<8x64xf32>
    %230 = vector.extract_strided_slice %226 {offsets = [0, 0], sizes = [8, 64], strides = [1, 1]} : vector<16x128xf32> to vector<8x64xf32>
    %231 = vector.extract_strided_slice %227 {offsets = [0, 0], sizes = [8, 64], strides = [1, 1]} : vector<16x128xf32> to vector<8x64xf32>
    %cst_100 = arith.constant dense<0.000000e+00> : vector<8x8xf32>
    %232 = tpu.matmul %229, %230, %cst_100 {dimension_numbers = #tpu.dot_dimension_numbers<[1], [1], [0], [0], [0, 0, 1, 0], [], []>} : vector<8x64xf32>, vector<8x64xf32>, vector<8x8xf32> -> vector<8x8xf32>
    %cst_101 = arith.constant 1.250000e-01 : f32
    %233 = vector.broadcast %cst_101 : f32 to vector<8x8xf32>
    %234 = arith.mulf %232, %233 : vector<8x8xf32>
    %235 = vector.broadcast %228 : vector<1x8xf32> to vector<8x8xf32>
    %236 = arith.addf %234, %235 : vector<8x8xf32>
    %cst_102 = arith.constant dense<0xFF800000> : vector<8xf32>
    %237 = vector.multi_reduction <maximumf>, %236, %cst_102 [1] : vector<8x8xf32> to vector<8xf32>
    %238 = vector.shape_cast %237 : vector<8xf32> to vector<8x1xf32>
    %239 = vector.broadcast %238 : vector<8x1xf32> to vector<8x8xf32>
    %240 = arith.subf %236, %239 : vector<8x8xf32>
    %241 = math.exp %240 : vector<8x8xf32>
    %cst_103 = arith.constant dense<0.000000e+00> : vector<8xf32>
    %242 = vector.multi_reduction <add>, %241, %cst_103 [1] : vector<8x8xf32> to vector<8xf32>
    %243 = vector.shape_cast %242 : vector<8xf32> to vector<8x1xf32>
    %244 = tpu.reciprocal %243 {approx = true} : vector<8x1xf32> -> vector<8x1xf32>
    %245 = vector.broadcast %244 : vector<8x1xf32> to vector<8x8xf32>
    %246 = arith.mulf %241, %245 : vector<8x8xf32>
    %cst_104 = arith.constant dense<0.000000e+00> : vector<8x64xf32>
    %247 = tpu.matmul %246, %231, %cst_104 {dimension_numbers = #tpu.dot_dimension_numbers<[1], [0], [0], [1], [0, 0, 1, 1], [], []>} : vector<8x8xf32>, vector<8x64xf32>, vector<8x64xf32> -> vector<8x64xf32>
    %248 = vector.extract_strided_slice %225 {offsets = [0, 64], sizes = [8, 64], strides = [1, 1]} : vector<16x128xf32> to vector<8x64xf32>
    %249 = vector.extract_strided_slice %226 {offsets = [0, 64], sizes = [8, 64], strides = [1, 1]} : vector<16x128xf32> to vector<8x64xf32>
    %250 = vector.extract_strided_slice %227 {offsets = [0, 64], sizes = [8, 64], strides = [1, 1]} : vector<16x128xf32> to vector<8x64xf32>
    %cst_105 = arith.constant dense<0.000000e+00> : vector<8x8xf32>
    %251 = tpu.matmul %248, %249, %cst_105 {dimension_numbers = #tpu.dot_dimension_numbers<[1], [1], [0], [0], [0, 0, 1, 0], [], []>} : vector<8x64xf32>, vector<8x64xf32>, vector<8x8xf32> -> vector<8x8xf32>
    %cst_106 = arith.constant 1.250000e-01 : f32
    %252 = vector.broadcast %cst_106 : f32 to vector<8x8xf32>
    %253 = arith.mulf %251, %252 : vector<8x8xf32>
    %254 = vector.broadcast %228 : vector<1x8xf32> to vector<8x8xf32>
    %255 = arith.addf %253, %254 : vector<8x8xf32>
    %cst_107 = arith.constant dense<0xFF800000> : vector<8xf32>
    %256 = vector.multi_reduction <maximumf>, %255, %cst_107 [1] : vector<8x8xf32> to vector<8xf32>
    %257 = vector.shape_cast %256 : vector<8xf32> to vector<8x1xf32>
    %258 = vector.broadcast %257 : vector<8x1xf32> to vector<8x8xf32>
    %259 = arith.subf %255, %258 : vector<8x8xf32>
    %260 = math.exp %259 : vector<8x8xf32>
    %cst_108 = arith.constant dense<0.000000e+00> : vector<8xf32>
    %261 = vector.multi_reduction <add>, %260, %cst_108 [1] : vector<8x8xf32> to vector<8xf32>
    %262 = vector.shape_cast %261 : vector<8xf32> to vector<8x1xf32>
    %263 = tpu.reciprocal %262 {approx = true} : vector<8x1xf32> -> vector<8x1xf32>
    %264 = vector.broadcast %263 : vector<8x1xf32> to vector<8x8xf32>
    %265 = arith.mulf %260, %264 : vector<8x8xf32>
    %cst_109 = arith.constant dense<0.000000e+00> : vector<8x64xf32>
    %266 = tpu.matmul %265, %250, %cst_109 {dimension_numbers = #tpu.dot_dimension_numbers<[1], [0], [0], [1], [0, 0, 1, 1], [], []>} : vector<8x8xf32>, vector<8x64xf32>, vector<8x64xf32> -> vector<8x64xf32>
    %267 = tpu.concatenate %247, %266 in 1 : vector<8x64xf32>, vector<8x64xf32> -> vector<8x128xf32>
    %268 = vector.extract_strided_slice %42 {offsets = [1, 0], sizes = [1, 8], strides = [1, 1]} : vector<2x8xf32> to vector<1x8xf32>
    %269 = vector.extract_strided_slice %225 {offsets = [8, 0], sizes = [8, 64], strides = [1, 1]} : vector<16x128xf32> to vector<8x64xf32>
    %270 = vector.extract_strided_slice %226 {offsets = [8, 0], sizes = [8, 64], strides = [1, 1]} : vector<16x128xf32> to vector<8x64xf32>
    %271 = vector.extract_strided_slice %227 {offsets = [8, 0], sizes = [8, 64], strides = [1, 1]} : vector<16x128xf32> to vector<8x64xf32>
    %cst_110 = arith.constant dense<0.000000e+00> : vector<8x8xf32>
    %272 = tpu.matmul %269, %270, %cst_110 {dimension_numbers = #tpu.dot_dimension_numbers<[1], [1], [0], [0], [0, 0, 1, 0], [], []>} : vector<8x64xf32>, vector<8x64xf32>, vector<8x8xf32> -> vector<8x8xf32>
    %cst_111 = arith.constant 1.250000e-01 : f32
    %273 = vector.broadcast %cst_111 : f32 to vector<8x8xf32>
    %274 = arith.mulf %272, %273 : vector<8x8xf32>
    %275 = vector.broadcast %268 : vector<1x8xf32> to vector<8x8xf32>
    %276 = arith.addf %274, %275 : vector<8x8xf32>
    %cst_112 = arith.constant dense<0xFF800000> : vector<8xf32>
    %277 = vector.multi_reduction <maximumf>, %276, %cst_112 [1] : vector<8x8xf32> to vector<8xf32>
    %278 = vector.shape_cast %277 : vector<8xf32> to vector<8x1xf32>
    %279 = vector.broadcast %278 : vector<8x1xf32> to vector<8x8xf32>
    %280 = arith.subf %276, %279 : vector<8x8xf32>
    %281 = math.exp %280 : vector<8x8xf32>
    %cst_113 = arith.constant dense<0.000000e+00> : vector<8xf32>
    %282 = vector.multi_reduction <add>, %281, %cst_113 [1] : vector<8x8xf32> to vector<8xf32>
    %283 = vector.shape_cast %282 : vector<8xf32> to vector<8x1xf32>
    %284 = tpu.reciprocal %283 {approx = true} : vector<8x1xf32> -> vector<8x1xf32>
    %285 = vector.broadcast %284 : vector<8x1xf32> to vector<8x8xf32>
    %286 = arith.mulf %281, %285 : vector<8x8xf32>
    %cst_114 = arith.constant dense<0.000000e+00> : vector<8x64xf32>
    %287 = tpu.matmul %286, %271, %cst_114 {dimension_numbers = #tpu.dot_dimension_numbers<[1], [0], [0], [1], [0, 0, 1, 1], [], []>} : vector<8x8xf32>, vector<8x64xf32>, vector<8x64xf32> -> vector<8x64xf32>
    %288 = vector.extract_strided_slice %225 {offsets = [8, 64], sizes = [8, 64], strides = [1, 1]} : vector<16x128xf32> to vector<8x64xf32>
    %289 = vector.extract_strided_slice %226 {offsets = [8, 64], sizes = [8, 64], strides = [1, 1]} : vector<16x128xf32> to vector<8x64xf32>
    %290 = vector.extract_strided_slice %227 {offsets = [8, 64], sizes = [8, 64], strides = [1, 1]} : vector<16x128xf32> to vector<8x64xf32>
    %cst_115 = arith.constant dense<0.000000e+00> : vector<8x8xf32>
    %291 = tpu.matmul %288, %289, %cst_115 {dimension_numbers = #tpu.dot_dimension_numbers<[1], [1], [0], [0], [0, 0, 1, 0], [], []>} : vector<8x64xf32>, vector<8x64xf32>, vector<8x8xf32> -> vector<8x8xf32>
    %cst_116 = arith.constant 1.250000e-01 : f32
    %292 = vector.broadcast %cst_116 : f32 to vector<8x8xf32>
    %293 = arith.mulf %291, %292 : vector<8x8xf32>
    %294 = vector.broadcast %268 : vector<1x8xf32> to vector<8x8xf32>
    %295 = arith.addf %293, %294 : vector<8x8xf32>
    %cst_117 = arith.constant dense<0xFF800000> : vector<8xf32>
    %296 = vector.multi_reduction <maximumf>, %295, %cst_117 [1] : vector<8x8xf32> to vector<8xf32>
    %297 = vector.shape_cast %296 : vector<8xf32> to vector<8x1xf32>
    %298 = vector.broadcast %297 : vector<8x1xf32> to vector<8x8xf32>
    %299 = arith.subf %295, %298 : vector<8x8xf32>
    %300 = math.exp %299 : vector<8x8xf32>
    %cst_118 = arith.constant dense<0.000000e+00> : vector<8xf32>
    %301 = vector.multi_reduction <add>, %300, %cst_118 [1] : vector<8x8xf32> to vector<8xf32>
    %302 = vector.shape_cast %301 : vector<8xf32> to vector<8x1xf32>
    %303 = tpu.reciprocal %302 {approx = true} : vector<8x1xf32> -> vector<8x1xf32>
    %304 = vector.broadcast %303 : vector<8x1xf32> to vector<8x8xf32>
    %305 = arith.mulf %300, %304 : vector<8x8xf32>
    %cst_119 = arith.constant dense<0.000000e+00> : vector<8x64xf32>
    %306 = tpu.matmul %305, %290, %cst_119 {dimension_numbers = #tpu.dot_dimension_numbers<[1], [0], [0], [1], [0, 0, 1, 1], [], []>} : vector<8x8xf32>, vector<8x64xf32>, vector<8x64xf32> -> vector<8x64xf32>
    %307 = tpu.concatenate %287, %306 in 1 : vector<8x64xf32>, vector<8x64xf32> -> vector<8x128xf32>
    %308 = tpu.concatenate %267, %307 in 0 : vector<8x128xf32>, vector<8x128xf32> -> vector<16x128xf32>
    %c1_120 = arith.constant 1 : index
    %c0_121 = arith.constant 0 : index
    %c0_122 = arith.constant 0 : index
    %309 = vector.load %arg9[%c1_120, %c0_121, %c0_122] : memref<2x128x128xf32, #tpu.memory_space<vmem>>, vector<1x128x128xf32>
    %310 = vector.shape_cast %309 : vector<1x128x128xf32> to vector<128x128xf32>
    %cst_123 = arith.constant dense<0.000000e+00> : vector<16x128xf32>
    %311 = tpu.matmul %308, %310, %cst_123 {dimension_numbers = #tpu.dot_dimension_numbers<[1], [0], [0], [1], [0, 0, 1, 1], [], []>} : vector<16x128xf32>, vector<128x128xf32>, vector<16x128xf32> -> vector<16x128xf32>
    %c1_124 = arith.constant 1 : index
    %c0_125 = arith.constant 0 : index
    %c0_126 = arith.constant 0 : index
    %312 = vector.load %arg10[%c1_124, %c0_125, %c0_126] : memref<2x1x128xf32, #tpu.memory_space<vmem>>, vector<1x1x128xf32>
    %313 = vector.shape_cast %312 : vector<1x1x128xf32> to vector<1x128xf32>
    %314 = vector.broadcast %313 : vector<1x128xf32> to vector<16x128xf32>
    %315 = arith.addf %311, %314 : vector<16x128xf32>
    %316 = arith.addf %315, %217 : vector<16x128xf32>
    %c1_127 = arith.constant 1 : index
    %c0_128 = arith.constant 0 : index
    %c0_129 = arith.constant 0 : index
    %317 = vector.load %arg11[%c1_127, %c0_128, %c0_129] : memref<2x1x128xf32, #tpu.memory_space<vmem>>, vector<1x1x128xf32>
    %318 = vector.shape_cast %317 : vector<1x1x128xf32> to vector<1x128xf32>
    %c1_130 = arith.constant 1 : index
    %c0_131 = arith.constant 0 : index
    %c0_132 = arith.constant 0 : index
    %319 = vector.load %arg12[%c1_130, %c0_131, %c0_132] : memref<2x1x128xf32, #tpu.memory_space<vmem>>, vector<1x1x128xf32>
    %320 = vector.shape_cast %319 : vector<1x1x128xf32> to vector<1x128xf32>
    %cst_133 = arith.constant dense<0.000000e+00> : vector<16xf32>
    %321 = vector.multi_reduction <add>, %316, %cst_133 [1] : vector<16x128xf32> to vector<16xf32>
    %322 = vector.shape_cast %321 : vector<16xf32> to vector<16x1xf32>
    %cst_134 = arith.constant 1.280000e+02 : f32
    %323 = vector.broadcast %cst_134 : f32 to vector<16x1xf32>
    %324 = arith.divf %322, %323 : vector<16x1xf32>
    %325 = vector.broadcast %324 : vector<16x1xf32> to vector<16x128xf32>
    %326 = arith.subf %316, %325 : vector<16x128xf32>
    %327 = arith.mulf %326, %326 : vector<16x128xf32>
    %cst_135 = arith.constant dense<0.000000e+00> : vector<16xf32>
    %328 = vector.multi_reduction <add>, %327, %cst_135 [1] : vector<16x128xf32> to vector<16xf32>
    %329 = vector.shape_cast %328 : vector<16xf32> to vector<16x1xf32>
    %cst_136 = arith.constant 1.280000e+02 : f32
    %330 = vector.broadcast %cst_136 : f32 to vector<16x1xf32>
    %331 = arith.divf %329, %330 : vector<16x1xf32>
    %cst_137 = arith.constant 9.99999996E-13 : f32
    %332 = vector.broadcast %cst_137 : f32 to vector<16x1xf32>
    %333 = arith.addf %331, %332 : vector<16x1xf32>
    %334 = math.rsqrt %333 : vector<16x1xf32>
    %335 = vector.broadcast %334 : vector<16x1xf32> to vector<16x128xf32>
    %336 = arith.mulf %326, %335 : vector<16x128xf32>
    %337 = vector.broadcast %318 : vector<1x128xf32> to vector<16x128xf32>
    %338 = arith.mulf %336, %337 : vector<16x128xf32>
    %339 = vector.broadcast %320 : vector<1x128xf32> to vector<16x128xf32>
    %340 = arith.addf %338, %339 : vector<16x128xf32>
    %c1_138 = arith.constant 1 : index
    %c0_139 = arith.constant 0 : index
    %c0_140 = arith.constant 0 : index
    %341 = vector.load %arg13[%c1_138, %c0_139, %c0_140] : memref<2x128x512xf32, #tpu.memory_space<vmem>>, vector<1x128x512xf32>
    %342 = vector.shape_cast %341 : vector<1x128x512xf32> to vector<128x512xf32>
    %cst_141 = arith.constant dense<0.000000e+00> : vector<16x512xf32>
    %343 = tpu.matmul %340, %342, %cst_141 {dimension_numbers = #tpu.dot_dimension_numbers<[1], [0], [0], [1], [0, 0, 1, 1], [], []>} : vector<16x128xf32>, vector<128x512xf32>, vector<16x512xf32> -> vector<16x512xf32>
    %c1_142 = arith.constant 1 : index
    %c0_143 = arith.constant 0 : index
    %c0_144 = arith.constant 0 : index
    %344 = vector.load %arg14[%c1_142, %c0_143, %c0_144] : memref<2x1x512xf32, #tpu.memory_space<vmem>>, vector<1x1x512xf32>
    %345 = vector.shape_cast %344 : vector<1x1x512xf32> to vector<1x512xf32>
    %346 = vector.broadcast %345 : vector<1x512xf32> to vector<16x512xf32>
    %347 = arith.addf %343, %346 : vector<16x512xf32>
    %348 = arith.mulf %347, %347 : vector<16x512xf32>
    %349 = arith.mulf %347, %348 : vector<16x512xf32>
    %cst_145 = arith.constant 4.471500e-02 : f32
    %350 = vector.broadcast %cst_145 : f32 to vector<16x512xf32>
    %351 = arith.mulf %350, %349 : vector<16x512xf32>
    %352 = arith.addf %347, %351 : vector<16x512xf32>
    %cst_146 = arith.constant 0.797884583 : f32
    %353 = vector.broadcast %cst_146 : f32 to vector<16x512xf32>
    %354 = arith.mulf %353, %352 : vector<16x512xf32>
    %355 = math.tanh %354 : vector<16x512xf32>
    %cst_147 = arith.constant 1.000000e+00 : f32
    %356 = vector.broadcast %cst_147 : f32 to vector<16x512xf32>
    %357 = arith.addf %356, %355 : vector<16x512xf32>
    %cst_148 = arith.constant 5.000000e-01 : f32
    %358 = vector.broadcast %cst_148 : f32 to vector<16x512xf32>
    %359 = arith.mulf %358, %357 : vector<16x512xf32>
    %360 = arith.mulf %347, %359 : vector<16x512xf32>
    %c1_149 = arith.constant 1 : index
    %c0_150 = arith.constant 0 : index
    %c0_151 = arith.constant 0 : index
    %361 = vector.load %arg15[%c1_149, %c0_150, %c0_151] : memref<2x512x128xf32, #tpu.memory_space<vmem>>, vector<1x512x128xf32>
    %362 = vector.shape_cast %361 : vector<1x512x128xf32> to vector<512x128xf32>
    %cst_152 = arith.constant dense<0.000000e+00> : vector<16x128xf32>
    %363 = tpu.matmul %360, %362, %cst_152 {dimension_numbers = #tpu.dot_dimension_numbers<[1], [0], [0], [1], [0, 0, 1, 1], [], []>} : vector<16x512xf32>, vector<512x128xf32>, vector<16x128xf32> -> vector<16x128xf32>
    %c1_153 = arith.constant 1 : index
    %c0_154 = arith.constant 0 : index
    %c0_155 = arith.constant 0 : index
    %364 = vector.load %arg16[%c1_153, %c0_154, %c0_155] : memref<2x1x128xf32, #tpu.memory_space<vmem>>, vector<1x1x128xf32>
    %365 = vector.shape_cast %364 : vector<1x1x128xf32> to vector<1x128xf32>
    %366 = vector.broadcast %365 : vector<1x128xf32> to vector<16x128xf32>
    %367 = arith.addf %363, %366 : vector<16x128xf32>
    %368 = arith.addf %367, %340 : vector<16x128xf32>
    %c1_156 = arith.constant 1 : index
    %c0_157 = arith.constant 0 : index
    %c0_158 = arith.constant 0 : index
    %369 = vector.load %arg17[%c1_156, %c0_157, %c0_158] : memref<2x1x128xf32, #tpu.memory_space<vmem>>, vector<1x1x128xf32>
    %370 = vector.shape_cast %369 : vector<1x1x128xf32> to vector<1x128xf32>
    %c1_159 = arith.constant 1 : index
    %c0_160 = arith.constant 0 : index
    %c0_161 = arith.constant 0 : index
    %371 = vector.load %arg18[%c1_159, %c0_160, %c0_161] : memref<2x1x128xf32, #tpu.memory_space<vmem>>, vector<1x1x128xf32>
    %372 = vector.shape_cast %371 : vector<1x1x128xf32> to vector<1x128xf32>
    %cst_162 = arith.constant dense<0.000000e+00> : vector<16xf32>
    %373 = vector.multi_reduction <add>, %368, %cst_162 [1] : vector<16x128xf32> to vector<16xf32>
    %374 = vector.shape_cast %373 : vector<16xf32> to vector<16x1xf32>
    %cst_163 = arith.constant 1.280000e+02 : f32
    %375 = vector.broadcast %cst_163 : f32 to vector<16x1xf32>
    %376 = arith.divf %374, %375 : vector<16x1xf32>
    %377 = vector.broadcast %376 : vector<16x1xf32> to vector<16x128xf32>
    %378 = arith.subf %368, %377 : vector<16x128xf32>
    %379 = arith.mulf %378, %378 : vector<16x128xf32>
    %cst_164 = arith.constant dense<0.000000e+00> : vector<16xf32>
    %380 = vector.multi_reduction <add>, %379, %cst_164 [1] : vector<16x128xf32> to vector<16xf32>
    %381 = vector.shape_cast %380 : vector<16xf32> to vector<16x1xf32>
    %cst_165 = arith.constant 1.280000e+02 : f32
    %382 = vector.broadcast %cst_165 : f32 to vector<16x1xf32>
    %383 = arith.divf %381, %382 : vector<16x1xf32>
    %cst_166 = arith.constant 9.99999996E-13 : f32
    %384 = vector.broadcast %cst_166 : f32 to vector<16x1xf32>
    %385 = arith.addf %383, %384 : vector<16x1xf32>
    %386 = math.rsqrt %385 : vector<16x1xf32>
    %387 = vector.broadcast %386 : vector<16x1xf32> to vector<16x128xf32>
    %388 = arith.mulf %378, %387 : vector<16x128xf32>
    %389 = vector.broadcast %370 : vector<1x128xf32> to vector<16x128xf32>
    %390 = arith.mulf %388, %389 : vector<16x128xf32>
    %391 = vector.broadcast %372 : vector<1x128xf32> to vector<16x128xf32>
    %392 = arith.addf %390, %391 : vector<16x128xf32>
    %393 = vector.extract_strided_slice %392 {offsets = [0, 0], sizes = [8, 128], strides = [1, 1]} : vector<16x128xf32> to vector<8x128xf32>
    %cst_167 = arith.constant dense<0.000000e+00> : vector<128xf32>
    %394 = vector.multi_reduction <add>, %393, %cst_167 [0] : vector<8x128xf32> to vector<128xf32>
    %395 = vector.shape_cast %394 : vector<128xf32> to vector<1x128xf32>
    %396 = vector.extract_strided_slice %392 {offsets = [8, 0], sizes = [8, 128], strides = [1, 1]} : vector<16x128xf32> to vector<8x128xf32>
    %cst_168 = arith.constant dense<0.000000e+00> : vector<128xf32>
    %397 = vector.multi_reduction <add>, %396, %cst_168 [0] : vector<8x128xf32> to vector<128xf32>
    %398 = vector.shape_cast %397 : vector<128xf32> to vector<1x128xf32>
    %399 = tpu.concatenate %395, %398 in 0 : vector<1x128xf32>, vector<1x128xf32> -> vector<2x128xf32>
    %c0_169 = arith.constant 0 : index
    %c0_170 = arith.constant 0 : index
    %400 = vector.load %arg19[%c0_169, %c0_170] : memref<128x128xf32, #tpu.memory_space<vmem>>, vector<128x128xf32>
    %cst_171 = arith.constant dense<0.000000e+00> : vector<2x128xf32>
    %401 = tpu.matmul %399, %400, %cst_171 {dimension_numbers = #tpu.dot_dimension_numbers<[1], [0], [0], [1], [0, 0, 1, 1], [], []>} : vector<2x128xf32>, vector<128x128xf32>, vector<2x128xf32> -> vector<2x128xf32>
    %c0_172 = arith.constant 0 : index
    %c0_173 = arith.constant 0 : index
    %402 = vector.load %arg20[%c0_172, %c0_173] : memref<1x128xf32, #tpu.memory_space<vmem>>, vector<1x128xf32>
    %403 = vector.broadcast %402 : vector<1x128xf32> to vector<2x128xf32>
    %404 = arith.addf %401, %403 : vector<2x128xf32>
    %405 = math.tanh %404 : vector<2x128xf32>
    %c0_174 = arith.constant 0 : index
    %c0_175 = arith.constant 0 : index
    %406 = vector.load %arg21[%c0_174, %c0_175] : memref<128x3xf32, #tpu.memory_space<vmem>>, vector<128x3xf32>
    %cst_176 = arith.constant dense<0.000000e+00> : vector<2x3xf32>
    %407 = tpu.matmul %405, %406, %cst_176 {dimension_numbers = #tpu.dot_dimension_numbers<[1], [0], [0], [1], [0, 0, 1, 1], [], []>} : vector<2x128xf32>, vector<128x3xf32>, vector<2x3xf32> -> vector<2x3xf32>
    %c0_177 = arith.constant 0 : index
    %c0_178 = arith.constant 0 : index
    %408 = vector.load %arg22[%c0_177, %c0_178] : memref<1x3xf32, #tpu.memory_space<vmem>>, vector<1x3xf32>
    %409 = vector.broadcast %408 : vector<1x3xf32> to vector<2x3xf32>
    %410 = arith.addf %407, %409 : vector<2x3xf32>
    %c0_179 = arith.constant 0 : index
    %c0_180 = arith.constant 0 : index
    %411 = vector.load %arg23[%c0_179, %c0_180] : memref<2x3xf32, #tpu.memory_space<vmem>>, vector<2x3xf32>
    tpu.vector_store %arg23[%c0_179, %c0_180], %410 {strides = array<i32>} : memref<2x3xf32, #tpu.memory_space<vmem>>, vector<2x3xf32>,
    return
  }
}

</mosaic_0001>

<bundles_post_ra>
// kernel: bert_classifier_forward.1
= control target key start
LH: loop header
LB: loop body
LE: loop exit
PB: predicated region body
PF: predicated region fallthrough
CT: control target
= control target key end

     0   :  { %s3746_s0 = inlined_call_operand.vmem [shape: s32[16,1], index: 0, kind: input, shape index: {}]   ;;  %s3747_s1 = inlined_call_operand.hbm [shape: f32[512,128], index: 1, kind: input, shape index: {}]   ;;  %s3748_s2 = inlined_call_operand.vmem [shape: f32[8,128], index: 2, kind: input, shape index: {}]   ;;  %s3749_s3 = inlined_call_operand.vmem [shape: f32[2,128], index: 3, kind: input, shape index: {}]   ;;  %s3750_s4 = inlined_call_operand.vmem [shape: s32[2,8], index: 4, kind: input, shape index: {}]   ;;  %s3751_s5 = inlined_call_operand.vmem [shape: f32[1,128], index: 5, kind: input, shape index: {}]   ;;  %s3752_s6 = inlined_call_operand.hbm [shape: f32[1,128], index: 6, kind: input, shape index: {}]   ;;  %s3753_s7 = inlined_call_operand.hbm [shape: f32[2,128,384], index: 7, kind: input, shape index: {}]   ;;  %s3754_s8 = inlined_call_operand.hbm [shape: f32[2,1,384], index: 8, kind: input, shape index: {}]   ;;  %s3755_s9 = inlined_call_operand.hbm [shape: f32[2,128,128], index: 9, kind: input, shape index: {}]   ;;  %s3756_s10 = inlined_call_operand.hbm [shape: f32[2,1,128], index: 10, kind: input, shape index: {}]   ;;  %s3757_s11 = inlined_call_operand.vmem [shape: f32[2,1,128], index: 11, kind: input, shape index: {}]   ;;  %s3758_s12 = inlined_call_operand.vmem [shape: f32[2,1,128], index: 12, kind: input, shape index: {}]   ;;  %s3759_s13 = inlined_call_operand.hbm [shape: f32[2,128,512], index: 13, kind: input, shape index: {}]   ;;  %s3760_s14 = inlined_call_operand.vmem [shape: f32[2,1,512], index: 14, kind: input, shape index: {}]   ;;  %s3761_s15 = inlined_call_operand.hbm [shape: f32[2,512,128], index: 15, kind: input, shape index: {}]   ;;  %s3762_s16 = inlined_call_operand.hbm [shape: f32[2,1,128], index: 16, kind: input, shape index: {}]   ;;  %s3763_s17 = inlined_call_operand.vmem [shape: f32[2,1,128], index: 17, kind: input, shape index: {}]   ;;  %s3764_s18 = inlined_call_operand.hbm [shape: f32[2,1,128], index: 18, kind: input, shape index: {}]   ;;  %s3765_s19 = inlined_call_operand.vmem [shape: f32[128,128], index: 19, kind: input, shape index: {}]   ;;  %s3766_s20 = inlined_call_operand.hbm [shape: f32[1,128], index: 20, kind: input, shape index: {}]   ;;  %s3767_s21 = inlined_call_operand.vmem [shape: f32[128,3], index: 21, kind: input, shape index: {}]   ;;  %s3768_s22 = inlined_call_operand.hbm [shape: f32[1,3], index: 22, kind: input, shape index: {}]   ;;  %s3769_s23 = inlined_call_operand.hbm [shape: f32[2,3], index: 23, kind: output, shape index: {}]  }
   0x1   :  { %3771 = sst [smem:[#allocation31_spill]] %s3746_s0 }
   0x2   :  { %3772 = sst [smem:[#allocation32_spill]] %s3747_s1 }
   0x3   :  { %3773 = sst [smem:[#allocation33_spill]] %s3748_s2 }
   0x4   :  { %3774 = sst [smem:[#allocation34_spill]] %s3749_s3 }
   0x5   :  { %3775 = sst [smem:[#allocation35_spill]] %s3750_s4 }
   0x6   :  { %3776 = sst [smem:[#allocation36_spill]] %s3751_s5 }
   0x7   :  { %3777 = sst [smem:[#allocation37_spill]] %s3752_s6 }
   0x8   :  { %3778 = sst [smem:[#allocation38_spill]] %s3753_s7 }
   0x9   :  { %3779 = sst [smem:[#allocation39_spill]] %s3769_s23 }
   0xa   :  { %28 = vsyncpa [#allocation3], 0 }
   0xb   :  { %29 = vsyncpa [#allocation6], 0 }
   0xc   :  { %30 = vsyncpa [#allocation9], 0 }
   0xd   :  { %31 = vsyncpa [#allocation12], 0 }
   0xe   :  { %32 = vsyncpa [#allocation15], 0 }
   0xf   :  { %33 = vsyncpa [#allocation18], 0 }
  0x10   :  { %34 = vsyncpa [#allocation21], 0  ;;  %s3780_s24 = sld [smem:[#allocation37_spill]] }
  0x16   :  { %s64_s25 = sshll.u32 %s3780_s24, 4  ;;  %s65_s25 = int_to_ptr.hbm [resolvable:$true] %s64_s25 }
  0x17   :  { %35 = vsyncpa [#allocation4], 0  ;;  %s3046_s5 = smov [#allocation5]   ;;  %s87_s6 = sshll.u32 %s3754_s8, 4  ;;  %s88_s6 = int_to_ptr.hbm [resolvable:$true] %s87_s6 }
  0x18   :  { %s66_s1 = sshll.u32 %s3046_s5, 4  ;;  %s3047_s27 = smov [#allocation8]   ;;  %s67_s1 = int_to_ptr.vmem [resolvable:$true] %s66_s1 }
  0x19   :  { %69 = dma.hbm_to_vmem [thread:$0]  %s65_s25, 16, %s67_s1, [#allocation6]  }
  0x1a   :  { %s89_s7 = sshll.u32 %s3047_s27, 4  ;;  %s3048_s28 = smov 48   ;;  %s90_s7 = int_to_ptr.vmem [resolvable:$true] %s89_s7 }
  0x1b   :  { %s3049_s29 = smov 3   ;;  %s113_s4 = sshll.u32 %s3756_s10, 4  ;;  %s114_s4 = int_to_ptr.hbm [resolvable:$true] %s113_s4 }
  0x1c   :  { %95 = dma.hbm_to_vmem [thread:$0]  %s88_s6, 96, %s90_s7, [#allocation9], %s3048_s28, %s3048_s28, %s3049_s29  }
  0x1d   :  { %s3050_s30 = smov [#allocation11]   ;;  %s3051_s5 = smov 16  }
  0x1e   :  { %s115_s24 = sshll.u32 %s3050_s30, 4  ;;  %s3052_s23 = smov 1   ;;  %s116_s24 = int_to_ptr.vmem [resolvable:$true] %s115_s24 }
  0x1f   :  { %121 = dma.hbm_to_vmem [thread:$0]  %s114_s4, 32, %s116_s24, [#allocation12], %s3051_s5, %s3051_s5, %s3052_s23  }
  0x20   :  { %s145_s1 = sshll.u32 %s3761_s15, 4  ;;  %s3053_s26 = smov [#allocation14]   ;;  %s146_s1 = int_to_ptr.hbm [resolvable:$true] %s145_s1 }
  0x21   :  { %s147_s2 = sshll.u32 %s3053_s26, 4  ;;  %s173_s10 = sshll.u32 %s3764_s18, 4  ;;  %s148_s2 = int_to_ptr.vmem [resolvable:$true] %s147_s2  ;;  %s174_s10 = int_to_ptr.hbm [resolvable:$true] %s173_s10 }
  0x22   :  { %s3054_s7 = smov 128   ;;  %s3055_s28 = smov 8  }
  0x23   :  { %153 = dma.hbm_to_vmem [thread:$0]  %s146_s1, 16384, %s148_s2, [#allocation15], %s3054_s7, %s3054_s7, %s3055_s28  }
  0x24   :  { %s3781_s0 = sld [smem:[#allocation32_spill]]  ;;  %s3056_s15 = smov [#allocation17]  }
  0x25   :  { %s175_s30 = sshll.u32 %s3056_s15, 4  ;;  %s3057_s18 = smov [#allocation2]   ;;  %s176_s30 = int_to_ptr.vmem [resolvable:$true] %s175_s30 }
  0x26   :  { %181 = dma.hbm_to_vmem [thread:$0]  %s174_s10, 32, %s176_s30, [#allocation18], %s3051_s5, %s3051_s5, %s3052_s23  }
  0x27   :  { %s44_s24 = sshll.u32 %s3057_s18, 4  ;;  %s3782_s26 = sld [smem:[#allocation38_spill]]  ;;  %s45_s24 = int_to_ptr.vmem [resolvable:$true] %s44_s24 }
  0x28   :  { %s3058_s1 = smov [#allocation7]   ;;  %s100_s3 = sshll.u32 %s3755_s9, 4  ;;  %s101_s3 = int_to_ptr.hbm [resolvable:$true] %s100_s3 }
  0x29   :  { %s76_s2 = sshll.u32 %s3058_s1, 4  ;;  %s3059_s10 = smov 384   ;;  %s77_s2 = int_to_ptr.vmem [resolvable:$true] %s76_s2 }
  0x2a   :  { %s42_s4 = sshll.u32 %s3781_s0, 4  ;;  %s3060_s0 = smov 24   ;;  %s43_s4 = int_to_ptr.hbm [resolvable:$true] %s42_s4 }
  0x2b   :  { %50 = dma.hbm_to_vmem [thread:$0]  %s43_s4, 8192, %s45_s24, [#allocation3], %s3054_s7, %s3054_s7, %s3055_s28  }
  0x2c   :  { %s3061_s15 = smov [#allocation10]   ;;  %s130_s25 = sshll.u32 %s3759_s13, 4  ;;  %s131_s25 = int_to_ptr.hbm [resolvable:$true] %s130_s25 }
  0x2d   :  { %s74_s6 = sshll.u32 %s3782_s26, 4  ;;  %s102_s30 = sshll.u32 %s3061_s15, 4  ;;  %s75_s6 = int_to_ptr.hbm [resolvable:$true] %s74_s6  ;;  %s103_s30 = int_to_ptr.vmem [resolvable:$true] %s102_s30 }
  0x2e   :  { %82 = dma.hbm_to_vmem [thread:$0]  %s75_s6, 12288, %s77_s2, [#allocation6], %s3059_s10, %s3059_s10, %s3060_s0  }
  0x2f   :  { %108 = dma.hbm_to_vmem [thread:$0]  %s101_s3, 4096, %s103_s30, [#allocation9], %s3054_s7, %s3054_s7, %s3055_s28  }
  0x30   :  { %s3062_s4 = smov [#allocation13]   ;;  %s158_s6 = sshll.u32 %s3762_s16, 4  ;;  %s159_s6 = int_to_ptr.hbm [resolvable:$true] %s158_s6 }
  0x31   :  { %s132_s24 = sshll.u32 %s3062_s4, 4  ;;  %s3063_s1 = smov 512   ;;  %s133_s24 = int_to_ptr.vmem [resolvable:$true] %s132_s24 }
  0x32   :  { %s3064_s2 = smov 32   ;;  %s3065_s27 = smov [#allocation16]  }
  0x33   :  { %138 = dma.hbm_to_vmem [thread:$0]  %s131_s25, 16384, %s133_s24, [#allocation12], %s3063_s1, %s3063_s1, %s3064_s2  }
  0x34   :  { %s160_s29 = sshll.u32 %s3065_s27, 4  ;;  %s189_s0 = sshll.u32 %s3766_s20, 4  ;;  %s161_s29 = int_to_ptr.vmem [resolvable:$true] %s160_s29  ;;  %s190_s0 = int_to_ptr.hbm [resolvable:$true] %s189_s0 }
  0x35   :  { %166 = dma.hbm_to_vmem [thread:$0]  %s159_s6, 32, %s161_s29, [#allocation15], %s3051_s5, %s3051_s5, %s3052_s23  }
  0x36   :  { %s202_s16 = sshll.u32 %s3768_s22, 4  ;;  %s3066_s3 = smov [#allocation19]   ;;  %s203_s16 = int_to_ptr.hbm [resolvable:$true] %s202_s16 }
  0x37   :  { %s191_s15 = sshll.u32 %s3066_s3, 4  ;;  %s3067_s30 = smov [#allocation20]   ;;  %s192_s15 = int_to_ptr.vmem [resolvable:$true] %s191_s15 }
  0x38   :  { %194 = dma.hbm_to_vmem [thread:$0]  %s190_s0, 16, %s192_s15, [#allocation18]  }
  0x39   :  { %s204_s18 = sshll.u32 %s3067_s30, 4  ;;  %s205_s18 = int_to_ptr.vmem [resolvable:$true] %s204_s18 }
  0x3a   :  { %207 = dma.hbm_to_vmem [thread:$0]  %s203_s16, 16, %s205_s18, [#allocation21]  }
  0x3b   :  { %3030 = dma.done.wait [#allocation3], 8192  }
  0x3c   :  { %3031 = vsyncadd [#allocation3], 4294959104 }
  0x3d   :  { %3032 = dma.done.wait [#allocation6], 12304  }
  0x3e   :  { %3033 = vsyncadd [#allocation6], 4294954992 }
  0x3f   :  { %3034 = dma.done.wait [#allocation9], 4192  }
  0x40   :  { %3035 = vsyncadd [#allocation9], 4294963104 }
  0x41   :  { %3036 = dma.done.wait [#allocation12], 16416  }
  0x42   :  { %3037 = vsyncadd [#allocation12], 4294950880 }
  0x43   :  { %3038 = dma.done.wait [#allocation15], 16416  }
  0x44   :  { %3039 = vsyncadd [#allocation15], 4294950880 }
  0x45   :  { %3040 = dma.done.wait [#allocation18], 48  }
  0x46   :  { %3041 = vsyncadd [#allocation18], 4294967248 }
  0x47   :  { %3042 = dma.done.wait [#allocation21], 16  }
  0x48   :  { %3043 = vsyncadd [#allocation21], 4294967280  ;;  %v3068_v0 = vmov 0   ;;  %s3783_s23 = sld [smem:[#allocation31_spill]]  ;;  %v308_v2 = vld [vmem:[#allocation2 + $0x78] sm:$0xff]  ;;  %v307_v6 = vld [vmem:[#allocation2 + $0x70] sm:$0xff] }
  0x49   :  { %2612 = vset.pattern.permute.xlu0 %v3068_v0  ;;  %2613 = vset.pattern.permute.xlu1 %v3068_v0  ;;  %v324_v3 = vld [vmem:[#allocation2 + $0xf8] sm:$0xff]  ;;  %v323_v7 = vld [vmem:[#allocation2 + $0xf0] sm:$0xff]  ;;  %v306_v10 = vld [vmem:[#allocation2 + $0x68] sm:$0xff]  ;;  %s3784_s25 = sld [smem:[#allocation33_spill]]  ;;  %vm642_vm12 = vcmask 523264   ;;  %s3071_s29 = smov 64  }
  0x4a   :  { %359 = vmatpush.msra.mxu0 %v308_v2  ;;  %v340_v4 = vld [vmem:[#allocation2 + $0x178] sm:$0xff]  ;;  %382 = vmatpush.msra.mxu1 %v324_v3  ;;  %v339_v8 = vld [vmem:[#allocation2 + $0x170] sm:$0xff]  ;;  %v322_v11 = vld [vmem:[#allocation2 + $0xe8] sm:$0xff]  ;;  %v256_v2 = vlaneseq  ;;  %s3785_s9 = sld [smem:[#allocation34_spill]]  ;;  %vm672_vm13 = vcmask 64512   ;;  %s3072_s2 = smov [#allocation22]  }
  0x4b   :  { %v356_v5 = vld [vmem:[#allocation2 + $0x1f8] sm:$0xff]  ;;  %405 = vmatpush.msra.mxu2 %v340_v4  ;;  %v355_v9 = vld [vmem:[#allocation2 + $0x1f0] sm:$0xff]  ;;  %v338_v12 = vld [vmem:[#allocation2 + $0x168] sm:$0xff]  ;;  %s3786_s27 = sld [smem:[#allocation36_spill]] }
  0x4c   :  { %428 = vmatpush.msra.mxu3 %v356_v5  ;;  %360 = vmatpush.msra.mxu0 %v307_v6  ;;  %v354_v13 = vld [vmem:[#allocation2 + $0x1e8] sm:$0xff]  ;;  %v305_v14 = vld [vmem:[#allocation2 + $0x60] sm:$0xff]  ;;  %v304_v18 = vld [vmem:[#allocation2 + $0x58] sm:$0xff]  ;;  %v3250_v3 = vand.u32 127, %v256_v2  ;;  %s3787_s0 = sld [smem:[#allocation35_spill]] }
  0x4d   :  { %383 = vmatpush.msra.mxu1 %v323_v7  ;;  %406 = vmatpush.msra.mxu2 %v339_v8  ;;  %v321_v15 = vld [vmem:[#allocation2 + $0xe0] sm:$0xff]  ;;  %v320_v19 = vld [vmem:[#allocation2 + $0xd8] sm:$0xff]  ;;  %v303_v22 = vld [vmem:[#allocation2 + $0x50] sm:$0xff]  ;;  %v3069_v8 = vmov 1.0  }
  0x4e   :  { %v261_v1 = vld [vmem:[%s3783_s23] sm:$0xff]  ;;  %429 = vmatpush.msra.mxu3 %v355_v9  ;;  %361 = vmatpush.msra.mxu0 %v306_v10  ;;  %v336_v20 = vld [vmem:[#allocation2 + $0x158] sm:$0xff]  ;;  %v319_v23 = vld [vmem:[#allocation2 + $0xd0] sm:$0xff]  ;;  %v3253_v4 = vadd.s32 128, %v3250_v3  ;;  %v3256_v5 = vadd.s32 256, %v3250_v3  ;;  %v3259_v6 = vadd.s32 384, %v3250_v3 }
  0x4f   :  { %264 = vperm.xlu0 %2612, %v261_v1   ;;  %v337_v16 = vld [vmem:[#allocation2 + $0x160] sm:$0xff]  ;;  %384 = vmatpush.msra.mxu1 %v322_v11  ;;  %v352_v21 = vld [vmem:[#allocation2 + $0x1d8] sm:$0xff]  ;;  %v335_v24 = vld [vmem:[#allocation2 + $0x150] sm:$0xff] }
  0x50   :  { %407 = vmatpush.msra.mxu2 %v338_v12  ;;  %v353_v17 = vld [vmem:[#allocation2 + $0x1e0] sm:$0xff]  ;;  %430 = vmatpush.msra.mxu3 %v354_v13  ;;  %v351_v25 = vld [vmem:[#allocation2 + $0x1d0] sm:$0xff]  ;;  %v302_v26 = vld [vmem:[#allocation2 + $0x48] sm:$0xff] }
  0x51   :  { %362 = vmatpush.msra.mxu0 %v305_v14  ;;  %385 = vmatpush.msra.mxu1 %v321_v15  ;;  %v318_v27 = vld [vmem:[#allocation2 + $0xc8] sm:$0xff]  ;;  %v301_v30 = vld [vmem:[#allocation2 + $0x40] sm:$0xff]  ;;  %v300_v34 = vld [vmem:[#allocation2 + $0x38] sm:$0xff] }
  0x52   :  { %408 = vmatpush.msra.mxu2 %v337_v16  ;;  %431 = vmatpush.msra.mxu3 %v353_v17  ;;  %v334_v28 = vld [vmem:[#allocation2 + $0x148] sm:$0xff]  ;;  %v317_v31 = vld [vmem:[#allocation2 + $0xc0] sm:$0xff]  ;;  %v316_v35 = vld [vmem:[#allocation2 + $0xb8] sm:$0xff] }
  0x53   :  { %363 = vmatpush.msra.mxu0 %v304_v18  ;;  %386 = vmatpush.msra.mxu1 %v320_v19  ;;  %v350_v29 = vld [vmem:[#allocation2 + $0x1c8] sm:$0xff]  ;;  %v333_v32 = vld [vmem:[#allocation2 + $0x140] sm:$0xff]  ;;  %v332_v36 = vld [vmem:[#allocation2 + $0x138] sm:$0xff] }
  0x54   :  { %409 = vmatpush.msra.mxu2 %v336_v20  ;;  %432 = vmatpush.msra.mxu3 %v352_v21  ;;  %v349_v33 = vld [vmem:[#allocation2 + $0x1c0] sm:$0xff]  ;;  %v348_v37 = vld [vmem:[#allocation2 + $0x1b8] sm:$0xff]  ;;  %v299_v38 = vld [vmem:[#allocation2 + $0x30] sm:$0xff]  ;;  %v3070_v21 = vmov 128.0  }
  0x55   :  { %364 = vmatpush.msra.mxu0 %v303_v22  ;;  %387 = vmatpush.msra.mxu1 %v319_v23  ;;  %v315_v39 = vld [vmem:[#allocation2 + $0xb0] sm:$0xff]  ;;  %v298_v42 = vld [vmem:[#allocation2 + $0x28] sm:$0xff]  ;;  %v297_v46 = vld [vmem:[#allocation2 + $0x20] sm:$0xff]  ;;  %2630 = vrcp.f32 %v3070_v21 }
  0x56   :  { %410 = vmatpush.msra.mxu2 %v335_v24  ;;  %433 = vmatpush.msra.mxu3 %v351_v25  ;;  %v331_v40 = vld [vmem:[#allocation2 + $0x130] sm:$0xff]  ;;  %v314_v43 = vld [vmem:[#allocation2 + $0xa8] sm:$0xff]  ;;  %v313_v47 = vld [vmem:[#allocation2 + $0xa0] sm:$0xff] }
  0x57   :  { %365 = vmatpush.msra.mxu0 %v302_v26  ;;  %388 = vmatpush.msra.mxu1 %v318_v27  ;;  %v347_v41 = vld [vmem:[#allocation2 + $0x1b0] sm:$0xff]  ;;  %v330_v44 = vld [vmem:[#allocation2 + $0x128] sm:$0xff]  ;;  %v329_v48 = vld [vmem:[#allocation2 + $0x120] sm:$0xff] }
  0x58   :  { %411 = vmatpush.msra.mxu2 %v334_v28  ;;  %434 = vmatpush.msra.mxu3 %v350_v29  ;;  %v346_v45 = vld [vmem:[#allocation2 + $0x1a8] sm:$0xff]  ;;  %v345_v49 = vld [vmem:[#allocation2 + $0x1a0] sm:$0xff]  ;;  %v296_v50 = vld [vmem:[#allocation2 + $0x18] sm:$0xff] }
  0x59   :  { %366 = vmatpush.msra.mxu0 %v301_v30  ;;  %389 = vmatpush.msra.mxu1 %v317_v31  ;;  %v312_v51 = vld [vmem:[#allocation2 + $0x98] sm:$0xff]  ;;  %v295_v54 = vld [vmem:[#allocation2 + $0x10] sm:$0xff]  ;;  %v294_v58 = vld [vmem:[#allocation2 + $0x8] sm:$0xff] }
  0x5a   :  { %412 = vmatpush.msra.mxu2 %v333_v32  ;;  %435 = vmatpush.msra.mxu3 %v349_v33  ;;  %v328_v52 = vld [vmem:[#allocation2 + $0x118] sm:$0xff]  ;;  %v311_v55 = vld [vmem:[#allocation2 + $0x90] sm:$0xff]  ;;  %v310_v59 = vld [vmem:[#allocation2 + $0x88] sm:$0xff] }
  0x5b   :  { %367 = vmatpush.msra.mxu0 %v300_v34  ;;  %390 = vmatpush.msra.mxu1 %v316_v35  ;;  %v344_v53 = vld [vmem:[#allocation2 + $0x198] sm:$0xff]  ;;  %v327_v56 = vld [vmem:[#allocation2 + $0x110] sm:$0xff]  ;;  %v326_v60 = vld [vmem:[#allocation2 + $0x108] sm:$0xff]  ;;  %v2631_v22 = vpop.eup %2630 }
  0x5c   :  { %413 = vmatpush.msra.mxu2 %v332_v36  ;;  %436 = vmatpush.msra.mxu3 %v348_v37  ;;  %v343_v57 = vld [vmem:[#allocation2 + $0x190] sm:$0xff]  ;;  %v342_v61 = vld [vmem:[#allocation2 + $0x188] sm:$0xff]  ;;  %v293_v62 = vld [vmem:[#allocation2] sm:$0xff]  ;;  %v461_v23 = vmul.f32 128.0, %v2631_v22  ;;  %vm465_vm4 = vweird.f32 %v2631_v22 }
  0x5d   :  { %368 = vmatpush.msra.mxu0 %v299_v38  ;;  %391 = vmatpush.msra.mxu1 %v315_v39  ;;  %v309_v63 = vld [vmem:[#allocation2 + $0x80] sm:$0xff]  ;;  %v262_v32 = vld [vmem:[%s3783_s23 + $0x8] sm:$0xff]  ;;  %v563_v34 = vld [vmem:[#allocation7 + $0x170] sm:$0xff] }
  0x5e   :  { %414 = vmatpush.msra.mxu2 %v331_v40  ;;  %437 = vmatpush.msra.mxu3 %v347_v41  ;;  %v325_v0 = vld [vmem:[#allocation2 + $0x100] sm:$0xff]  ;;  %v462_v24 = vsub.f32 1.0, %v461_v23  ;;  %v562_v33 = vld [vmem:[#allocation7 + $0x168] sm:$0xff]  ;;  %v559_v36 = vld [vmem:[#allocation7 + $0x150] sm:$0xff] }
  0x5f   :  { %369 = vmatpush.msra.mxu0 %v298_v42  ;;  %392 = vmatpush.msra.mxu1 %v314_v43  ;;  %v341_v1 = vld [vmem:[#allocation2 + $0x180] sm:$0xff]  ;;  %v558_v41 = vld [vmem:[#allocation7 + $0x148] sm:$0xff] }
  0x60   :  { %415 = vmatpush.msra.mxu2 %v330_v44  ;;  %438 = vmatpush.msra.mxu3 %v346_v45  ;;  %v3272_v9 = vld [vmem:[%s3784_s25] sm:$0xff]  ;;  %v463_v25 = vmul.f32 %v2631_v22, %v462_v24  ;;  %v554_v43 = vld [vmem:[#allocation7 + $0x128] sm:$0xff]  ;;  %v555_v44 = vld [vmem:[#allocation7 + $0x130] sm:$0xff] }
  0x61   :  { %370 = vmatpush.msra.mxu0 %v297_v46  ;;  %393 = vmatpush.msra.mxu1 %v313_v47  ;;  %v3278_v13 = vld [vmem:[%s3785_s9] sm:$0x3]  ;;  %v561_v38 = vld [vmem:[#allocation7 + $0x160] sm:$0xff]  ;;  %v550_v45 = vld [vmem:[#allocation7 + $0x108] sm:$0xff] }
  0x62   :  { %416 = vmatpush.msra.mxu2 %v329_v48  ;;  %439 = vmatpush.msra.mxu3 %v345_v49  ;;  %v451_v17 = vperm.slane %v3278_v13, 0  ;;  %v464_v26 = vadd.f32 %v2631_v22, %v463_v25  ;;  %v564_v35 = vld [vmem:[#allocation7 + $0x178] sm:$0xff]  ;;  %v557_v40 = vld [vmem:[#allocation7 + $0x140] sm:$0xff]  ;;  %v551_v46 = vld [vmem:[#allocation7 + $0x110] sm:$0xff] }
  0x63   :  { %371 = vmatpush.msra.mxu0 %v296_v50  ;;  %394 = vmatpush.msra.mxu1 %v312_v51  ;;  %v560_v37 = vld [vmem:[#allocation7 + $0x158] sm:$0xff]  ;;  %v553_v42 = vld [vmem:[#allocation7 + $0x120] sm:$0xff]  ;;  %v547_v48 = vld [vmem:[#allocation7 + $0xf0] sm:$0xff] }
  0x64   :  { %417 = vmatpush.msra.mxu2 %v328_v52  ;;  %440 = vmatpush.msra.mxu3 %v344_v53  ;;  %v3283_v27 = vsel %vm465_vm4, %v2631_v22, %v464_v26  ;;  %v556_v39 = vld [vmem:[#allocation7 + $0x138] sm:$0xff]  ;;  %v549_v50 = vld [vmem:[#allocation7 + $0x100] sm:$0xff]  ;;  %v546_v53 = vld [vmem:[#allocation7 + $0xe8] sm:$0xff] }
  0x65   :  { %372 = vmatpush.msra.mxu0 %v295_v54  ;;  %395 = vmatpush.msra.mxu1 %v311_v55  ;;  %v552_v47 = vld [vmem:[#allocation7 + $0x118] sm:$0xff]  ;;  %v545_v52 = vld [vmem:[#allocation7 + $0xe0] sm:$0xff]  ;;  %v542_v55 = vld [vmem:[#allocation7 + $0xc8] sm:$0xff] }
  0x66   :  { %418 = vmatpush.msra.mxu2 %v327_v56  ;;  %441 = vmatpush.msra.mxu3 %v343_v57  ;;  %v548_v49 = vld [vmem:[#allocation7 + $0xf8] sm:$0xff]  ;;  %v541_v54 = vld [vmem:[#allocation7 + $0xc0] sm:$0xff]  ;;  %v543_v56 = vld [vmem:[#allocation7 + $0xd0] sm:$0xff] }
  0x67   :  { %373 = vmatpush.msra.mxu0 %v294_v58  ;;  %396 = vmatpush.msra.mxu1 %v310_v59  ;;  %v544_v51 = vld [vmem:[#allocation7 + $0xd8] sm:$0xff]  ;;  %v538_v57 = vld [vmem:[#allocation7 + $0xa8] sm:$0xff]  ;;  %v539_v58 = vld [vmem:[#allocation7 + $0xb0] sm:$0xff] }
  0x68   :  { %419 = vmatpush.msra.mxu2 %v326_v60  ;;  %442 = vmatpush.msra.mxu3 %v342_v61  ;;  %v540_v59 = vld [vmem:[#allocation7 + $0xb8] sm:$0xff]  ;;  %v535_v60 = vld [vmem:[#allocation7 + $0x90] sm:$0xff]  ;;  %v529_v2 = vld [vmem:[#allocation7 + $0x60] sm:$0xff] }
  0x69   :  { %374 = vmatpush.msra.mxu0 %v293_v62  ;;  %397 = vmatpush.msra.mxu1 %v309_v63  ;;  %v536_v61 = vld [vmem:[#allocation7 + $0x98] sm:$0xff]  ;;  %v537_v62 = vld [vmem:[#allocation7 + $0xa0] sm:$0xff]  ;;  %v522_v21 = vld [vmem:[#allocation7 + $0x28] sm:$0xff] }
  0x6a   :  { %420 = vmatpush.msra.mxu2 %v325_v0  ;;  %443 = vmatpush.msra.mxu3 %v341_v1  ;;  %v532_v63 = vld [vmem:[#allocation7 + $0x78] sm:$0xff]  ;;  %v533_v0 = vld [vmem:[#allocation7 + $0x80] sm:$0xff]  ;;  %v534_v1 = vld [vmem:[#allocation7 + $0x88] sm:$0xff] }
  0x6b   :  { %573 = vmatpush.msrb.mxu0 %v562_v33  ;;  %596 = vmatpush.msrb.mxu1 %v563_v34  ;;  %v517_v22 = vld [vmem:[#allocation7] sm:$0xff]  ;;  %v518_v23 = vld [vmem:[#allocation7 + $0x8] sm:$0xff]  ;;  %v519_v25 = vld [vmem:[#allocation7 + $0x10] sm:$0xff] }
  0x6c   :  { %619 = vmatpush.msrb.mxu2 %v564_v35 }
  0x6d   :  { %574 = vmatpush.msrb.mxu0 %v559_v36  ;;  %597 = vmatpush.msrb.mxu1 %v560_v37 }
  0x6e   :  { %620 = vmatpush.msrb.mxu2 %v561_v38 }
  0x6f   :  { %575 = vmatpush.msrb.mxu0 %v556_v39  ;;  %598 = vmatpush.msrb.mxu1 %v557_v40  ;;  %v3298_v39 = vld [vmem:[%s3786_s27] ss:$0 sm:$0xff]  ;;  %s2523_s27 = sshll.u32 %s3072_s2, 4  ;;  %s2524_s27 = int_to_ptr.vmem [resolvable:$true] %s2523_s27 }
  0x70   :  { %621 = vmatpush.msrb.mxu2 %v558_v41  ;;  %v3309_v40 = vld [vmem:[#allocation5] ss:$0 sm:$0xff]  ;;  %v3318_v41 = vld [vmem:[#allocation8] sm:$0x7] }
  0x71   :  { %576 = vmatpush.msrb.mxu0 %v553_v42  ;;  %599 = vmatpush.msrb.mxu1 %v554_v43  ;;  %v567_v42 = vperm.slane %v3318_v41, 0  ;;  %v568_v43 = vperm.slane %v3318_v41, 1 }
  0x72   :  { %622 = vmatpush.msrb.mxu2 %v555_v44 }
  0x73   :  { %577 = vmatpush.msrb.mxu0 %v550_v45  ;;  %600 = vmatpush.msrb.mxu1 %v551_v46 }
  0x74   :  { %623 = vmatpush.msrb.mxu2 %v552_v47 }
  0x75   :  { %578 = vmatpush.msrb.mxu0 %v547_v48  ;;  %601 = vmatpush.msrb.mxu1 %v548_v49 }
  0x76   :  { %624 = vmatpush.msrb.mxu2 %v549_v50 }
  0x77   :  { %579 = vmatpush.msrb.mxu0 %v544_v51  ;;  %602 = vmatpush.msrb.mxu1 %v545_v52  ;;  %v513_v52 = vld [vmem:[%s3787_s0] sm:$0x3] }
  0x78   :  { %625 = vmatpush.msrb.mxu2 %v546_v53  ;;  %v514_v53 = vcvt.s32.f32 %v513_v52 }
  0x79   :  { %580 = vmatpush.msrb.mxu0 %v541_v54  ;;  %603 = vmatpush.msrb.mxu1 %v542_v55 }
  0x7a   :  { %626 = vmatpush.msrb.mxu2 %v543_v56  ;;  %v515_v54 = vsub.f32 1.0, %v514_v53 }
  0x7b   :  { %581 = vmatpush.msrb.mxu0 %v538_v57  ;;  %604 = vmatpush.msrb.mxu1 %v539_v58 }
  0x7c   :  { %627 = vmatpush.msrb.mxu2 %v540_v59  ;;  %v3338_v56 = vmul.f32 -1e+09, %v515_v54 }
  0x7d   :  { %582 = vmatpush.msrb.mxu0 %v535_v60  ;;  %605 = vmatpush.msrb.mxu1 %v536_v61 }
  0x7e   :  { %628 = vmatpush.msrb.mxu2 %v537_v62  ;;  %v3341_v57 = vperm.slane %v3338_v56, 0  ;;  %v3385_v54 = vperm.slane %v3338_v56, 1  ;;  %v929_v56 = vld [vmem:[#allocation10 + $0x68] sm:$0xff] }
  0x7f   :  { %583 = vmatpush.msrb.mxu0 %v532_v63  ;;  %606 = vmatpush.msrb.mxu1 %v533_v0 }
  0x80   :  { %629 = vmatpush.msrb.mxu2 %v534_v1 }
  0x81   :  { %584 = vmatpush.msrb.mxu0 %v529_v2 }
  0xc1   :  { %v265_v7 = vpop.permute.xlu0 %264 }
  0xc2   :  { %vm269_vm0 = vcmp.eq.s32.totalorder %v3250_v3, %v265_v7  ;;  %vm270_vm1 = vcmp.eq.s32.totalorder %v3253_v4, %v265_v7  ;;  %vm271_vm2 = vcmp.eq.s32.totalorder %v3256_v5, %v265_v7  ;;  %vm272_vm3 = vcmp.eq.s32.totalorder %v3259_v6, %v265_v7  ;;  %v530_v7 = vld [vmem:[#allocation7 + $0x68] sm:$0xff] }
  0xc3   :  { %2549 = vmatmul.msk.f32.vlgmr.msra.gmra.mxu0 %vm269_vm0, %v3069_v8  ;;  %2551 = vmatmul.msk.f32.vlgmr.msra.gmra.mxu1 %vm270_vm1, %v3069_v8 }
  0xc4   :  { %2553 = vmatmul.msk.f32.vlgmr.msra.gmra.mxu2 %vm271_vm2, %v3069_v8  ;;  %2555 = vmatmul.msk.f32.vlgmr.msra.gmra.mxu3 %vm272_vm3, %v3069_v8 }
  0xc5   :  { %607 = vmatpush.msrb.mxu1 %v530_v7 }
 0x140   :  { %v376_v10 = vpop.f32.mrf.mxu0  ;;  %v399_v12 = vpop.f32.mrf.mxu1 }
 0x141   :  { %v377_v11 = vadd.f32 %v376_v10, %v3272_v9  ;;  %v531_v10 = vld [vmem:[#allocation7 + $0x70] sm:$0xff] }
 0x142   :  { %630 = vmatpush.msrb.mxu2 %v531_v10 }
 0x143   :  { %v400_v14 = vadd.f32 %v399_v12, %v377_v11  ;;  %v526_v11 = vld [vmem:[#allocation7 + $0x48] sm:$0xff]  ;;  %v527_v12 = vld [vmem:[#allocation7 + $0x50] sm:$0xff] }
 0x144   :  { %585 = vmatpush.msrb.mxu0 %v526_v11  ;;  %608 = vmatpush.msrb.mxu1 %v527_v12 }
 0x147   :  { %v422_v15 = vpop.f32.mrf.mxu2  ;;  %v445_v18 = vpop.f32.mrf.mxu3 }
 0x148   :  { %v423_v16 = vadd.f32 %v422_v15, %v400_v14  ;;  %v528_v14 = vld [vmem:[#allocation7 + $0x58] sm:$0xff]  ;;  %v523_v15 = vld [vmem:[#allocation7 + $0x30] sm:$0xff] }
 0x149   :  { %631 = vmatpush.msrb.mxu2 %v528_v14  ;;  %586 = vmatpush.msrb.mxu0 %v523_v15 }
 0x14a   :  { %v446_v19 = vadd.f32 %v445_v18, %v423_v16  ;;  %v524_v16 = vld [vmem:[#allocation7 + $0x38] sm:$0xff]  ;;  %v525_v18 = vld [vmem:[#allocation7 + $0x40] sm:$0xff] }
 0x14b   :  { %609 = vmatpush.msrb.mxu1 %v524_v16  ;;  %632 = vmatpush.msrb.mxu2 %v525_v18 }
 0x14c   :  { %v452_v20 = vadd.f32 %v451_v17, %v446_v19  ;;  %v520_v19 = vld [vmem:[#allocation7 + $0x18] sm:$0xff] }
 0x14d   :  { %587 = vmatpush.msrb.mxu0 %v520_v19  ;;  %633 = vmatpush.msrb.mxu2 %v522_v21 }
 0x14e   :  { %456 = vadd.xlane.f32.xlu0 %v452_v20 }
 0x14f   :  { %588 = vmatpush.msrb.mxu0 %v517_v22  ;;  %634 = vmatpush.msrb.mxu2 %v519_v25 }
 0x1c1   :  { %v457_v28 = vpop.xlane.xlu0 %456 }
 0x1c2   :  { %v467_v29 = vmul.f32 %v3283_v27, %v457_v28 }
 0x1c4   :  { %v3286_v30 = vsub.f32 %v452_v20, %v467_v29  ;;  %v521_v20 = vld [vmem:[#allocation7 + $0x20] sm:$0xff] }
 0x1c5   :  { %610 = vmatpush.msrb.mxu1 %v521_v20 }
 0x1c6   :  { %v471_v31 = vmul.f32 %v3286_v30, %v3286_v30 }
 0x1c7   :  { %611 = vmatpush.msrb.mxu1 %v518_v23 }
 0x1c8   :  { %473 = vadd.xlane.f32.xlu1 %v471_v31 }
 0x1e1   :  { %267 = vperm.xlu1 %2613, %v262_v32  }
 0x23b   :  { %v474_v24 = vpop.xlane.xlu1 %473 }
 0x23c   :  { %v477_v26 = vmul.f32 %v474_v24, %v3283_v27 }
 0x23e   :  { %v479_v28 = vadd.f32 1e-12, %v477_v26 }
 0x240   :  { %2632 = vrsqrt.f32 %v479_v28  ;;  %vm487_vm6 = vweird.f32 %v479_v28 }
 0x246   :  { %v2633_v29 = vpop.eup %2632 }
 0x247   :  { %v482_v31 = vmul.f32 %v2633_v29, %v479_v28  ;;  %vm488_vm5 = vweird.f32 %v2633_v29 }
 0x248   :  { %vm489_vm7 = vmor %vm487_vm6, %vm488_vm5 }
 0x249   :  { %v483_v32 = vmul.f32 %v2633_v29, %v482_v31 }
 0x24b   :  { %v484_v33 = vmul.f32 0.5, %v483_v32 }
 0x24d   :  { %v485_v34 = vsub.f32 1.5, %v484_v33 }
 0x24f   :  { %v486_v35 = vmul.f32 %v2633_v29, %v485_v34 }
 0x251   :  { %v490_v36 = vsel %vm489_vm7, %v2633_v29, %v486_v35 }
 0x252   :  { %v501_v37 = vmul.f32 %v490_v36, %v3286_v30 }
 0x253   :  { %v268_v38 = vpop.permute.xlu1 %267 }
 0x254   :  { %vm273_vm8 = vcmp.eq.s32.totalorder %v3250_v3, %v268_v38  ;;  %vm274_vm9 = vcmp.eq.s32.totalorder %v3253_v4, %v268_v38  ;;  %vm275_vm10 = vcmp.eq.s32.totalorder %v3256_v5, %v268_v38  ;;  %vm276_vm11 = vcmp.eq.s32.totalorder %v3259_v6, %v268_v38 }
 0x255   :  { %2550 = vmatmul.msk.f32.gmra.mxu0 %vm273_vm8, %v3069_v8  ;;  %2552 = vmatmul.msk.f32.gmra.mxu1 %vm274_vm9, %v3069_v8  ;;  %v506_v30 = vmul.f32 %v3298_v39, %v501_v37 }
 0x256   :  { %2554 = vmatmul.msk.f32.gmra.mxu2 %vm275_vm10, %v3069_v8  ;;  %2556 = vmatmul.msk.f32.gmra.mxu3 %vm276_vm11, %v3069_v8 }
 0x257   :  { %v3312_v3 = vadd.f32 %v3309_v40, %v506_v30 }
 0x25d   :  { %589 = vmatmul.f32.vlgmr.msrb.gmra.mxu0 %v3312_v3  ;;  %612 = vmatmul.f32.vlgmr.msrb.gmra.mxu1 %v3312_v3 }
 0x25e   :  { %635 = vmatmul.f32.vlgmr.msrb.gmra.mxu2 %v3312_v3 }
 0x2d2   :  { %v379_v4 = vpop.f32.mrf.mxu0  ;;  %v402_v5 = vpop.f32.mrf.mxu1 }
 0x2d3   :  { %v380_v6 = vadd.f32 %v379_v4, %v3272_v9  ;;  %v569_v9 = vperm.slane %v3318_v41, 2 }
 0x2d5   :  { %v403_v8 = vadd.f32 %v402_v5, %v380_v6 }
 0x2d9   :  { %v425_v44 = vpop.f32.mrf.mxu2  ;;  %v448_v55 = vpop.f32.mrf.mxu3 }
 0x2da   :  { %v426_v45 = vadd.f32 %v425_v44, %v403_v8  ;;  %v590_v46 = vpop.f32.mrf.mxu0  ;;  %v613_v47 = vpop.f32.mrf.mxu1 }
 0x2db   :  { %v591_v48 = vadd.f32 %v590_v46, %v567_v42  ;;  %v614_v49 = vadd.f32 %v613_v47, %v568_v43 }
 0x2dc   :  { %v449_v7 = vadd.f32 %v448_v55, %v426_v45 }
 0x2dd   :  { %2557 = vmatpush.xpose.msk.msrb.mxu3 %vm642_vm12, %v614_v49  ;;  %707 = vrot.lane.b32.xlu1 %v591_v48, %s3071_s29 }
 0x2de   :  { %v453_v10 = vadd.f32 %v451_v17, %v449_v7  ;;  %v926_v7 = vld [vmem:[#allocation10 + $0x50] sm:$0xff] }
 0x2e0   :  { %2558 = vmatmul.msk.f32.vlgmr.msrb.gmra.mxu3 %vm642_vm12, %v591_v48 }
 0x2e1   :  { %v636_v50 = vpop.f32.mrf.mxu2 }
 0x2e2   :  { %v3332_v51 = vadd.f32 %v636_v50, %v569_v9 }
 0x2e4   :  { %702 = vmatpush.msra.mxu3 %v3332_v51 }
 0x34f   :  { %v708_v16 = vpop.permute.xlu1 %707 }
 0x363   :  { %v666_v58 = vpop.f32.mrf.mxu3 }
 0x364   :  { %v669_v59 = vmul.f32 0.125, %v666_v58 }
 0x366   :  { %v671_v60 = vadd.f32 %v3341_v57, %v669_v59 }
 0x368   :  { %v673_v61 = vsel %vm672_vm13, %v671_v60, -inf }
 0x369   :  { %674 = vmax.xlane.f32.xlu2 %v673_v61 }
 0x3dc   :  { %v675_v62 = vpop.xlane.xlu2 %674 }
 0x3dd   :  { %v676_v63 = vsub.f32 %v671_v60, %v675_v62 }
 0x3df   :  { %v677_v0 = vmul.f32 1.442695, %v676_v63  ;;  %v931_v63 = vld [vmem:[#allocation10 + $0x78] sm:$0xff] }
 0x3e0   :  { %936 = vmatpush.msra.mxu0 %v931_v63  ;;  %v1064_v63 = vld [vmem:[#allocation13 + $0x198] sm:$0xff] }
 0x3e1   :  { %2634 = vpow2.f32 %v677_v0  ;;  %v930_v0 = vld [vmem:[#allocation10 + $0x70] sm:$0xff] }
 0x3e2   :  { %937 = vmatpush.msra.mxu0 %v930_v0  ;;  %v1057_v0 = vld [vmem:[#allocation13 + $0x160] sm:$0xff] }
 0x3e4   :  { %938 = vmatpush.msra.mxu0 %v929_v56  ;;  %v1058_v56 = vld [vmem:[#allocation13 + $0x168] sm:$0xff] }
 0x3e7   :  { %v2635_v1 = vpop.eup %2634 }
 0x3e8   :  { %v679_v2 = vsel %vm672_vm13, %v2635_v1, 0.0 }
 0x3e9   :  { %680 = vadd.xlane.f32.xlu2 %v679_v2  ;;  %v927_v2 = vld [vmem:[#allocation10 + $0x58] sm:$0xff] }
 0x401   :  { %709 = vrot.lane.b32.xlu2 %v614_v49, %s3071_s29 }
 0x42a   :  { %458 = vadd.xlane.f32.xlu2 %v453_v10 }
 0x45c   :  { %v681_v11 = vpop.xlane.xlu2 %680 }
 0x45d   :  { %2636 = vrcp.f32 %v681_v11  ;;  %v924_v11 = vld [vmem:[#allocation10 + $0x40] sm:$0xff] }
 0x463   :  { %v2637_v12 = vpop.eup %2636 }
 0x464   :  { %v683_v14 = vmul.f32 %v2637_v12, %v2635_v1  ;;  %v710_v15 = vpop.permute.xlu2 %709  ;;  %v928_v1 = vld [vmem:[#allocation10 + $0x60] sm:$0xff]  ;;  %v923_v12 = vld [vmem:[#allocation10 + $0x38] sm:$0xff] }
 0x465   :  { %2560 = vmatpush.xpose.msk.msrb.mxu3 %vm642_vm12, %v710_v15  ;;  %939 = vmatpush.msra.mxu0 %v928_v1  ;;  %v921_v15 = vld [vmem:[#allocation10 + $0x28] sm:$0xff]  ;;  %v1059_v1 = vld [vmem:[#allocation13 + $0x170] sm:$0xff] }
 0x466   :  { %2559 = vmatmul.msk.f32.vlgmr.msra.gmra.mxu3 %vm672_vm13, %v683_v14  ;;  %v922_v14 = vld [vmem:[#allocation10 + $0x30] sm:$0xff] }
 0x467   :  { %940 = vmatpush.msra.mxu0 %v927_v2  ;;  %v1060_v2 = vld [vmem:[#allocation13 + $0x178] sm:$0xff] }
 0x469   :  { %941 = vmatpush.msra.mxu0 %v926_v7  ;;  %v1053_v7 = vld [vmem:[#allocation13 + $0x140] sm:$0xff] }
 0x46e   :  { %2561 = vmatmul.msk.f32.vlgmr.msrb.gmra.mxu3 %vm642_vm12, %v708_v16 }
 0x49d   :  { %v459_v18 = vpop.xlane.xlu2 %458 }
 0x49e   :  { %v468_v19 = vmul.f32 %v3283_v27, %v459_v18 }
 0x4a0   :  { %v470_v20 = vsub.f32 %v453_v10, %v468_v19  ;;  %v925_v10 = vld [vmem:[#allocation10 + $0x48] sm:$0xff]  ;;  %v920_v19 = vld [vmem:[#allocation10 + $0x20] sm:$0xff] }
 0x4a1   :  { %942 = vmatpush.msra.mxu0 %v925_v10  ;;  %v1054_v10 = vld [vmem:[#allocation13 + $0x148] sm:$0xff] }
 0x4a2   :  { %v472_v21 = vmul.f32 %v470_v20, %v470_v20 }
 0x4a3   :  { %943 = vmatpush.msra.mxu0 %v924_v11  ;;  %v1055_v11 = vld [vmem:[#allocation13 + $0x150] sm:$0xff] }
 0x4a4   :  { %475 = vadd.xlane.f32.xlu1 %v472_v21  ;;  %v919_v21 = vld [vmem:[#allocation10 + $0x18] sm:$0xff] }
 0x4a5   :  { %944 = vmatpush.msra.mxu0 %v923_v12  ;;  %v1056_v12 = vld [vmem:[#allocation13 + $0x158] sm:$0xff] }
 0x4a7   :  { %945 = vmatpush.msra.mxu0 %v922_v14  ;;  %v1049_v14 = vld [vmem:[#allocation13 + $0x120] sm:$0xff] }
 0x4a9   :  { %946 = vmatpush.msra.mxu0 %v921_v15  ;;  %v1050_v15 = vld [vmem:[#allocation13 + $0x128] sm:$0xff] }
 0x4ab   :  { %947 = vmatpush.msra.mxu0 %v920_v19  ;;  %v1045_v19 = vld [vmem:[#allocation13 + $0x100] sm:$0xff] }
 0x4ad   :  { %948 = vmatpush.msra.mxu0 %v919_v21  ;;  %v1047_v21 = vld [vmem:[#allocation13 + $0x110] sm:$0xff] }
 0x4e9   :  { %v3353_v13 = vpop.f32.mrf.mxu3 }
 0x4f1   :  { %v732_v17 = vpop.f32.mrf.mxu3 }
 0x4f2   :  { %v735_v22 = vmul.f32 0.125, %v732_v17  ;;  %v918_v17 = vld [vmem:[#allocation10 + $0x10] sm:$0xff] }
 0x4f3   :  { %949 = vmatpush.msra.mxu0 %v918_v17  ;;  %v1048_v17 = vld [vmem:[#allocation13 + $0x118] sm:$0xff] }
 0x4f4   :  { %v736_v23 = vadd.f32 %v735_v22, %v3341_v57  ;;  %v917_v22 = vld [vmem:[#allocation10 + $0x8] sm:$0xff] }
 0x4f5   :  { %950 = vmatpush.msra.mxu0 %v917_v22  ;;  %v1041_v22 = vld [vmem:[#allocation13 + $0xe0] sm:$0xff] }
 0x4f6   :  { %v737_v24 = vsel %vm672_vm13, %v736_v23, -inf }
 0x4f7   :  { %738 = vmax.xlane.f32.xlu0 %v737_v24 }
 0x517   :  { %v476_v25 = vpop.xlane.xlu1 %475 }
 0x518   :  { %v478_v26 = vmul.f32 %v476_v25, %v3283_v27 }
 0x51a   :  { %v480_v28 = vadd.f32 1e-12, %v478_v26 }
 0x51c   :  { %2638 = vrsqrt.f32 %v480_v28  ;;  %vm497_vm15 = vweird.f32 %v480_v28 }
 0x522   :  { %v2639_v29 = vpop.eup %2638 }
 0x523   :  { %v492_v31 = vmul.f32 %v2639_v29, %v480_v28  ;;  %vm498_vm14 = vweird.f32 %v2639_v29 }
 0x524   :  { %vm499_vm0 = vmor %vm497_vm15, %vm498_vm14 }
 0x525   :  { %v493_v32 = vmul.f32 %v2639_v29, %v492_v31 }
 0x527   :  { %v494_v33 = vmul.f32 0.5, %v493_v32 }
 0x529   :  { %v495_v34 = vsub.f32 1.5, %v494_v33 }
 0x52b   :  { %v496_v35 = vmul.f32 %v2639_v29, %v495_v34 }
 0x52d   :  { %v500_v36 = vsel %vm499_vm0, %v2639_v29, %v496_v35 }
 0x52e   :  { %v502_v37 = vmul.f32 %v500_v36, %v470_v20 }
 0x530   :  { %v507_v38 = vmul.f32 %v3298_v39, %v502_v37 }
 0x532   :  { %v3360_v30 = vadd.f32 %v3309_v40, %v507_v38  ;;  %v3399_v38 = vld [vmem:[#allocation11] ss:$0 sm:$0xff] }
 0x534   :  { %592 = vmatmul.f32.gmra.mxu0 %v3360_v30  ;;  %615 = vmatmul.f32.gmra.mxu1 %v3360_v30 }
 0x535   :  { %638 = vmatmul.f32.gmra.mxu2 %v3360_v30 }
 0x56a   :  { %v739_v4 = vpop.xlane.xlu0 %738 }
 0x56b   :  { %v740_v5 = vsub.f32 %v736_v23, %v739_v4  ;;  %v916_v23 = vld [vmem:[#allocation10] sm:$0xff] }
 0x56c   :  { %951 = vmatpush.msra.mxu0 %v916_v23  ;;  %v1042_v23 = vld [vmem:[#allocation13 + $0xe8] sm:$0xff] }
 0x56d   :  { %v741_v6 = vmul.f32 1.442695, %v740_v5 }
 0x56f   :  { %2640 = vpow2.f32 %v741_v6 }
 0x575   :  { %v2641_v8 = vpop.eup %2640 }
 0x576   :  { %v743_v44 = vsel %vm672_vm13, %v2641_v8, 0.0 }
 0x577   :  { %744 = vadd.xlane.f32.xlu0 %v743_v44 }
 0x58b   :  { %749 = vrot.lane.b32.xlu0 %v3332_v51, %s3071_s29 }
 0x5b1   :  { %v593_v39 = vpop.f32.mrf.mxu0  ;;  %v616_v40 = vpop.f32.mrf.mxu1 }
 0x5b2   :  { %v594_v45 = vadd.f32 %v593_v39, %v567_v42  ;;  %v617_v46 = vadd.f32 %v616_v40, %v568_v43  ;;  %v1073_v40 = vld [vmem:[#allocation13 + $0x1e0] sm:$0xff] }
 0x5b3   :  { %1087 = vmatpush.msra.mxu1 %v1073_v40  ;;  %v1022_v40 = vld [vmem:[#allocation13 + $0x48] sm:$0xff] }
 0x5b4   :  { %845 = vrot.lane.b32.xlu2 %v617_v46, %s3071_s29  ;;  %843 = vrot.lane.b32.xlu1 %v594_v45, %s3071_s29 }
 0x5b8   :  { %v639_v49 = vpop.f32.mrf.mxu2 }
 0x5b9   :  { %v3376_v51 = vadd.f32 %v639_v49, %v569_v9  ;;  %v1070_v49 = vld [vmem:[#allocation13 + $0x1c8] sm:$0xff] }
 0x5ea   :  { %v745_v47 = vpop.xlane.xlu0 %744 }
 0x5eb   :  { %2642 = vrcp.f32 %v745_v47  ;;  %v1076_v47 = vld [vmem:[#allocation13 + $0x1f8] sm:$0xff] }
 0x5ec   :  { %1156 = vmatpush.msrb.mxu0 %v1076_v47  ;;  %v1017_v47 = vld [vmem:[#allocation13 + $0x20] sm:$0xff] }
 0x5f1   :  { %v2643_v48 = vpop.eup %2642 }
 0x5f2   :  { %v747_v50 = vmul.f32 %v2643_v48, %v2641_v8  ;;  %v1069_v48 = vld [vmem:[#allocation13 + $0x1c0] sm:$0xff] }
 0x5f3   :  { %1088 = vmatpush.msra.mxu1 %v1069_v48  ;;  %v1018_v48 = vld [vmem:[#allocation13 + $0x28] sm:$0xff] }
 0x5fd   :  { %v750_v52 = vpop.permute.xlu0 %749 }
 0x5fe   :  { %770 = vmatpush.msra.mxu3 %v750_v52  ;;  %v1072_v52 = vld [vmem:[#allocation13 + $0x1d8] sm:$0xff] }
 0x5ff   :  { %2562 = vmatmul.msk.f32.vlgmr.msra.gmra.mxu3 %vm672_vm13, %v747_v50  ;;  %v1071_v50 = vld [vmem:[#allocation13 + $0x1d0] sm:$0xff]  ;;  %1157 = vmatpush.msrb.mxu0 %v1072_v52  ;;  %v1013_v52 = vld [vmem:[#allocation13] sm:$0xff] }
 0x600   :  { %2563 = vmatpush.xpose.msk.msrb.mxu3 %vm642_vm12, %v617_v46  ;;  %v1075_v46 = vld [vmem:[#allocation13 + $0x1f0] sm:$0xff] }
 0x604   :  { %838 = vmatpush.msra.mxu3 %v3376_v51 }
 0x607   :  { %2564 = vmatmul.msk.f32.vlgmr.msrb.gmra.mxu3 %vm642_vm12, %v594_v45  ;;  %v1074_v45 = vld [vmem:[#allocation13 + $0x1e8] sm:$0xff] }
 0x60e   :  { %v846_v42 = vpop.permute.xlu2 %845 }
 0x60f   :  { %2566 = vmatpush.xpose.msk.msra.mxu2 %vm642_vm12, %v846_v42 }
 0x613   :  { %1110 = vmatpush.msrb.mxu2 %v1074_v45  ;;  %v1023_v45 = vld [vmem:[#allocation13 + $0x50] sm:$0xff] }
 0x615   :  { %1111 = vmatpush.msrb.mxu2 %v1070_v49  ;;  %v1019_v49 = vld [vmem:[#allocation13 + $0x30] sm:$0xff] }
 0x626   :  { %v844_v43 = vpop.permute.xlu1 %843 }
 0x627   :  { %2567 = vmatmul.msk.f32.vlgmr.msra.gmra.mxu2 %vm642_vm12, %v844_v43 }
 0x682   :  { %v772_v53 = vpop.f32.mrf.mxu3 }
 0x68a   :  { %v803_v41 = vpop.f32.mrf.mxu3 }
 0x68b   :  { %v806_v9 = vmul.f32 0.125, %v803_v41 }
 0x68d   :  { %v808_v55 = vadd.f32 %v3385_v54, %v806_v9  ;;  %v1065_v9 = vld [vmem:[#allocation13 + $0x1a0] sm:$0xff] }
 0x68e   :  { %1089 = vmatpush.msra.mxu1 %v1065_v9 }
 0x68f   :  { %v809_v58 = vsel %vm672_vm13, %v808_v55, -inf }
 0x690   :  { %810 = vmax.xlane.f32.xlu0 %v809_v58  ;;  %v1067_v58 = vld [vmem:[#allocation13 + $0x1b0] sm:$0xff] }
 0x6aa   :  { %v868_v59 = vpop.f32.mrf.mxu2 }
 0x6ab   :  { %v871_v60 = vmul.f32 0.125, %v868_v59  ;;  %v1068_v59 = vld [vmem:[#allocation13 + $0x1b8] sm:$0xff] }
 0x6ac   :  { %1158 = vmatpush.msrb.mxu0 %v1068_v59 }
 0x6ad   :  { %v872_v61 = vadd.f32 %v871_v60, %v3385_v54  ;;  %v1061_v60 = vld [vmem:[#allocation13 + $0x180] sm:$0xff] }
 0x6ae   :  { %1090 = vmatpush.msra.mxu1 %v1061_v60  ;;  %1159 = vmatpush.msrb.mxu0 %v1064_v63 }
 0x6af   :  { %v873_v62 = vsel %vm672_vm13, %v872_v61, -inf }
 0x6b0   :  { %874 = vmax.xlane.f32.xlu2 %v873_v62  ;;  %v1063_v62 = vld [vmem:[#allocation13 + $0x190] sm:$0xff]  ;;  %1091 = vmatpush.msra.mxu1 %v1057_v0 }
 0x6b1   :  { %1160 = vmatpush.msrb.mxu0 %v1060_v2 }
 0x6b2   :  { %1092 = vmatpush.msra.mxu1 %v1053_v7 }
 0x6b3   :  { %1161 = vmatpush.msrb.mxu0 %v1056_v12 }
 0x6b4   :  { %1093 = vmatpush.msra.mxu1 %v1049_v14 }
 0x6b6   :  { %1094 = vmatpush.msra.mxu1 %v1045_v19 }
 0x6b8   :  { %1095 = vmatpush.msra.mxu1 %v1041_v22  ;;  %v1314_v22 = vld [vmem:[#allocation14 + $0x1f8] sm:$0xff] }
 0x6c8   :  { %776 = vrot.lane.b32.xlu2 %v772_v53, %s3071_s29 }
 0x703   :  { %v811_v16 = vpop.xlane.xlu0 %810 }
 0x704   :  { %v812_v18 = vsub.f32 %v808_v55, %v811_v16  ;;  %v1066_v55 = vld [vmem:[#allocation13 + $0x1a8] sm:$0xff]  ;;  %v1051_v16 = vld [vmem:[#allocation13 + $0x130] sm:$0xff] }
 0x705   :  { %1112 = vmatpush.msrb.mxu2 %v1066_v55 }
 0x706   :  { %v813_v20 = vmul.f32 1.442695, %v812_v18  ;;  %v1052_v18 = vld [vmem:[#allocation13 + $0x138] sm:$0xff] }
 0x707   :  { %1162 = vmatpush.msrb.mxu0 %v1052_v18 }
 0x708   :  { %2644 = vpow2.f32 %v813_v20  ;;  %v1046_v20 = vld [vmem:[#allocation13 + $0x108] sm:$0xff] }
 0x709   :  { %1163 = vmatpush.msrb.mxu0 %v1048_v17  ;;  %v1298_v17 = vld [vmem:[#allocation14 + $0x178] sm:$0xff] }
 0x70e   :  { %v2645_v24 = vpop.eup %2644 }
 0x70f   :  { %v815_v25 = vsel %vm672_vm13, %v2645_v24, 0.0 }
 0x710   :  { %816 = vadd.xlane.f32.xlu1 %v815_v25  ;;  %v1044_v25 = vld [vmem:[#allocation13 + $0xf8] sm:$0xff] }
 0x711   :  { %1164 = vmatpush.msrb.mxu0 %v1044_v25  ;;  %v1264_v25 = vld [vmem:[#allocation14 + $0x68] sm:$0xff] }
 0x723   :  { %v875_v26 = vpop.xlane.xlu2 %874 }
 0x724   :  { %v876_v28 = vsub.f32 %v872_v61, %v875_v26  ;;  %v1062_v61 = vld [vmem:[#allocation13 + $0x188] sm:$0xff]  ;;  %v1037_v26 = vld [vmem:[#allocation13 + $0xc0] sm:$0xff] }
 0x725   :  { %1113 = vmatpush.msrb.mxu2 %v1062_v61  ;;  %1096 = vmatpush.msra.mxu1 %v1037_v26  ;;  %v1280_v26 = vld [vmem:[#allocation14 + $0xe8] sm:$0xff] }
 0x726   :  { %v877_v29 = vmul.f32 1.442695, %v876_v28  ;;  %v1038_v28 = vld [vmem:[#allocation13 + $0xc8] sm:$0xff] }
 0x727   :  { %1114 = vmatpush.msrb.mxu2 %v1058_v56 }
 0x728   :  { %2646 = vpow2.f32 %v877_v29  ;;  %v1039_v29 = vld [vmem:[#allocation13 + $0xd0] sm:$0xff] }
 0x729   :  { %1115 = vmatpush.msrb.mxu2 %v1054_v10  ;;  %v3424_v10 = vld [vmem:[%s3758_s12] ss:$0 sm:$0xff] }
 0x72b   :  { %v777_v31 = vpop.permute.xlu2 %776  ;;  %1116 = vmatpush.msrb.mxu2 %v1050_v15 }
 0x72c   :  { %v779_v32 = vsel %vm642_vm12, %v3353_v13, %v777_v31  ;;  %v1040_v31 = vld [vmem:[#allocation13 + $0xd8] sm:$0xff] }
 0x72d   :  { %952 = vmatmul.f32.vlgmr.msra.gmra.mxu0 %v779_v32  ;;  %1117 = vmatpush.msrb.mxu2 %v1046_v20  ;;  %v1033_v32 = vld [vmem:[#allocation13 + $0xa0] sm:$0xff]  ;;  %v1266_v20 = vld [vmem:[#allocation14 + $0x78] sm:$0xff] }
 0x72e   :  { %v2647_v33 = vpop.eup %2646  ;;  %1165 = vmatpush.msrb.mxu0 %v1040_v31  ;;  %1097 = vmatpush.msra.mxu1 %v1033_v32  ;;  %v1263_v31 = vld [vmem:[#allocation14 + $0x60] sm:$0xff] }
 0x72f   :  { %v879_v34 = vsel %vm672_vm13, %v2647_v33, 0.0  ;;  %1118 = vmatpush.msrb.mxu2 %v1042_v23  ;;  %v1297_v23 = vld [vmem:[#allocation14 + $0x170] sm:$0xff]  ;;  %v1279_v32 = vld [vmem:[#allocation14 + $0xe0] sm:$0xff] }
 0x730   :  { %880 = vadd.xlane.f32.xlu0 %v879_v34  ;;  %v1035_v34 = vld [vmem:[#allocation13 + $0xb0] sm:$0xff] }
 0x731   :  { %1119 = vmatpush.msrb.mxu2 %v1038_v28  ;;  %v1296_v28 = vld [vmem:[#allocation14 + $0x168] sm:$0xff] }
 0x744   :  { %885 = vrot.lane.b32.xlu0 %v3376_v51, %s3071_s29 }
 0x783   :  { %v817_v35 = vpop.xlane.xlu1 %816 }
 0x784   :  { %2648 = vrcp.f32 %v817_v35  ;;  %v1036_v35 = vld [vmem:[#allocation13 + $0xb8] sm:$0xff] }
 0x785   :  { %1166 = vmatpush.msrb.mxu0 %v1036_v35  ;;  %v1262_v35 = vld [vmem:[#allocation14 + $0x58] sm:$0xff] }
 0x78a   :  { %v2649_v36 = vpop.eup %2648 }
 0x78b   :  { %v819_v37 = vmul.f32 %v2649_v36, %v2645_v24  ;;  %v1043_v24 = vld [vmem:[#allocation13 + $0xf0] sm:$0xff]  ;;  %v1029_v36 = vld [vmem:[#allocation13 + $0x80] sm:$0xff] }
 0x78c   :  { %1098 = vmatpush.msra.mxu1 %v1029_v36  ;;  %v1278_v36 = vld [vmem:[#allocation14 + $0xd8] sm:$0xff] }
 0x78d   :  { %2565 = vmatmul.msk.f32.vlgmr.msra.gmra.mxu3 %vm672_vm13, %v819_v37  ;;  %v1030_v37 = vld [vmem:[#allocation13 + $0x88] sm:$0xff] }
 0x7a3   :  { %v881_v4 = vpop.xlane.xlu0 %880 }
 0x7a4   :  { %2650 = vrcp.f32 %v881_v4  ;;  %v1031_v4 = vld [vmem:[#allocation13 + $0x90] sm:$0xff] }
 0x7aa   :  { %v953_v5 = vpop.f32.mrf.mxu0  ;;  %v2651_v8 = vpop.eup %2650 }
 0x7ab   :  { %v954_v13 = vadd.f32 %v3399_v38, %v953_v5  ;;  %v883_v44 = vmul.f32 %v2651_v8, %v2647_v33  ;;  %v1034_v33 = vld [vmem:[#allocation13 + $0xa8] sm:$0xff]  ;;  %v1032_v5 = vld [vmem:[#allocation13 + $0x98] sm:$0xff]  ;;  %v1027_v8 = vld [vmem:[#allocation13 + $0x70] sm:$0xff] }
 0x7ac   :  { %1120 = vmatpush.msrb.mxu2 %v1034_v33  ;;  %1167 = vmatpush.msrb.mxu0 %v1032_v5  ;;  %v1295_v33 = vld [vmem:[#allocation14 + $0x160] sm:$0xff]  ;;  %v1261_v5 = vld [vmem:[#allocation14 + $0x50] sm:$0xff] }
 0x7ad   :  { %v959_v6 = vadd.f32 %v954_v13, %v3312_v3  ;;  %v1025_v13 = vld [vmem:[#allocation13 + $0x60] sm:$0xff] }
 0x7ae   :  { %1121 = vmatpush.msrb.mxu2 %v1030_v37  ;;  %1099 = vmatpush.msra.mxu1 %v1025_v13  ;;  %v1294_v37 = vld [vmem:[#allocation14 + $0x158] sm:$0xff]  ;;  %v1277_v13 = vld [vmem:[#allocation14 + $0xd0] sm:$0xff] }
 0x7af   :  { %963 = vadd.xlane.f32.xlu0 %v959_v6 }
 0x7b6   :  { %v886_v39 = vpop.permute.xlu0 %885 }
 0x7b7   :  { %906 = vmatpush.msrb.mxu3 %v886_v39  ;;  %v1021_v39 = vld [vmem:[#allocation13 + $0x40] sm:$0xff] }
 0x7b8   :  { %2568 = vmatmul.msk.f32.vlgmr.msrb.gmra.mxu3 %vm672_vm13, %v883_v44  ;;  %v1028_v44 = vld [vmem:[#allocation13 + $0x78] sm:$0xff]  ;;  %1100 = vmatpush.msra.mxu1 %v1021_v39  ;;  %v1260_v39 = vld [vmem:[#allocation14 + $0x48] sm:$0xff] }
 0x7b9   :  { %1133 = vmatpush.msra.mxu3 %v1075_v46  ;;  %1168 = vmatpush.msrb.mxu0 %v1028_v44  ;;  %v1024_v46 = vld [vmem:[#allocation13 + $0x58] sm:$0xff]  ;;  %v1309_v44 = vld [vmem:[#allocation14 + $0x1d0] sm:$0xff] }
 0x7ba   :  { %1101 = vmatpush.msra.mxu1 %v1017_v47 }
 0x7bb   :  { %1134 = vmatpush.msra.mxu3 %v1071_v50  ;;  %1169 = vmatpush.msrb.mxu0 %v1024_v46  ;;  %v1020_v50 = vld [vmem:[#allocation13 + $0x38] sm:$0xff]  ;;  %v1308_v46 = vld [vmem:[#allocation14 + $0x1c8] sm:$0xff] }
 0x7bc   :  { %1102 = vmatpush.msra.mxu1 %v1013_v52 }
 0x7bd   :  { %1135 = vmatpush.msra.mxu3 %v1067_v58  ;;  %1170 = vmatpush.msrb.mxu0 %v1020_v50  ;;  %v1291_v50 = vld [vmem:[#allocation14 + $0x140] sm:$0xff] }
 0x7be   :  { %1319 = vmatpush.msrb.mxu1 %v1266_v20 }
 0x7bf   :  { %1136 = vmatpush.msra.mxu3 %v1063_v62 }
 0x7c1   :  { %1137 = vmatpush.msra.mxu3 %v1059_v1  ;;  %v3418_v1 = vld [vmem:[%s3757_s11] ss:$0 sm:$0xff] }
 0x7c3   :  { %1138 = vmatpush.msra.mxu3 %v1055_v11 }
 0x7c5   :  { %1139 = vmatpush.msra.mxu3 %v1051_v16 }
 0x7c7   :  { %1140 = vmatpush.msra.mxu3 %v1047_v21  ;;  %v1282_v21 = vld [vmem:[#allocation14 + $0xf8] sm:$0xff] }
 0x7c9   :  { %1141 = vmatpush.msra.mxu3 %v1043_v24  ;;  %v1313_v24 = vld [vmem:[#allocation14 + $0x1f0] sm:$0xff] }
 0x7cb   :  { %1142 = vmatpush.msra.mxu3 %v1039_v29  ;;  %v1312_v29 = vld [vmem:[#allocation14 + $0x1e8] sm:$0xff] }
 0x7cd   :  { %1143 = vmatpush.msra.mxu3 %v1035_v34  ;;  %v1311_v34 = vld [vmem:[#allocation14 + $0x1e0] sm:$0xff] }
 0x7cf   :  { %1144 = vmatpush.msra.mxu3 %v1031_v4  ;;  %v1310_v4 = vld [vmem:[#allocation14 + $0x1d8] sm:$0xff] }
 0x7d1   :  { %1145 = vmatpush.msra.mxu3 %v1027_v8  ;;  %v3444_v8 = vld [vmem:[%s3760_s14] sm:$0xf] }
 0x7d2   :  { %v1079_v47 = vperm.slane %v3444_v8, 0 }
 0x7d3   :  { %1146 = vmatpush.msra.mxu3 %v1023_v45  ;;  %v1292_v45 = vld [vmem:[#allocation14 + $0x148] sm:$0xff] }
 0x7d5   :  { %1147 = vmatpush.msra.mxu3 %v1019_v49  ;;  %v1275_v49 = vld [vmem:[#allocation14 + $0xc0] sm:$0xff] }
 0x810   :  { %v3409_v53 = vpop.f32.mrf.mxu3 }
 0x822   :  { %v964_v3 = vpop.xlane.xlu0 %963 }
 0x823   :  { %v967_v51 = vmul.f32 %v964_v3, %v3283_v27  ;;  %v1014_v3 = vld [vmem:[#allocation13 + $0x8] sm:$0xff] }
 0x825   :  { %v3405_v42 = vsub.f32 %v959_v6, %v967_v51  ;;  %v1026_v6 = vld [vmem:[#allocation13 + $0x68] sm:$0xff]  ;;  %v1015_v51 = vld [vmem:[#allocation13 + $0x10] sm:$0xff] }
 0x826   :  { %1122 = vmatpush.msrb.mxu2 %v1026_v6  ;;  %1148 = vmatpush.msra.mxu3 %v1015_v51  ;;  %v1293_v6 = vld [vmem:[#allocation14 + $0x150] sm:$0xff]  ;;  %v1307_v51 = vld [vmem:[#allocation14 + $0x1c0] sm:$0xff] }
 0x827   :  { %v971_v43 = vmul.f32 %v3405_v42, %v3405_v42 }
 0x828   :  { %1123 = vmatpush.msrb.mxu2 %v1022_v40  ;;  %1365 = vmatpush.msrb.mxu3 %v1298_v17  ;;  %v1276_v40 = vld [vmem:[#allocation14 + $0xc8] sm:$0xff]  ;;  %v1287_v17 = vld [vmem:[#allocation14 + $0x120] sm:$0xff] }
 0x829   :  { %973 = vadd.xlane.f32.xlu2 %v971_v43  ;;  %v1016_v43 = vld [vmem:[#allocation13 + $0x18] sm:$0xff] }
 0x82a   :  { %1124 = vmatpush.msrb.mxu2 %v1018_v48  ;;  %1171 = vmatpush.msrb.mxu0 %v1016_v43  ;;  %v1259_v48 = vld [vmem:[#allocation14 + $0x40] sm:$0xff] }
 0x82b   :  { %1366 = vmatpush.msrb.mxu3 %v1297_v23 }
 0x82c   :  { %1125 = vmatpush.msrb.mxu2 %v1014_v3  ;;  %1388 = vmatpush.msra.mxu0 %v1314_v22  ;;  %v1082_v3 = vperm.slane %v3444_v8, 3  ;;  %v1303_v22 = vld [vmem:[#allocation14 + $0x1a0] sm:$0xff] }
 0x82d   :  { %1367 = vmatpush.msrb.mxu3 %v1296_v28 }
 0x82e   :  { %1342 = vmatpush.msra.mxu2 %v1282_v21  ;;  %1389 = vmatpush.msra.mxu0 %v1313_v24  ;;  %v1271_v21 = vld [vmem:[#allocation14 + $0xa0] sm:$0xff]  ;;  %v1254_v24 = vld [vmem:[#allocation14 + $0x18] sm:$0xff] }
 0x82f   :  { %1368 = vmatpush.msrb.mxu3 %v1295_v33 }
 0x830   :  { %1390 = vmatpush.msra.mxu0 %v1312_v29  ;;  %v1302_v29 = vld [vmem:[#allocation14 + $0x198] sm:$0xff] }
 0x831   :  { %1369 = vmatpush.msrb.mxu3 %v1294_v37  ;;  %v1252_v37 = vld [vmem:[#allocation14 + $0x8] sm:$0xff] }
 0x832   :  { %1391 = vmatpush.msra.mxu0 %v1311_v34 }
 0x833   :  { %1370 = vmatpush.msrb.mxu3 %v1293_v6  ;;  %v1284_v6 = vld [vmem:[#allocation14 + $0x108] sm:$0xff] }
 0x834   :  { %1392 = vmatpush.msra.mxu0 %v1310_v4 }
 0x835   :  { %1371 = vmatpush.msrb.mxu3 %v1292_v45  ;;  %v1267_v45 = vld [vmem:[#allocation14 + $0x80] sm:$0xff] }
 0x836   :  { %1393 = vmatpush.msra.mxu0 %v1309_v44  ;;  %v1300_v44 = vld [vmem:[#allocation14 + $0x188] sm:$0xff] }
 0x837   :  { %1372 = vmatpush.msrb.mxu3 %v1291_v50  ;;  %v1299_v50 = vld [vmem:[#allocation14 + $0x180] sm:$0xff] }
 0x838   :  { %1394 = vmatpush.msra.mxu0 %v1308_v46 }
 0x83a   :  { %1395 = vmatpush.msra.mxu0 %v1307_v51 }
 0x83b   :  { %v908_v41 = vpop.f32.mrf.mxu3 }
 0x83c   :  { %912 = vrot.lane.b32.xlu1 %v908_v41, %s3071_s29 }
 0x89c   :  { %v974_v41 = vpop.xlane.xlu2 %973 }
 0x89d   :  { %v977_v9 = vmul.f32 %v974_v41, %v3283_v27  ;;  %v1080_v41 = vperm.slane %v3444_v8, 1 }
 0x89f   :  { %v979_v55 = vadd.f32 1e-12, %v977_v9  ;;  %v1258_v9 = vld [vmem:[#allocation14 + $0x38] sm:$0xff] }
 0x8a1   :  { %2652 = vrsqrt.f32 %v979_v55  ;;  %vm987_vm2 = vweird.f32 %v979_v55 }
 0x8a7   :  { %v2653_v58 = vpop.eup %2652 }
 0x8a8   :  { %v982_v59 = vmul.f32 %v2653_v58, %v979_v55  ;;  %vm988_vm1 = vweird.f32 %v2653_v58  ;;  %v1274_v55 = vld [vmem:[#allocation14 + $0xb8] sm:$0xff] }
 0x8a9   :  { %vm989_vm3 = vmor %vm987_vm2, %vm988_vm1 }
 0x8aa   :  { %v983_v60 = vmul.f32 %v2653_v58, %v982_v59 }
 0x8ac   :  { %v984_v61 = vmul.f32 0.5, %v983_v60  ;;  %v1081_v60 = vperm.slane %v3444_v8, 2 }
 0x8ae   :  { %v985_v62 = vsub.f32 1.5, %v984_v61  ;;  %v913_v63 = vpop.permute.xlu1 %912  ;;  %v1306_v61 = vld [vmem:[#allocation14 + $0x1b8] sm:$0xff] }
 0x8af   :  { %v915_v0 = vsel %vm642_vm12, %v3409_v53, %v913_v63  ;;  %1396 = vmatpush.msra.mxu0 %v1306_v61 }
 0x8b0   :  { %v986_v56 = vmul.f32 %v2653_v58, %v985_v62  ;;  %955 = vmatmul.f32.gmra.mxu0 %v915_v0  ;;  %v1257_v0 = vld [vmem:[#allocation14 + $0x30] sm:$0xff] }
 0x8b2   :  { %v990_v2 = vsel %vm989_vm3, %v2653_v58, %v986_v56  ;;  %v1290_v58 = vld [vmem:[#allocation14 + $0x138] sm:$0xff]  ;;  %v1273_v56 = vld [vmem:[#allocation14 + $0xb0] sm:$0xff] }
 0x8b3   :  { %v1001_v7 = vmul.f32 %v990_v2, %v3405_v42  ;;  %1373 = vmatpush.msrb.mxu3 %v1290_v58  ;;  %v1289_v2 = vld [vmem:[#allocation14 + $0x130] sm:$0xff] }
 0x8b5   :  { %v1006_v11 = vmul.f32 %v3418_v1, %v1001_v7  ;;  %1374 = vmatpush.msrb.mxu3 %v1289_v2 }
 0x8b7   :  { %v3428_v53 = vadd.f32 %v3424_v10, %v1006_v11  ;;  %v1305_v11 = vld [vmem:[#allocation14 + $0x1b0] sm:$0xff] }
 0x8b8   :  { %1397 = vmatpush.msra.mxu0 %v1305_v11 }
 0x8b9   :  { %1103 = vmatmul.f32.vlgmr.msra.gmra.mxu1 %v3428_v53  ;;  %1126 = vmatmul.f32.vlgmr.msrb.gmra.mxu2 %v3428_v53 }
 0x8ba   :  { %1149 = vmatmul.f32.vlgmr.msra.gmra.mxu3 %v3428_v53  ;;  %1172 = vmatmul.f32.vlgmr.msrb.gmra.mxu0 %v3428_v53 }
 0x92d   :  { %v956_v12 = vpop.f32.mrf.mxu0 }
 0x92e   :  { %v957_v42 = vadd.f32 %v3399_v38, %v956_v12  ;;  %v1265_v38 = vld [vmem:[#allocation14 + $0x70] sm:$0xff]  ;;  %v1256_v12 = vld [vmem:[#allocation14 + $0x28] sm:$0xff] }
 0x92f   :  { %1320 = vmatpush.msrb.mxu1 %v1265_v38 }
 0x930   :  { %v960_v14 = vadd.f32 %v957_v42, %v3360_v30  ;;  %v1281_v30 = vld [vmem:[#allocation14 + $0xf0] sm:$0xff]  ;;  %v1272_v42 = vld [vmem:[#allocation14 + $0xa8] sm:$0xff] }
 0x931   :  { %1343 = vmatpush.msra.mxu2 %v1281_v30  ;;  %1321 = vmatpush.msrb.mxu1 %v1264_v25  ;;  %v1270_v25 = vld [vmem:[#allocation14 + $0x98] sm:$0xff] }
 0x932   :  { %965 = vadd.xlane.f32.xlu1 %v960_v14 }
 0x933   :  { %1344 = vmatpush.msra.mxu2 %v1280_v26  ;;  %1322 = vmatpush.msrb.mxu1 %v1263_v31  ;;  %v1286_v26 = vld [vmem:[#allocation14 + $0x118] sm:$0xff]  ;;  %v1253_v31 = vld [vmem:[#allocation14 + $0x10] sm:$0xff] }
 0x935   :  { %1345 = vmatpush.msra.mxu2 %v1279_v32  ;;  %1323 = vmatpush.msrb.mxu1 %v1262_v35  ;;  %v1269_v32 = vld [vmem:[#allocation14 + $0x90] sm:$0xff] }
 0x936   :  { %v1104_v52 = vpop.f32.mrf.mxu1  ;;  %v1285_v35 = vld [vmem:[#allocation14 + $0x110] sm:$0xff] }
 0x937   :  { %1346 = vmatpush.msra.mxu2 %v1278_v36  ;;  %1324 = vmatpush.msrb.mxu1 %v1261_v5  ;;  %v1173_v43 = vpop.f32.mrf.mxu0  ;;  %v3452_v62 = vadd.f32 %v1104_v52, %v1079_v47  ;;  %v1301_v36 = vld [vmem:[#allocation14 + $0x190] sm:$0xff] }
 0x938   :  { %v3456_v7 = vadd.f32 %v1173_v43, %v1082_v3 }
 0x939   :  { %1347 = vmatpush.msra.mxu2 %v1277_v13  ;;  %1325 = vmatpush.msrb.mxu1 %v1260_v39  ;;  %v1179_v38 = vmul.f32 %v3452_v62, %v3452_v62  ;;  %v1268_v13 = vld [vmem:[#allocation14 + $0x88] sm:$0xff] }
 0x93a   :  { %v1182_v30 = vmul.f32 %v3456_v7, %v3456_v7 }
 0x93b   :  { %1348 = vmatpush.msra.mxu2 %v1276_v40  ;;  %1326 = vmatpush.msrb.mxu1 %v1259_v48  ;;  %v1187_v33 = vmul.f32 %v1179_v38, %v3452_v62  ;;  %v1251_v40 = vld [vmem:[#allocation14] sm:$0xff] }
 0x93c   :  { %v1127_v59 = vpop.f32.mrf.mxu2  ;;  %v1190_v4 = vmul.f32 %v1182_v30, %v3456_v7 }
 0x93d   :  { %1349 = vmatpush.msra.mxu2 %v1275_v49  ;;  %1327 = vmatpush.msrb.mxu1 %v1258_v9  ;;  %v1150_v63 = vpop.f32.mrf.mxu3  ;;  %v1283_v49 = vld [vmem:[#allocation14 + $0x100] sm:$0xff]  ;;  %v1195_v52 = vmul.f32 0.044715, %v1187_v33 }
 0x93e   :  { %v3464_v20 = vadd.f32 %v1150_v63, %v1081_v60  ;;  %v1198_v51 = vmul.f32 0.044715, %v1190_v4 }
 0x93f   :  { %1350 = vmatpush.msra.mxu2 %v1274_v55  ;;  %1328 = vmatpush.msrb.mxu1 %v1257_v0  ;;  %v1203_v55 = vadd.f32 %v1195_v52, %v3452_v62 }
 0x940   :  { %v1181_v28 = vmul.f32 %v3464_v20, %v3464_v20  ;;  %v1206_v58 = vadd.f32 %v1198_v51, %v3456_v7 }
 0x941   :  { %1351 = vmatpush.msra.mxu2 %v1273_v56  ;;  %1329 = vmatpush.msrb.mxu1 %v1256_v12  ;;  %v1211_v0 = vmul.f32 0.7978846, %v1203_v55 }
 0x942   :  { %v1189_v46 = vmul.f32 %v1181_v28, %v3464_v20  ;;  %v1214_v2 = vmul.f32 0.7978846, %v1206_v58 }
 0x943   :  { %1352 = vmatpush.msra.mxu2 %v1272_v42 }
 0x944   :  { %v1197_v9 = vmul.f32 0.044715, %v1189_v46 }
 0x945   :  { %1353 = vmatpush.msra.mxu2 %v1271_v21 }
 0x946   :  { %v1205_v63 = vadd.f32 %v1197_v9, %v3464_v20 }
 0x947   :  { %1354 = vmatpush.msra.mxu2 %v1270_v25 }
 0x948   :  { %v1213_v42 = vmul.f32 0.7978846, %v1205_v63 }
 0x949   :  { %1355 = vmatpush.msra.mxu2 %v1269_v32 }
 0x94b   :  { %1356 = vmatpush.msra.mxu2 %v1268_v13 }
 0x94d   :  { %1357 = vmatpush.msra.mxu2 %v1267_v45 }
 0x9a5   :  { %v966_v15 = vpop.xlane.xlu1 %965 }
 0x9a6   :  { %v968_v16 = vmul.f32 %v966_v15, %v3283_v27  ;;  %v1288_v15 = vld [vmem:[#allocation14 + $0x128] sm:$0xff] }
 0x9a7   :  { %1375 = vmatpush.msrb.mxu3 %v1288_v15 }
 0x9a8   :  { %v3437_v18 = vsub.f32 %v960_v14, %v968_v16  ;;  %v3460_v14 = vadd.f32 %v1127_v59, %v1080_v41  ;;  %v1304_v16 = vld [vmem:[#allocation14 + $0x1a8] sm:$0xff] }
 0x9a9   :  { %1398 = vmatpush.msra.mxu0 %v1304_v16  ;;  %1376 = vmatpush.msrb.mxu3 %v1287_v17 }
 0x9aa   :  { %v972_v19 = vmul.f32 %v3437_v18, %v3437_v18  ;;  %v1180_v23 = vmul.f32 %v3460_v14, %v3460_v14 }
 0x9ab   :  { %1399 = vmatpush.msra.mxu0 %v1303_v22  ;;  %1377 = vmatpush.msrb.mxu3 %v1286_v26 }
 0x9ac   :  { %975 = vadd.xlane.f32.xlu0 %v972_v19  ;;  %v1255_v19 = vld [vmem:[#allocation14 + $0x20] sm:$0xff]  ;;  %v1188_v39 = vmul.f32 %v1180_v23, %v3460_v14 }
 0x9ad   :  { %1330 = vmatpush.msrb.mxu1 %v1255_v19  ;;  %1400 = vmatpush.msra.mxu0 %v1302_v29 }
 0x9ae   :  { %1378 = vmatpush.msrb.mxu3 %v1285_v35  ;;  %v1196_v43 = vmul.f32 0.044715, %v1188_v39 }
 0x9af   :  { %1331 = vmatpush.msrb.mxu1 %v1254_v24  ;;  %1401 = vmatpush.msra.mxu0 %v1301_v36 }
 0x9b0   :  { %1379 = vmatpush.msrb.mxu3 %v1284_v6  ;;  %v1204_v59 = vadd.f32 %v1196_v43, %v3460_v14 }
 0x9b1   :  { %1332 = vmatpush.msrb.mxu1 %v1253_v31  ;;  %1402 = vmatpush.msra.mxu0 %v1300_v44 }
 0x9b2   :  { %1380 = vmatpush.msrb.mxu3 %v1283_v49  ;;  %v1212_v11 = vmul.f32 0.7978846, %v1204_v59 }
 0x9b3   :  { %1333 = vmatpush.msrb.mxu1 %v1252_v37  ;;  %1403 = vmatpush.msra.mxu0 %v1299_v50 }
 0x9b5   :  { %1334 = vmatpush.msrb.mxu1 %v1251_v40 }
 0xa1f   :  { %v976_v34 = vpop.xlane.xlu0 %975 }
 0xa20   :  { %v978_v5 = vmul.f32 %v976_v34, %v3283_v27 }
 0xa22   :  { %v980_v48 = vadd.f32 1e-12, %v978_v5 }
 0xa24   :  { %2654 = vrsqrt.f32 %v980_v48  ;;  %vm997_vm5 = vweird.f32 %v980_v48 }
 0xa25   :  { %2656 = vtanh.f32 %v1211_v0 }
 0xa26   :  { %2658 = vtanh.f32 %v1214_v2 }
 0xa27   :  { %2660 = vtanh.f32 %v1212_v11 }
 0xa28   :  { %2662 = vtanh.f32 %v1213_v42 }
 0xa2a   :  { %v2655_v61 = vpop.eup %2654 }
 0xa2b   :  { %v992_v56 = vmul.f32 %v2655_v61, %v980_v48  ;;  %vm998_vm4 = vweird.f32 %v2655_v61  ;;  %v2657_v21 = vpop.eup %2656 }
 0xa2c   :  { %vm999_vm6 = vmor %vm997_vm5, %vm998_vm4  ;;  %v2659_v22 = vpop.eup %2658  ;;  %v1227_v26 = vadd.f32 1.0, %v2657_v21 }
 0xa2d   :  { %v993_v12 = vmul.f32 %v2655_v61, %v992_v56  ;;  %v2661_v30 = vpop.eup %2660  ;;  %v1230_v31 = vadd.f32 1.0, %v2659_v22 }
 0xa2e   :  { %v2663_v23 = vpop.eup %2662  ;;  %v1228_v28 = vadd.f32 1.0, %v2661_v30 }
 0xa2f   :  { %v994_v15 = vmul.f32 0.5, %v993_v12  ;;  %v1229_v29 = vadd.f32 1.0, %v2663_v23  ;;  %v1238_v34 = vmul.f32 0.5, %v1230_v31 }
 0xa30   :  { %v1236_v32 = vmul.f32 0.5, %v1228_v28 }
 0xa31   :  { %v995_v16 = vsub.f32 1.5, %v994_v15  ;;  %v1237_v33 = vmul.f32 0.5, %v1229_v29  ;;  %v1246_v36 = vmul.f32 %v1238_v34, %v3456_v7 }
 0xa33   :  { %v996_v19 = vmul.f32 %v2655_v61, %v995_v16  ;;  %v1245_v35 = vmul.f32 %v1237_v33, %v3464_v20 }
 0xa35   :  { %v1000_v17 = vsel %vm999_vm6, %v2655_v61, %v996_v19 }
 0xa36   :  { %v1002_v38 = vmul.f32 %v1000_v17, %v3437_v18  ;;  %v1235_v18 = vmul.f32 0.5, %v1227_v26 }
 0xa38   :  { %v1007_v24 = vmul.f32 %v3418_v1, %v1002_v38  ;;  %v1243_v1 = vmul.f32 %v1235_v18, %v3452_v62 }
 0xa3a   :  { %v3486_v25 = vadd.f32 %v3424_v10, %v1007_v24  ;;  %v1244_v10 = vmul.f32 %v1236_v32, %v3460_v14 }
 0xa3c   :  { %1106 = vmatmul.f32.gmra.mxu1 %v3486_v25  ;;  %1129 = vmatmul.f32.gmra.mxu2 %v3486_v25 }
 0xa3d   :  { %1152 = vmatmul.f32.gmra.mxu3 %v3486_v25  ;;  %1175 = vmatmul.f32.gmra.mxu0 %v3486_v25 }
 0xa44   :  { %1335 = vmatmul.f32.vlgmr.msrb.gmra.mxu1 %v1243_v1  ;;  %1358 = vmatmul.f32.vlgmr.msra.gmra.mxu2 %v1244_v10  ;;  %v1511_v1 = vld [vmem:[#allocation7 + $0x2e8] sm:$0xff]  ;;  %v1512_v10 = vld [vmem:[#allocation7 + $0x2f0] sm:$0xff] }
 0xa45   :  { %1381 = vmatmul.f32.vlgmr.msrb.gmra.mxu3 %v1245_v35  ;;  %1404 = vmatmul.f32.vlgmr.msra.gmra.mxu0 %v1246_v36  ;;  %v1513_v35 = vld [vmem:[#allocation7 + $0x2f8] sm:$0xff] }
 0xa46   :  { %1523 = vmatpush.msra.mxu1 %v1511_v1  ;;  %1546 = vmatpush.msrb.mxu2 %v1512_v10 }
 0xa47   :  { %1569 = vmatpush.msra.mxu3 %v1513_v35 }
 0xab9   :  { %v1107_v37 = vpop.f32.mrf.mxu1 }
 0xaba   :  { %v1108_v4 = vadd.f32 %v1107_v37, %v1079_v47  ;;  %v1176_v5 = vpop.f32.mrf.mxu0  ;;  %v3504_v47 = vld [vmem:[#allocation16] ss:$0 sm:$0xff]  ;;  %v1508_v37 = vld [vmem:[#allocation7 + $0x2d0] sm:$0xff] }
 0xabb   :  { %v1177_v13 = vadd.f32 %v1176_v5, %v1082_v3  ;;  %v1510_v5 = vld [vmem:[#allocation7 + $0x2e0] sm:$0xff]  ;;  %1524 = vmatpush.msra.mxu1 %v1508_v37 }
 0xabc   :  { %v1183_v6 = vmul.f32 %v1108_v4, %v1108_v4  ;;  %1570 = vmatpush.msra.mxu3 %v1510_v5 }
 0xabd   :  { %v1186_v62 = vmul.f32 %v1177_v13, %v1177_v13 }
 0xabe   :  { %v1191_v44 = vmul.f32 %v1183_v6, %v1108_v4 }
 0xabf   :  { %v1194_v14 = vmul.f32 %v1186_v62, %v1177_v13  ;;  %v1130_v39 = vpop.f32.mrf.mxu2 }
 0xac0   :  { %v1131_v7 = vadd.f32 %v1130_v39, %v1080_v41  ;;  %v1153_v20 = vpop.f32.mrf.mxu3  ;;  %v1199_v40 = vmul.f32 0.044715, %v1191_v44 }
 0xac1   :  { %v1154_v45 = vadd.f32 %v1153_v20, %v1081_v60  ;;  %v1202_v46 = vmul.f32 0.044715, %v1194_v14  ;;  %v1336_v3 = vpop.f32.mrf.mxu1 }
 0xac2   :  { %v1184_v48 = vmul.f32 %v1131_v7, %v1131_v7  ;;  %v1207_v49 = vadd.f32 %v1199_v40, %v1108_v4  ;;  %v1337_v58 = vadd.f32 %v3504_v47, %v1336_v3  ;;  %v1405_v11 = vpop.f32.mrf.mxu0  ;;  %v1503_v3 = vld [vmem:[#allocation7 + $0x2a8] sm:$0xff] }
 0xac3   :  { %v1185_v50 = vmul.f32 %v1154_v45, %v1154_v45  ;;  %v1210_v52 = vadd.f32 %v1202_v46, %v1177_v13  ;;  %v1505_v46 = vld [vmem:[#allocation7 + $0x2b8] sm:$0xff] }
 0xac4   :  { %v1192_v51 = vmul.f32 %v1184_v48, %v1131_v7  ;;  %v1215_v43 = vmul.f32 0.7978846, %v1207_v49  ;;  %v1506_v48 = vld [vmem:[#allocation7 + $0x2c0] sm:$0xff]  ;;  %v1507_v49 = vld [vmem:[#allocation7 + $0x2c8] sm:$0xff]  ;;  %1525 = vmatpush.msra.mxu1 %v1505_v46 }
 0xac5   :  { %v1193_v9 = vmul.f32 %v1185_v50, %v1154_v45  ;;  %v1218_v55 = vmul.f32 0.7978846, %v1210_v52  ;;  %1571 = vmatpush.msra.mxu3 %v1507_v49  ;;  %v1502_v50 = vld [vmem:[#allocation7 + $0x2a0] sm:$0xff]  ;;  %v1499_v52 = vld [vmem:[#allocation7 + $0x288] sm:$0xff] }
 0xac6   :  { %2664 = vtanh.f32 %v1215_v43  ;;  %v1200_v41 = vmul.f32 0.044715, %v1192_v51  ;;  %1526 = vmatpush.msra.mxu1 %v1502_v50  ;;  %v1500_v51 = vld [vmem:[#allocation7 + $0x290] sm:$0xff]  ;;  %v1501_v43 = vld [vmem:[#allocation7 + $0x298] sm:$0xff]  ;;  %v3530_v49 = vld [vmem:[#allocation8 + $0x3] sm:$0x7] }
 0xac7   :  { %v1359_v59 = vpop.f32.mrf.mxu2  ;;  %2666 = vtanh.f32 %v1218_v55  ;;  %v1201_v8 = vmul.f32 0.044715, %v1193_v9  ;;  %v1497_v9 = vld [vmem:[#allocation7 + $0x278] sm:$0xff]  ;;  %v1498_v55 = vld [vmem:[#allocation7 + $0x280] sm:$0xff] }
 0xac8   :  { %v1360_v60 = vadd.f32 %v1359_v59, %v1337_v58  ;;  %v1208_v61 = vadd.f32 %v1200_v41, %v1131_v7  ;;  %v1382_v63 = vpop.f32.mrf.mxu3  ;;  %1527 = vmatpush.msra.mxu1 %v1499_v52  ;;  %v1493_v58 = vld [vmem:[#allocation7 + $0x258] sm:$0xff]  ;;  %v1494_v41 = vld [vmem:[#allocation7 + $0x260] sm:$0xff]  ;;  %v1495_v59 = vld [vmem:[#allocation7 + $0x268] sm:$0xff] }
 0xac9   :  { %v1209_v0 = vadd.f32 %v1201_v8, %v1154_v45  ;;  %v1490_v8 = vld [vmem:[#allocation7 + $0x240] sm:$0xff] }
 0xaca   :  { %v1383_v56 = vadd.f32 %v1382_v63, %v1360_v60  ;;  %v1216_v2 = vmul.f32 0.7978846, %v1208_v61  ;;  %v1491_v60 = vld [vmem:[#allocation7 + $0x248] sm:$0xff]  ;;  %v1492_v61 = vld [vmem:[#allocation7 + $0x250] sm:$0xff] }
 0xacb   :  { %v1217_v12 = vmul.f32 0.7978846, %v1209_v0  ;;  %v1487_v63 = vld [vmem:[#allocation7 + $0x228] sm:$0xff]  ;;  %v1488_v0 = vld [vmem:[#allocation7 + $0x230] sm:$0xff] }
 0xacc   :  { %v2665_v42 = vpop.eup %2664  ;;  %v1406_v15 = vadd.f32 %v1405_v11, %v1383_v56  ;;  %2668 = vtanh.f32 %v1216_v2  ;;  %v1489_v56 = vld [vmem:[#allocation7 + $0x238] sm:$0xff]  ;;  %v1484_v2 = vld [vmem:[#allocation7 + $0x210] sm:$0xff] }
 0xacd   :  { %v2667_v16 = vpop.eup %2666  ;;  %v1231_v19 = vadd.f32 1.0, %v2665_v42  ;;  %2670 = vtanh.f32 %v1217_v12  ;;  %v1485_v11 = vld [vmem:[#allocation7 + $0x218] sm:$0xff]  ;;  %v1486_v12 = vld [vmem:[#allocation7 + $0x220] sm:$0xff] }
 0xace   :  { %v1411_v21 = vadd.f32 %v1406_v15, %v3428_v53  ;;  %v1234_v17 = vadd.f32 1.0, %v2667_v16  ;;  %v1481_v42 = vld [vmem:[#allocation7 + $0x1f8] sm:$0xff]  ;;  %v1482_v15 = vld [vmem:[#allocation7 + $0x200] sm:$0xff]  ;;  %v1483_v16 = vld [vmem:[#allocation7 + $0x208] sm:$0xff] }
 0xacf   :  { %v1239_v22 = vmul.f32 0.5, %v1231_v19  ;;  %v1478_v19 = vld [vmem:[#allocation7 + $0x1e0] sm:$0xff] }
 0xad0   :  { %1415 = vadd.xlane.f32.xlu0 %v1411_v21  ;;  %v1242_v38 = vmul.f32 0.5, %v1234_v17  ;;  %v1480_v17 = vld [vmem:[#allocation7 + $0x1f0] sm:$0xff] }
 0xad1   :  { %v1247_v30 = vmul.f32 %v1239_v22, %v1108_v4  ;;  %v1509_v4 = vld [vmem:[#allocation7 + $0x2d8] sm:$0xff]  ;;  %v1475_v22 = vld [vmem:[#allocation7 + $0x1c8] sm:$0xff] }
 0xad2   :  { %v2669_v23 = vpop.eup %2668  ;;  %v1250_v24 = vmul.f32 %v1242_v38, %v1177_v13  ;;  %1547 = vmatpush.msrb.mxu2 %v1509_v4  ;;  %v1476_v38 = vld [vmem:[#allocation7 + $0x1d0] sm:$0xff] }
 0xad3   :  { %v2671_v26 = vpop.eup %2670  ;;  %1338 = vmatmul.f32.gmra.mxu1 %v1247_v30  ;;  %v1232_v28 = vadd.f32 1.0, %v2669_v23  ;;  %v1477_v30 = vld [vmem:[#allocation7 + $0x1d8] sm:$0xff]  ;;  %v1472_v23 = vld [vmem:[#allocation7 + $0x1b0] sm:$0xff] }
 0xad4   :  { %1407 = vmatmul.f32.gmra.mxu0 %v1250_v24  ;;  %v1233_v29 = vadd.f32 1.0, %v2671_v26  ;;  %1548 = vmatpush.msrb.mxu2 %v1506_v48  ;;  %v1473_v24 = vld [vmem:[#allocation7 + $0x1b8] sm:$0xff]  ;;  %v1474_v26 = vld [vmem:[#allocation7 + $0x1c0] sm:$0xff] }
 0xad5   :  { %v1240_v31 = vmul.f32 0.5, %v1232_v28  ;;  %v1469_v28 = vld [vmem:[#allocation7 + $0x198] sm:$0xff] }
 0xad6   :  { %v1241_v18 = vmul.f32 0.5, %v1233_v29  ;;  %1549 = vmatpush.msrb.mxu2 %v1503_v3  ;;  %v1470_v29 = vld [vmem:[#allocation7 + $0x1a0] sm:$0xff]  ;;  %v1517_v3 = vperm.slane %v3530_v49, 0 }
 0xad7   :  { %v1248_v32 = vmul.f32 %v1240_v31, %v1131_v7  ;;  %v1471_v31 = vld [vmem:[#allocation7 + $0x1a8] sm:$0xff] }
 0xad8   :  { %v1249_v33 = vmul.f32 %v1241_v18, %v1154_v45  ;;  %1550 = vmatpush.msrb.mxu2 %v1500_v51  ;;  %v1466_v18 = vld [vmem:[#allocation7 + $0x180] sm:$0xff] }
 0xad9   :  { %1361 = vmatmul.f32.gmra.mxu2 %v1248_v32  ;;  %v1467_v32 = vld [vmem:[#allocation7 + $0x188] sm:$0xff] }
 0xada   :  { %1384 = vmatmul.f32.gmra.mxu3 %v1249_v33  ;;  %1551 = vmatpush.msrb.mxu2 %v1497_v9  ;;  %v1468_v33 = vld [vmem:[#allocation7 + $0x190] sm:$0xff] }
 0xadc   :  { %1552 = vmatpush.msrb.mxu2 %v1494_v41 }
 0xade   :  { %1553 = vmatpush.msrb.mxu2 %v1491_v60 }
 0xae0   :  { %1554 = vmatpush.msrb.mxu2 %v1488_v0 }
 0xae2   :  { %1555 = vmatpush.msrb.mxu2 %v1485_v11 }
 0xae4   :  { %1556 = vmatpush.msrb.mxu2 %v1482_v15 }
 0xb43   :  { %v1416_v34 = vpop.xlane.xlu0 %1415 }
 0xb44   :  { %v1419_v53 = vmul.f32 %v1416_v34, %v3283_v27 }
 0xb46   :  { %v3509_v36 = vsub.f32 %v1411_v21, %v1419_v53  ;;  %v1479_v21 = vld [vmem:[#allocation7 + $0x1e8] sm:$0xff] }
 0xb47   :  { %1557 = vmatpush.msrb.mxu2 %v1479_v21 }
 0xb48   :  { %v1423_v13 = vmul.f32 %v3509_v36, %v3509_v36 }
 0xb49   :  { %1558 = vmatpush.msrb.mxu2 %v1476_v38 }
 0xb4a   :  { %1425 = vadd.xlane.f32.xlu2 %v1423_v13 }
 0xb4b   :  { %1559 = vmatpush.msrb.mxu2 %v1473_v24 }
 0xb4d   :  { %1560 = vmatpush.msrb.mxu2 %v1470_v29 }
 0xb4f   :  { %1561 = vmatpush.msrb.mxu2 %v1467_v32 }
 0xb50   :  { %v1339_v6 = vpop.f32.mrf.mxu1 }
 0xb51   :  { %v1340_v62 = vadd.f32 %v3504_v47, %v1339_v6  ;;  %v1408_v20 = vpop.f32.mrf.mxu0  ;;  %v1504_v47 = vld [vmem:[#allocation7 + $0x2b0] sm:$0xff]  ;;  %v2620_v6 = vld [vmem:[%s3763_s17] ss:$0 sm:$0xff] }
 0xb52   :  { %1572 = vmatpush.msra.mxu3 %v1504_v47 }
 0xb54   :  { %1573 = vmatpush.msra.mxu3 %v1501_v43  ;;  %v1518_v43 = vperm.slane %v3530_v49, 1 }
 0xb56   :  { %1574 = vmatpush.msra.mxu3 %v1498_v55 }
 0xb58   :  { %1575 = vmatpush.msra.mxu3 %v1495_v59 }
 0xb5a   :  { %1576 = vmatpush.msra.mxu3 %v1492_v61 }
 0xb5c   :  { %v1362_v44 = vpop.f32.mrf.mxu2  ;;  %1577 = vmatpush.msra.mxu3 %v1489_v56 }
 0xb5d   :  { %v1363_v14 = vadd.f32 %v1362_v44, %v1340_v62  ;;  %v1385_v39 = vpop.f32.mrf.mxu3 }
 0xb5e   :  { %1578 = vmatpush.msra.mxu3 %v1486_v12 }
 0xb5f   :  { %v1386_v7 = vadd.f32 %v1385_v39, %v1363_v14  ;;  %v2621_v14 = vld [vmem:[#allocation17] ss:$0 sm:$0xff] }
 0xb60   :  { %1579 = vmatpush.msra.mxu3 %v1483_v16 }
 0xb61   :  { %v1409_v40 = vadd.f32 %v1408_v20, %v1386_v7 }
 0xb62   :  { %1580 = vmatpush.msra.mxu3 %v1480_v17 }
 0xb63   :  { %v3515_v45 = vadd.f32 %v1409_v40, %v3486_v25  ;;  %v1496_v25 = vld [vmem:[#allocation7 + $0x270] sm:$0xff] }
 0xb64   :  { %1528 = vmatpush.msra.mxu1 %v1496_v25  ;;  %1581 = vmatpush.msra.mxu3 %v1477_v30 }
 0xb65   :  { %1417 = vadd.xlane.f32.xlu0 %v3515_v45 }
 0xb66   :  { %1529 = vmatpush.msra.mxu1 %v1493_v58  ;;  %1582 = vmatpush.msra.mxu3 %v1474_v26 }
 0xb68   :  { %1530 = vmatpush.msra.mxu1 %v1490_v8  ;;  %1583 = vmatpush.msra.mxu3 %v1471_v31 }
 0xb6a   :  { %1531 = vmatpush.msra.mxu1 %v1487_v63  ;;  %1584 = vmatpush.msra.mxu3 %v1468_v33 }
 0xb6c   :  { %1532 = vmatpush.msra.mxu1 %v1484_v2 }
 0xb6e   :  { %1533 = vmatpush.msra.mxu1 %v1481_v42 }
 0xb70   :  { %1534 = vmatpush.msra.mxu1 %v1478_v19 }
 0xb72   :  { %1535 = vmatpush.msra.mxu1 %v1475_v22 }
 0xb74   :  { %1536 = vmatpush.msra.mxu1 %v1472_v23 }
 0xb76   :  { %1537 = vmatpush.msra.mxu1 %v1469_v28 }
 0xb78   :  { %1538 = vmatpush.msra.mxu1 %v1466_v18 }
 0xbbd   :  { %v1426_v34 = vpop.xlane.xlu2 %1425 }
 0xbbe   :  { %v1429_v53 = vmul.f32 %v1426_v34, %v3283_v27 }
 0xbc0   :  { %v1431_v1 = vadd.f32 1e-12, %v1429_v53 }
 0xbc2   :  { %2672 = vrsqrt.f32 %v1431_v1  ;;  %vm1439_vm8 = vweird.f32 %v1431_v1 }
 0xbc8   :  { %v2673_v10 = vpop.eup %2672 }
 0xbc9   :  { %v1434_v35 = vmul.f32 %v2673_v10, %v1431_v1  ;;  %vm1440_vm7 = vweird.f32 %v2673_v10 }
 0xbca   :  { %vm1441_vm9 = vmor %vm1439_vm8, %vm1440_vm7 }
 0xbcb   :  { %v1435_v37 = vmul.f32 %v2673_v10, %v1434_v35 }
 0xbcd   :  { %v1436_v4 = vmul.f32 0.5, %v1435_v37 }
 0xbcf   :  { %v1437_v5 = vsub.f32 1.5, %v1436_v4 }
 0xbd1   :  { %v1438_v13 = vmul.f32 %v2673_v10, %v1437_v5 }
 0xbd3   :  { %v1442_v62 = vsel %vm1441_vm9, %v2673_v10, %v1438_v13  ;;  %vm2433_vm9 = vcmask 1040384  }
 0xbd4   :  { %v1453_v44 = vmul.f32 %v1442_v62, %v3509_v36 }
 0xbd6   :  { %v1458_v39 = vmul.f32 %v2620_v6, %v1453_v44 }
 0xbd8   :  { %v1418_v7 = vpop.xlane.xlu0 %1417  ;;  %v3523_v20 = vadd.f32 %v2621_v14, %v1458_v39 }
 0xbd9   :  { %v1420_v40 = vmul.f32 %v1418_v7, %v3283_v27 }
 0xbda   :  { %1539 = vmatmul.f32.vlgmr.msra.gmra.mxu1 %v3523_v20  ;;  %1562 = vmatmul.f32.vlgmr.msrb.gmra.mxu2 %v3523_v20 }
 0xbdb   :  { %v1422_v46 = vsub.f32 %v3515_v45, %v1420_v40  ;;  %1585 = vmatmul.f32.vlgmr.msra.gmra.mxu3 %v3523_v20  ;;  %v1519_v45 = vperm.slane %v3530_v49, 2 }
 0xbdd   :  { %v1424_v48 = vmul.f32 %v1422_v46, %v1422_v46 }
 0xbdf   :  { %1427 = vadd.xlane.f32.xlu1 %v1424_v48 }
 0xc52   :  { %v1428_v36 = vpop.xlane.xlu1 %1427 }
 0xc53   :  { %v1430_v50 = vmul.f32 %v1428_v36, %v3283_v27 }
 0xc55   :  { %v1432_v47 = vadd.f32 1e-12, %v1430_v50 }
 0xc57   :  { %2674 = vrsqrt.f32 %v1432_v47  ;;  %v1540_v52 = vpop.f32.mrf.mxu1  ;;  %vm1449_vm11 = vweird.f32 %v1432_v47 }
 0xc58   :  { %v1541_v51 = vadd.f32 %v1540_v52, %v1517_v3 }
 0xc5a   :  { %1654 = vrot.lane.b32.xlu0 %v1541_v51, %s3071_s29 }
 0xc5d   :  { %v2675_v25 = vpop.eup %2674  ;;  %v1563_v9 = vpop.f32.mrf.mxu2 }
 0xc5e   :  { %v1444_v55 = vmul.f32 %v2675_v25, %v1432_v47  ;;  %v1564_v58 = vadd.f32 %v1563_v9, %v1518_v43  ;;  %v1586_v41 = vpop.f32.mrf.mxu3  ;;  %vm1450_vm10 = vweird.f32 %v2675_v25 }
 0xc5f   :  { %v3537_v59 = vadd.f32 %v1586_v41, %v1519_v45  ;;  %vm1451_vm14 = vmor %vm1449_vm11, %vm1450_vm10  ;;  %vm2516_vm10 = vcmask 17408  }
 0xc60   :  { %v1445_v8 = vmul.f32 %v2675_v25, %v1444_v55  ;;  %2569 = vmatpush.xpose.msk.msrb.mxu0 %vm642_vm12, %v1564_v58  ;;  %1656 = vrot.lane.b32.xlu1 %v1564_v58, %s3071_s29 }
 0xc61   :  { %1649 = vmatpush.msrb.mxu1 %v3537_v59 }
 0xc62   :  { %v1446_v60 = vmul.f32 0.5, %v1445_v8 }
 0xc63   :  { %2570 = vmatmul.msk.f32.vlgmr.msrb.gmra.mxu0 %vm642_vm12, %v1541_v51 }
 0xc64   :  { %v1447_v61 = vsub.f32 1.5, %v1446_v60 }
 0xc66   :  { %v1448_v63 = vmul.f32 %v2675_v25, %v1447_v61 }
 0xc68   :  { %v1452_v0 = vsel %vm1451_vm14, %v2675_v25, %v1448_v63 }
 0xc69   :  { %v1454_v56 = vmul.f32 %v1452_v0, %v1422_v46 }
 0xc6b   :  { %v1459_v2 = vmul.f32 %v2620_v6, %v1454_v56 }
 0xc6d   :  { %v3543_v11 = vadd.f32 %v2621_v14, %v1459_v2 }
 0xc6f   :  { %1542 = vmatmul.f32.gmra.mxu1 %v3543_v11  ;;  %1565 = vmatmul.f32.gmra.mxu2 %v3543_v11 }
 0xc70   :  { %1588 = vmatmul.f32.gmra.mxu3 %v3543_v11 }
 0xccc   :  { %v1655_v31 = vpop.permute.xlu0 %1654 }
 0xcd2   :  { %v1657_v12 = vpop.permute.xlu1 %1656 }
 0xcd3   :  { %2572 = vmatpush.xpose.msk.msra.mxu1 %vm642_vm12, %v1657_v12 }
 0xce0   :  { %v1615_v42 = vpop.f32.mrf.mxu0 }
 0xce1   :  { %v1618_v15 = vmul.f32 0.125, %v1615_v42  ;;  %v1877_v42 = vld [vmem:[#allocation10 + $0xf0] sm:$0xff] }
 0xce3   :  { %v1619_v16 = vadd.f32 %v1618_v15, %v3341_v57  ;;  %v1876_v15 = vld [vmem:[#allocation10 + $0xe8] sm:$0xff] }
 0xce5   :  { %v1620_v19 = vsel %vm672_vm13, %v1619_v16, -inf }
 0xce6   :  { %1621 = vmax.xlane.f32.xlu2 %v1620_v19  ;;  %v1874_v19 = vld [vmem:[#allocation10 + $0xd8] sm:$0xff] }
 0xcec   :  { %v1543_v17 = vpop.f32.mrf.mxu1 }
 0xced   :  { %v1544_v38 = vadd.f32 %v1543_v17, %v1517_v3  ;;  %v1872_v17 = vld [vmem:[#allocation10 + $0xc8] sm:$0xff] }
 0xcf2   :  { %v1566_v21 = vpop.f32.mrf.mxu2 }
 0xcf3   :  { %v1567_v22 = vadd.f32 %v1566_v21, %v1518_v43  ;;  %v1589_v32 = vpop.f32.mrf.mxu3  ;;  %v1873_v21 = vld [vmem:[#allocation10 + $0xd0] sm:$0xff] }
 0xcf4   :  { %v1590_v53 = vadd.f32 %v1589_v32, %v1519_v45  ;;  %v1863_v32 = vld [vmem:[#allocation10 + $0x80] sm:$0xff] }
 0xcf5   :  { %2575 = vmatpush.xpose.msk.msra.mxu0 %vm642_vm12, %v1567_v22 }
 0xcf8   :  { %2576 = vmatmul.msk.f32.vlgmr.msra.gmra.mxu0 %vm642_vm12, %v1544_v38 }
 0xcfe   :  { %1791 = vrot.lane.b32.xlu2 %v1567_v22, %s3071_s29  ;;  %v1871_v22 = vld [vmem:[#allocation10 + $0xc0] sm:$0xff] }
 0xd59   :  { %v1622_v30 = vpop.xlane.xlu2 %1621 }
 0xd5a   :  { %v1623_v23 = vsub.f32 %v1619_v16, %v1622_v30  ;;  %v1875_v16 = vld [vmem:[#allocation10 + $0xe0] sm:$0xff]  ;;  %v1869_v30 = vld [vmem:[#allocation10 + $0xb0] sm:$0xff] }
 0xd5c   :  { %v1624_v24 = vmul.f32 1.442695, %v1623_v23  ;;  %v1868_v23 = vld [vmem:[#allocation10 + $0xa8] sm:$0xff] }
 0xd5e   :  { %2676 = vpow2.f32 %v1624_v24  ;;  %v1867_v24 = vld [vmem:[#allocation10 + $0xa0] sm:$0xff] }
 0xd61   :  { %v1792_v26 = vpop.permute.xlu2 %1791 }
 0xd62   :  { %2578 = vmatpush.xpose.msk.msra.mxu2 %vm642_vm12, %v1792_v26  ;;  %v1866_v26 = vld [vmem:[#allocation10 + $0x98] sm:$0xff] }
 0xd64   :  { %v2677_v28 = vpop.eup %2676 }
 0xd65   :  { %v1626_v29 = vsel %vm672_vm13, %v2677_v28, 0.0 }
 0xd66   :  { %1627 = vadd.xlane.f32.xlu0 %v1626_v29  ;;  %v1865_v29 = vld [vmem:[#allocation10 + $0x90] sm:$0xff] }
 0xd75   :  { %v1750_v4 = vpop.f32.mrf.mxu0 }
 0xd76   :  { %v1753_v13 = vmul.f32 0.125, %v1750_v4 }
 0xd78   :  { %v1754_v14 = vadd.f32 %v1753_v13, %v3385_v54 }
 0xd7a   :  { %1789 = vrot.lane.b32.xlu0 %v1544_v38, %s3071_s29  ;;  %v1755_v7 = vsel %vm672_vm13, %v1754_v14, -inf  ;;  %v1870_v38 = vld [vmem:[#allocation10 + $0xb8] sm:$0xff] }
 0xdd9   :  { %v1628_v18 = vpop.xlane.xlu0 %1627 }
 0xdda   :  { %2678 = vrcp.f32 %v1628_v18 }
 0xde0   :  { %v2679_v33 = vpop.eup %2678 }
 0xde1   :  { %v1630_v34 = vmul.f32 %v2679_v33, %v2677_v28 }
 0xde3   :  { %2571 = vmatmul.msk.f32.vlgmr.msrb.gmra.mxu1 %vm672_vm13, %v1630_v34 }
 0xde4   :  { %1784 = vmatpush.msrb.mxu1 %v1590_v53 }
 0xdeb   :  { %2573 = vmatmul.msk.f32.vlgmr.msra.gmra.mxu1 %vm642_vm12, %v1655_v31  ;;  %v1864_v31 = vld [vmem:[#allocation10 + $0x88] sm:$0xff] }
 0xdec   :  { %v1790_v1 = vpop.permute.xlu0 %1789 }
 0xded   :  { %2579 = vmatmul.msk.f32.vlgmr.msra.gmra.mxu2 %vm642_vm12, %v1790_v1 }
 0xe60   :  { %v3560_v10 = vpop.f32.mrf.mxu1 }
 0xe68   :  { %v1679_v35 = vpop.f32.mrf.mxu1 }
 0xe69   :  { %v1682_v37 = vmul.f32 0.125, %v1679_v35 }
 0xe6b   :  { %v1683_v5 = vadd.f32 %v1682_v37, %v3341_v57  ;;  %v2622_v37 = vld [vmem:[#allocation11 + $0x1] ss:$0 sm:$0xff] }
 0xe6d   :  { %v1684_v6 = vsel %vm672_vm13, %v1683_v5, -inf }
 0xe6e   :  { %1685 = vmax.xlane.f32.xlu1 %v1684_v6 }
 0xe70   :  { %v1814_v62 = vpop.f32.mrf.mxu2 }
 0xe71   :  { %v1817_v44 = vmul.f32 0.125, %v1814_v62 }
 0xe73   :  { %v1818_v39 = vadd.f32 %v1817_v44, %v3385_v54 }
 0xe75   :  { %v1819_v40 = vsel %vm672_vm13, %v1818_v39, -inf }
 0xe76   :  { %1756 = vmax.xlane.f32.xlu1 %v1755_v7  ;;  %1820 = vmax.xlane.f32.xlu2 %v1819_v40  ;;  %v2024_v40 = vld [vmem:[#allocation13 + $0x3e0] sm:$0xff] }
 0xe77   :  { %2039 = vmatpush.msra.mxu1 %v2024_v40  ;;  %v1970_v40 = vld [vmem:[#allocation13 + $0x230] sm:$0xff] }
 0xe8f   :  { %1831 = vrot.lane.b32.xlu1 %v1590_v53, %s3071_s29 }
 0xee1   :  { %v1686_v46 = vpop.xlane.xlu1 %1685 }
 0xee2   :  { %v1687_v57 = vsub.f32 %v1683_v5, %v1686_v46  ;;  %v2025_v46 = vld [vmem:[#allocation13 + $0x3e8] sm:$0xff] }
 0xee3   :  { %2062 = vmatpush.msrb.mxu2 %v2025_v46  ;;  %v1971_v46 = vld [vmem:[#allocation13 + $0x238] sm:$0xff] }
 0xee4   :  { %v1688_v48 = vmul.f32 1.442695, %v1687_v57  ;;  %v2026_v57 = vld [vmem:[#allocation13 + $0x3f0] sm:$0xff] }
 0xee6   :  { %2680 = vpow2.f32 %v1688_v48  ;;  %v2020_v48 = vld [vmem:[#allocation13 + $0x3c0] sm:$0xff] }
 0xee7   :  { %2040 = vmatpush.msra.mxu1 %v2020_v48  ;;  %v1966_v48 = vld [vmem:[#allocation13 + $0x210] sm:$0xff] }
 0xee9   :  { %v1821_v49 = vpop.xlane.xlu2 %1820  ;;  %v1757_v36 = vpop.xlane.xlu1 %1756 }
 0xeea   :  { %v1822_v50 = vsub.f32 %v1818_v39, %v1821_v49  ;;  %v1758_v52 = vsub.f32 %v1754_v14, %v1757_v36  ;;  %v2021_v49 = vld [vmem:[#allocation13 + $0x3c8] sm:$0xff]  ;;  %v2023_v36 = vld [vmem:[#allocation13 + $0x3d8] sm:$0xff] }
 0xeeb   :  { %2063 = vmatpush.msrb.mxu2 %v2021_v49  ;;  %v1967_v49 = vld [vmem:[#allocation13 + $0x218] sm:$0xff] }
 0xeec   :  { %v2681_v3 = vpop.eup %2680  ;;  %v1823_v47 = vmul.f32 1.442695, %v1822_v50  ;;  %v1759_v51 = vmul.f32 1.442695, %v1758_v52 }
 0xeed   :  { %v1690_v54 = vsel %vm672_vm13, %v2681_v3, 0.0 }
 0xeee   :  { %1691 = vadd.xlane.f32.xlu0 %v1690_v54  ;;  %2682 = vpow2.f32 %v1823_v47  ;;  %v2016_v54 = vld [vmem:[#allocation13 + $0x3a0] sm:$0xff] }
 0xeef   :  { %2684 = vpow2.f32 %v1759_v51  ;;  %v2017_v51 = vld [vmem:[#allocation13 + $0x3a8] sm:$0xff]  ;;  %2041 = vmatpush.msra.mxu1 %v2016_v54 }
 0xef0   :  { %2064 = vmatpush.msrb.mxu2 %v2017_v51 }
 0xef4   :  { %v2683_v43 = vpop.eup %2682 }
 0xef5   :  { %v1825_v45 = vsel %vm672_vm13, %v2683_v43, 0.0  ;;  %v2685_v25 = vpop.eup %2684 }
 0xef6   :  { %1826 = vadd.xlane.f32.xlu2 %v1825_v45  ;;  %v1761_v9 = vsel %vm672_vm13, %v2685_v25, 0.0  ;;  %v2019_v45 = vld [vmem:[#allocation13 + $0x3b8] sm:$0xff] }
 0xefe   :  { %1762 = vadd.xlane.f32.xlu2 %v1761_v9  ;;  %v2013_v9 = vld [vmem:[#allocation13 + $0x388] sm:$0xff] }
 0xeff   :  { %2065 = vmatpush.msrb.mxu2 %v2013_v9 }
 0xf01   :  { %v1832_v63 = vpop.permute.xlu1 %1831 }
 0xf02   :  { %1696 = vrot.lane.b32.xlu0 %v3537_v59, %s3071_s29  ;;  %v1878_v59 = vld [vmem:[#allocation10 + $0xf8] sm:$0xff] }
 0xf03   :  { %1884 = vmatpush.msrb.mxu0 %v1878_v59  ;;  %v2001_v59 = vld [vmem:[#allocation13 + $0x328] sm:$0xff] }
 0xf05   :  { %1885 = vmatpush.msrb.mxu0 %v1877_v42  ;;  %v2002_v42 = vld [vmem:[#allocation13 + $0x330] sm:$0xff] }
 0xf07   :  { %1886 = vmatpush.msrb.mxu0 %v1876_v15  ;;  %v2003_v15 = vld [vmem:[#allocation13 + $0x338] sm:$0xff] }
 0xf09   :  { %1887 = vmatpush.msrb.mxu0 %v1875_v16  ;;  %v1996_v16 = vld [vmem:[#allocation13 + $0x300] sm:$0xff] }
 0xf0b   :  { %1888 = vmatpush.msrb.mxu0 %v1874_v19  ;;  %v1997_v19 = vld [vmem:[#allocation13 + $0x308] sm:$0xff] }
 0xf0d   :  { %1889 = vmatpush.msrb.mxu0 %v1873_v21  ;;  %v1998_v21 = vld [vmem:[#allocation13 + $0x310] sm:$0xff] }
 0xf0f   :  { %1890 = vmatpush.msrb.mxu0 %v1872_v17  ;;  %v1999_v17 = vld [vmem:[#allocation13 + $0x318] sm:$0xff] }
 0xf11   :  { %1891 = vmatpush.msrb.mxu0 %v1871_v22  ;;  %v1992_v22 = vld [vmem:[#allocation13 + $0x2e0] sm:$0xff] }
 0xf13   :  { %1892 = vmatpush.msrb.mxu0 %v1870_v38  ;;  %v1993_v38 = vld [vmem:[#allocation13 + $0x2e8] sm:$0xff] }
 0xf15   :  { %1893 = vmatpush.msrb.mxu0 %v1869_v30  ;;  %v1994_v30 = vld [vmem:[#allocation13 + $0x2f0] sm:$0xff] }
 0xf17   :  { %1894 = vmatpush.msrb.mxu0 %v1868_v23  ;;  %v1995_v23 = vld [vmem:[#allocation13 + $0x2f8] sm:$0xff] }
 0xf19   :  { %1895 = vmatpush.msrb.mxu0 %v1867_v24  ;;  %v1988_v24 = vld [vmem:[#allocation13 + $0x2c0] sm:$0xff] }
 0xf1b   :  { %1896 = vmatpush.msrb.mxu0 %v1866_v26  ;;  %v1989_v26 = vld [vmem:[#allocation13 + $0x2c8] sm:$0xff] }
 0xf1d   :  { %1897 = vmatpush.msrb.mxu0 %v1865_v29  ;;  %v1991_v29 = vld [vmem:[#allocation13 + $0x2d8] sm:$0xff] }
 0xf1f   :  { %1898 = vmatpush.msrb.mxu0 %v1864_v31  ;;  %v1984_v31 = vld [vmem:[#allocation13 + $0x2a0] sm:$0xff] }
 0xf21   :  { %1899 = vmatpush.msrb.mxu0 %v1863_v32  ;;  %v1986_v32 = vld [vmem:[#allocation13 + $0x2b0] sm:$0xff] }
 0xf61   :  { %v1692_v55 = vpop.xlane.xlu0 %1691 }
 0xf62   :  { %2686 = vrcp.f32 %v1692_v55  ;;  %v2014_v55 = vld [vmem:[#allocation13 + $0x390] sm:$0xff] }
 0xf68   :  { %v2687_v41 = vpop.eup %2686 }
 0xf69   :  { %v1827_v58 = vpop.xlane.xlu2 %1826  ;;  %v1694_v60 = vmul.f32 %v2687_v41, %v2681_v3  ;;  %v2008_v41 = vld [vmem:[#allocation13 + $0x360] sm:$0xff] }
 0xf6a   :  { %2688 = vrcp.f32 %v1827_v58  ;;  %v2015_v58 = vld [vmem:[#allocation13 + $0x398] sm:$0xff] }
 0xf70   :  { %v2689_v0 = vpop.eup %2688 }
 0xf71   :  { %v1763_v8 = vpop.xlane.xlu2 %1762  ;;  %v1829_v12 = vmul.f32 %v2689_v0, %v2683_v43  ;;  %v2018_v43 = vld [vmem:[#allocation13 + $0x3b0] sm:$0xff]  ;;  %v2005_v0 = vld [vmem:[#allocation13 + $0x348] sm:$0xff] }
 0xf72   :  { %2690 = vrcp.f32 %v1763_v8  ;;  %v2009_v8 = vld [vmem:[#allocation13 + $0x368] sm:$0xff] }
 0xf73   :  { %2066 = vmatpush.msrb.mxu2 %v2009_v8 }
 0xf74   :  { %v1697_v61 = vpop.permute.xlu0 %1696 }
 0xf75   :  { %1717 = vmatpush.msrb.mxu3 %v1697_v61  ;;  %v2011_v61 = vld [vmem:[#allocation13 + $0x378] sm:$0xff]  ;;  %2067 = vmatpush.msrb.mxu2 %v2005_v0 }
 0xf76   :  { %2574 = vmatmul.msk.f32.vlgmr.msrb.gmra.mxu3 %vm672_vm13, %v1694_v60  ;;  %v2010_v60 = vld [vmem:[#allocation13 + $0x370] sm:$0xff] }
 0xf77   :  { %1852 = vmatpush.msra.mxu3 %v1832_v63  ;;  %v2004_v63 = vld [vmem:[#allocation13 + $0x340] sm:$0xff]  ;;  %2068 = vmatpush.msrb.mxu2 %v2001_v59 }
 0xf78   :  { %v2691_v56 = vpop.eup %2690 }
 0xf79   :  { %v1765_v2 = vmul.f32 %v2691_v56, %v2685_v25  ;;  %2085 = vmatpush.msrb.mxu3 %v2026_v57  ;;  %v2012_v25 = vld [vmem:[#allocation13 + $0x380] sm:$0xff]  ;;  %v2006_v56 = vld [vmem:[#allocation13 + $0x350] sm:$0xff]  ;;  %2069 = vmatpush.msrb.mxu2 %v1997_v19 }
 0xf7a   :  { %2042 = vmatpush.msra.mxu1 %v2012_v25  ;;  %v1964_v57 = vld [vmem:[#allocation13 + $0x200] sm:$0xff]  ;;  %v2623_v25 = vld [vmem:[%s3757_s11 + $0x1] ss:$0 sm:$0xff] }
 0xf7b   :  { %2577 = vmatmul.msk.f32.vlgmr.msrb.gmra.mxu1 %vm672_vm13, %v1765_v2  ;;  %v2007_v2 = vld [vmem:[#allocation13 + $0x358] sm:$0xff]  ;;  %2070 = vmatpush.msrb.mxu2 %v1993_v38 }
 0xf7c   :  { %2043 = vmatpush.msra.mxu1 %v2008_v41 }
 0xf7d   :  { %2071 = vmatpush.msrb.mxu2 %v1989_v26  ;;  %v2235_v26 = vld [vmem:[#allocation14 + $0x2f8] sm:$0xff] }
 0xf7e   :  { %2580 = vmatmul.msk.f32.vlgmr.msra.gmra.mxu3 %vm672_vm13, %v1829_v12  ;;  %2044 = vmatpush.msra.mxu1 %v2004_v63  ;;  %v2000_v12 = vld [vmem:[#allocation13 + $0x320] sm:$0xff]  ;;  %v2218_v63 = vld [vmem:[#allocation14 + $0x270] sm:$0xff] }
 0xf80   :  { %2045 = vmatpush.msra.mxu1 %v2000_v12 }
 0xf82   :  { %2046 = vmatpush.msra.mxu1 %v1996_v16 }
 0xf84   :  { %2047 = vmatpush.msra.mxu1 %v1992_v22 }
 0xf86   :  { %2048 = vmatpush.msra.mxu1 %v1988_v24  ;;  %v2216_v24 = vld [vmem:[#allocation14 + $0x260] sm:$0xff] }
 0xf88   :  { %2049 = vmatpush.msra.mxu1 %v1984_v31  ;;  %v2234_v31 = vld [vmem:[#allocation14 + $0x2f0] sm:$0xff] }
 0xff8   :  { %v1786_v53 = vpop.f32.mrf.mxu1 }
 0xff9   :  { %v1719_v28 = vpop.f32.mrf.mxu3 }
 0xffa   :  { %1723 = vrot.lane.b32.xlu2 %v1719_v28, %s3071_s29  ;;  %v1990_v28 = vld [vmem:[#allocation13 + $0x2d0] sm:$0xff] }
0x1001   :  { %v1854_v18 = vpop.f32.mrf.mxu3 }
0x1002   :  { %1858 = vrot.lane.b32.xlu0 %v1854_v18, %s3071_s29  ;;  %v1985_v18 = vld [vmem:[#allocation13 + $0x2a8] sm:$0xff] }
0x1003   :  { %2072 = vmatpush.msrb.mxu2 %v1985_v18  ;;  %v2250_v18 = vld [vmem:[#allocation14 + $0x370] sm:$0xff] }
0x1054   :  { %v1724_v33 = vpop.permute.xlu2 %1723 }
0x1055   :  { %v1726_v34 = vsel %vm642_vm12, %v3560_v10, %v1724_v33  ;;  %v1987_v33 = vld [vmem:[#allocation13 + $0x2b8] sm:$0xff] }
0x1056   :  { %1900 = vmatmul.f32.vlgmr.msrb.gmra.mxu0 %v1726_v34  ;;  %v1980_v34 = vld [vmem:[#allocation13 + $0x280] sm:$0xff] }
0x1057   :  { %2050 = vmatpush.msra.mxu1 %v1980_v34  ;;  %v2233_v34 = vld [vmem:[#allocation14 + $0x2e8] sm:$0xff] }
0x1074   :  { %v1859_v1 = vpop.permute.xlu0 %1858 }
0x1075   :  { %v1861_v35 = vsel %vm642_vm12, %v1786_v53, %v1859_v1  ;;  %v1981_v53 = vld [vmem:[#allocation13 + $0x288] sm:$0xff]  ;;  %v1982_v1 = vld [vmem:[#allocation13 + $0x290] sm:$0xff] }
0x1076   :  { %1903 = vmatmul.f32.gmra.mxu0 %v1861_v35  ;;  %2073 = vmatpush.msrb.mxu2 %v1981_v53  ;;  %v1983_v35 = vld [vmem:[#allocation13 + $0x298] sm:$0xff]  ;;  %v2249_v53 = vld [vmem:[#allocation14 + $0x368] sm:$0xff] }
0x10d3   :  { %v1901_v4 = vpop.f32.mrf.mxu0 }
0x10d4   :  { %v1902_v5 = vadd.f32 %v2622_v37, %v1901_v4  ;;  %v1977_v4 = vld [vmem:[#allocation13 + $0x268] sm:$0xff] }
0x10d5   :  { %2074 = vmatpush.msrb.mxu2 %v1977_v4  ;;  %v2248_v4 = vld [vmem:[#allocation14 + $0x360] sm:$0xff] }
0x10d6   :  { %v1907_v13 = vadd.f32 %v1902_v5, %v3523_v20  ;;  %v2027_v20 = vld [vmem:[#allocation13 + $0x3f8] sm:$0xff]  ;;  %v1978_v5 = vld [vmem:[#allocation13 + $0x270] sm:$0xff] }
0x10d7   :  { %2108 = vmatpush.msra.mxu0 %v2027_v20  ;;  %v1965_v20 = vld [vmem:[#allocation13 + $0x208] sm:$0xff] }
0x10d8   :  { %1913 = vadd.xlane.f32.xlu1 %v1907_v13 }
0x10d9   :  { %2109 = vmatpush.msra.mxu0 %v2023_v36 }
0x10db   :  { %2110 = vmatpush.msra.mxu0 %v2019_v45 }
0x10dd   :  { %2111 = vmatpush.msra.mxu0 %v2015_v58  ;;  %v2624_v58 = vld [vmem:[%s3758_s12 + $0x1] ss:$0 sm:$0xff] }
0x10df   :  { %2112 = vmatpush.msra.mxu0 %v2011_v61  ;;  %v2267_v61 = vld [vmem:[#allocation14 + $0x3f8] sm:$0xff] }
0x10e1   :  { %2113 = vmatpush.msra.mxu0 %v2007_v2  ;;  %v2265_v2 = vld [vmem:[#allocation14 + $0x3e8] sm:$0xff] }
0x10e3   :  { %2114 = vmatpush.msra.mxu0 %v2003_v15 }
0x10e5   :  { %2115 = vmatpush.msra.mxu0 %v1999_v17 }
0x10e7   :  { %2116 = vmatpush.msra.mxu0 %v1995_v23 }
0x10e9   :  { %2117 = vmatpush.msra.mxu0 %v1991_v29  ;;  %v2264_v29 = vld [vmem:[#allocation14 + $0x3e0] sm:$0xff] }
0x10eb   :  { %2118 = vmatpush.msra.mxu0 %v1987_v33  ;;  %v2214_v33 = vld [vmem:[#allocation14 + $0x250] sm:$0xff] }
0x10ed   :  { %2119 = vmatpush.msra.mxu0 %v1983_v35  ;;  %v2213_v35 = vld [vmem:[#allocation14 + $0x248] sm:$0xff] }
0x10f3   :  { %v1904_v6 = vpop.f32.mrf.mxu0 }
0x10f4   :  { %v1905_v62 = vadd.f32 %v2622_v37, %v1904_v6  ;;  %v1976_v37 = vld [vmem:[#allocation13 + $0x260] sm:$0xff] }
0x10f5   :  { %2051 = vmatpush.msra.mxu1 %v1976_v37  ;;  %v1972_v6 = vld [vmem:[#allocation13 + $0x240] sm:$0xff] }
0x10f6   :  { %v1908_v44 = vadd.f32 %v1905_v62, %v3543_v11  ;;  %v2022_v11 = vld [vmem:[#allocation13 + $0x3d0] sm:$0xff]  ;;  %v1973_v62 = vld [vmem:[#allocation13 + $0x248] sm:$0xff]  ;;  %v2232_v37 = vld [vmem:[#allocation14 + $0x2e0] sm:$0xff] }
0x10f7   :  { %2086 = vmatpush.msrb.mxu3 %v2022_v11  ;;  %2052 = vmatpush.msra.mxu1 %v1972_v6  ;;  %v2231_v6 = vld [vmem:[#allocation14 + $0x2d8] sm:$0xff] }
0x10f8   :  { %1915 = vadd.xlane.f32.xlu0 %v1908_v44  ;;  %2075 = vmatpush.msrb.mxu2 %v1973_v62  ;;  %v2247_v62 = vld [vmem:[#allocation14 + $0x358] sm:$0xff] }
0x10f9   :  { %2087 = vmatpush.msrb.mxu3 %v2018_v43 }
0x10fb   :  { %2088 = vmatpush.msrb.mxu3 %v2014_v55 }
0x10fd   :  { %2089 = vmatpush.msrb.mxu3 %v2010_v60  ;;  %v2219_v60 = vld [vmem:[#allocation14 + $0x278] sm:$0xff] }
0x10ff   :  { %2090 = vmatpush.msrb.mxu3 %v2006_v56  ;;  %v2217_v56 = vld [vmem:[#allocation14 + $0x268] sm:$0xff] }
0x1101   :  { %2091 = vmatpush.msrb.mxu3 %v2002_v42 }
0x1103   :  { %2092 = vmatpush.msrb.mxu3 %v1998_v21 }
0x1105   :  { %2093 = vmatpush.msrb.mxu3 %v1994_v30 }
0x1107   :  { %2094 = vmatpush.msrb.mxu3 %v1990_v28  ;;  %v2251_v28 = vld [vmem:[#allocation14 + $0x378] sm:$0xff] }
0x1109   :  { %2095 = vmatpush.msrb.mxu3 %v1986_v32  ;;  %v2263_v32 = vld [vmem:[#allocation14 + $0x3d8] sm:$0xff] }
0x110b   :  { %2096 = vmatpush.msrb.mxu3 %v1982_v1  ;;  %v2262_v1 = vld [vmem:[#allocation14 + $0x3d0] sm:$0xff] }
0x110d   :  { %2097 = vmatpush.msrb.mxu3 %v1978_v5  ;;  %v2261_v5 = vld [vmem:[#allocation14 + $0x3c8] sm:$0xff] }
0x114b   :  { %v1914_v14 = vpop.xlane.xlu1 %1913 }
0x114c   :  { %v1917_v10 = vmul.f32 %v1914_v14, %v3283_v27  ;;  %v1975_v14 = vld [vmem:[#allocation13 + $0x258] sm:$0xff] }
0x114e   :  { %v3585_v39 = vsub.f32 %v1907_v13, %v1917_v10  ;;  %v1979_v13 = vld [vmem:[#allocation13 + $0x278] sm:$0xff]  ;;  %v1968_v10 = vld [vmem:[#allocation13 + $0x220] sm:$0xff] }
0x114f   :  { %2120 = vmatpush.msra.mxu0 %v1979_v13  ;;  %2053 = vmatpush.msra.mxu1 %v1968_v10  ;;  %v2212_v13 = vld [vmem:[#allocation14 + $0x240] sm:$0xff]  ;;  %v2230_v10 = vld [vmem:[#allocation14 + $0x2d0] sm:$0xff] }
0x1150   :  { %v1921_v7 = vmul.f32 %v3585_v39, %v3585_v39 }
0x1151   :  { %2121 = vmatpush.msra.mxu0 %v1975_v14  ;;  %2054 = vmatpush.msra.mxu1 %v1964_v57  ;;  %v2211_v14 = vld [vmem:[#allocation14 + $0x238] sm:$0xff]  ;;  %v2229_v57 = vld [vmem:[#allocation14 + $0x2c8] sm:$0xff] }
0x1152   :  { %1923 = vadd.xlane.f32.xlu2 %v1921_v7  ;;  %v1969_v7 = vld [vmem:[#allocation13 + $0x228] sm:$0xff] }
0x1153   :  { %2076 = vmatpush.msrb.mxu2 %v1969_v7  ;;  %2122 = vmatpush.msra.mxu0 %v1971_v46  ;;  %v2246_v7 = vld [vmem:[#allocation14 + $0x350] sm:$0xff] }
0x1154   :  { %2273 = vmatpush.msrb.mxu1 %v2219_v60  ;;  %v2210_v46 = vld [vmem:[#allocation14 + $0x230] sm:$0xff] }
0x1155   :  { %2077 = vmatpush.msrb.mxu2 %v1965_v20  ;;  %2123 = vmatpush.msra.mxu0 %v1967_v49  ;;  %v2245_v20 = vld [vmem:[#allocation14 + $0x348] sm:$0xff]  ;;  %v2254_v60 = vld [vmem:[#allocation14 + $0x390] sm:$0xff] }
0x1156   :  { %2274 = vmatpush.msrb.mxu1 %v2218_v63  ;;  %v2209_v49 = vld [vmem:[#allocation14 + $0x228] sm:$0xff]  ;;  %v2224_v63 = vld [vmem:[#allocation14 + $0x2a0] sm:$0xff] }
0x1157   :  { %2342 = vmatpush.msrb.mxu0 %v2267_v61  ;;  %2296 = vmatpush.msra.mxu2 %v2235_v26  ;;  %v2205_v61 = vld [vmem:[#allocation14 + $0x208] sm:$0xff] }
0x1158   :  { %2275 = vmatpush.msrb.mxu1 %v2217_v56  ;;  %v2204_v56 = vld [vmem:[#allocation14 + $0x200] sm:$0xff] }
0x1159   :  { %2297 = vmatpush.msra.mxu2 %v2234_v31 }
0x115a   :  { %2276 = vmatpush.msrb.mxu1 %v2216_v24 }
0x115b   :  { %2298 = vmatpush.msra.mxu2 %v2233_v34 }
0x115d   :  { %2299 = vmatpush.msra.mxu2 %v2232_v37 }
0x115f   :  { %2300 = vmatpush.msra.mxu2 %v2231_v6 }
0x1161   :  { %2301 = vmatpush.msra.mxu2 %v2230_v10 }
0x1163   :  { %2302 = vmatpush.msra.mxu2 %v2229_v57 }
0x116b   :  { %v1916_v50 = vpop.xlane.xlu0 %1915 }
0x116c   :  { %v1918_v3 = vmul.f32 %v1916_v50, %v3283_v27 }
0x116e   :  { %v3590_v47 = vsub.f32 %v1908_v44, %v1918_v3  ;;  %v1974_v44 = vld [vmem:[#allocation13 + $0x250] sm:$0xff] }
0x116f   :  { %2098 = vmatpush.msrb.mxu3 %v1974_v44  ;;  %v2260_v44 = vld [vmem:[#allocation14 + $0x3c0] sm:$0xff] }
0x1170   :  { %v1922_v52 = vmul.f32 %v3590_v47, %v3590_v47 }
0x1171   :  { %2099 = vmatpush.msrb.mxu3 %v1970_v40  ;;  %v2259_v40 = vld [vmem:[#allocation14 + $0x3b8] sm:$0xff] }
0x1172   :  { %1925 = vadd.xlane.f32.xlu1 %v1922_v52 }
0x1173   :  { %2100 = vmatpush.msrb.mxu3 %v1966_v48  ;;  %v2258_v48 = vld [vmem:[#allocation14 + $0x3b0] sm:$0xff] }
0x1175   :  { %2319 = vmatpush.msra.mxu3 %v2251_v28 }
0x1177   :  { %2320 = vmatpush.msra.mxu3 %v2250_v18 }
0x1179   :  { %2321 = vmatpush.msra.mxu3 %v2249_v53 }
0x117b   :  { %2322 = vmatpush.msra.mxu3 %v2248_v4 }
0x117d   :  { %2323 = vmatpush.msra.mxu3 %v2247_v62 }
0x117f   :  { %2324 = vmatpush.msra.mxu3 %v2246_v7 }
0x1181   :  { %2325 = vmatpush.msra.mxu3 %v2245_v20 }
0x11c5   :  { %v1924_v11 = vpop.xlane.xlu2 %1923 }
0x11c6   :  { %v1927_v36 = vmul.f32 %v1924_v11, %v3283_v27  ;;  %v2228_v11 = vld [vmem:[#allocation14 + $0x2c0] sm:$0xff] }
0x11c7   :  { %2303 = vmatpush.msra.mxu2 %v2228_v11 }
0x11c8   :  { %v1929_v50 = vadd.f32 1e-12, %v1927_v36  ;;  %v2244_v36 = vld [vmem:[#allocation14 + $0x340] sm:$0xff] }
0x11c9   :  { %2326 = vmatpush.msra.mxu3 %v2244_v36 }
0x11ca   :  { %2692 = vrsqrt.f32 %v1929_v50  ;;  %vm1937_vm13 = vweird.f32 %v1929_v50 }
0x11d0   :  { %v2693_v3 = vpop.eup %2692 }
0x11d1   :  { %v1932_v52 = vmul.f32 %v2693_v3, %v1929_v50  ;;  %vm1938_vm12 = vweird.f32 %v2693_v3  ;;  %v2257_v50 = vld [vmem:[#allocation14 + $0x3a8] sm:$0xff] }
0x11d2   :  { %vm1939_vm15 = vmor %vm1937_vm13, %vm1938_vm12 }
0x11d3   :  { %v1933_v54 = vmul.f32 %v2693_v3, %v1932_v52  ;;  %v2227_v52 = vld [vmem:[#allocation14 + $0x2b8] sm:$0xff] }
0x11d4   :  { %2304 = vmatpush.msra.mxu2 %v2227_v52 }
0x11d5   :  { %v1934_v51 = vmul.f32 0.5, %v1933_v54  ;;  %v2243_v54 = vld [vmem:[#allocation14 + $0x338] sm:$0xff] }
0x11d6   :  { %2327 = vmatpush.msra.mxu3 %v2243_v54 }
0x11d7   :  { %v1935_v43 = vsub.f32 1.5, %v1934_v51  ;;  %v2256_v51 = vld [vmem:[#allocation14 + $0x3a0] sm:$0xff] }
0x11d9   :  { %v1936_v45 = vmul.f32 %v2693_v3, %v1935_v43  ;;  %v2207_v43 = vld [vmem:[#allocation14 + $0x218] sm:$0xff] }
0x11db   :  { %v1940_v9 = vsel %vm1939_vm15, %v2693_v3, %v1936_v45  ;;  %v2208_v3 = vld [vmem:[#allocation14 + $0x220] sm:$0xff]  ;;  %v2226_v45 = vld [vmem:[#allocation14 + $0x2b0] sm:$0xff] }
0x11dc   :  { %v1951_v55 = vmul.f32 %v1940_v9, %v3585_v39  ;;  %v2266_v39 = vld [vmem:[#allocation14 + $0x3f0] sm:$0xff]  ;;  %2305 = vmatpush.msra.mxu2 %v2226_v45  ;;  %v2255_v9 = vld [vmem:[#allocation14 + $0x398] sm:$0xff] }
0x11dd   :  { %2343 = vmatpush.msrb.mxu0 %v2266_v39  ;;  %v2240_v39 = vld [vmem:[#allocation14 + $0x320] sm:$0xff] }
0x11de   :  { %v1956_v41 = vmul.f32 %v2623_v25, %v1951_v55  ;;  %v2206_v55 = vld [vmem:[#allocation14 + $0x210] sm:$0xff] }
0x11df   :  { %2344 = vmatpush.msrb.mxu0 %v2265_v2  ;;  %v2223_v2 = vld [vmem:[#allocation14 + $0x298] sm:$0xff] }
0x11e0   :  { %v3602_v8 = vadd.f32 %v2624_v58, %v1956_v41  ;;  %v2241_v41 = vld [vmem:[#allocation14 + $0x328] sm:$0xff] }
0x11e1   :  { %2345 = vmatpush.msrb.mxu0 %v2264_v29 }
0x11e2   :  { %2055 = vmatmul.f32.vlgmr.msra.gmra.mxu1 %v3602_v8  ;;  %2078 = vmatmul.f32.vlgmr.msrb.gmra.mxu2 %v3602_v8 }
0x11e3   :  { %2101 = vmatmul.f32.vlgmr.msrb.gmra.mxu3 %v3602_v8  ;;  %2124 = vmatmul.f32.vlgmr.msra.gmra.mxu0 %v3602_v8 }
0x11e4   :  { %2346 = vmatpush.msrb.mxu0 %v2263_v32 }
0x11e5   :  { %v1926_v0 = vpop.xlane.xlu1 %1925 }
0x11e6   :  { %v1928_v12 = vmul.f32 %v1926_v0, %v3283_v27  ;;  %2347 = vmatpush.msrb.mxu0 %v2262_v1  ;;  %v2253_v0 = vld [vmem:[#allocation14 + $0x388] sm:$0xff] }
0x11e8   :  { %v1930_v59 = vadd.f32 1e-12, %v1928_v12  ;;  %2348 = vmatpush.msrb.mxu0 %v2261_v5  ;;  %v2239_v12 = vld [vmem:[#allocation14 + $0x318] sm:$0xff] }
0x11ea   :  { %2694 = vrsqrt.f32 %v1930_v59  ;;  %vm1947_vm1 = vweird.f32 %v1930_v59  ;;  %2349 = vmatpush.msrb.mxu0 %v2260_v44 }
0x11ec   :  { %2350 = vmatpush.msrb.mxu0 %v2259_v40 }
0x11ee   :  { %2351 = vmatpush.msrb.mxu0 %v2258_v48 }
0x11f0   :  { %v2695_v42 = vpop.eup %2694  ;;  %2352 = vmatpush.msrb.mxu0 %v2257_v50 }
0x11f1   :  { %v1942_v15 = vmul.f32 %v2695_v42, %v1930_v59  ;;  %vm1948_vm0 = vweird.f32 %v2695_v42  ;;  %v2252_v59 = vld [vmem:[#allocation14 + $0x380] sm:$0xff] }
0x11f2   :  { %vm1949_vm2 = vmor %vm1947_vm1, %vm1948_vm0  ;;  %2353 = vmatpush.msrb.mxu0 %v2256_v51 }
0x11f3   :  { %v1943_v16 = vmul.f32 %v2695_v42, %v1942_v15  ;;  %v2222_v15 = vld [vmem:[#allocation14 + $0x290] sm:$0xff] }
0x11f4   :  { %2354 = vmatpush.msrb.mxu0 %v2255_v9 }
0x11f5   :  { %v1944_v19 = vmul.f32 0.5, %v1943_v16  ;;  %v2238_v16 = vld [vmem:[#allocation14 + $0x310] sm:$0xff] }
0x11f6   :  { %2355 = vmatpush.msrb.mxu0 %v2254_v60 }
0x11f7   :  { %v1945_v21 = vsub.f32 1.5, %v1944_v19  ;;  %v2221_v19 = vld [vmem:[#allocation14 + $0x288] sm:$0xff] }
0x11f8   :  { %2356 = vmatpush.msrb.mxu0 %v2253_v0 }
0x11f9   :  { %v1946_v17 = vmul.f32 %v2695_v42, %v1945_v21  ;;  %v2237_v21 = vld [vmem:[#allocation14 + $0x308] sm:$0xff] }
0x11fa   :  { %2357 = vmatpush.msrb.mxu0 %v2252_v59 }
0x11fb   :  { %v1950_v22 = vsel %vm1949_vm2, %v2695_v42, %v1946_v17  ;;  %v3619_v42 = vld [vmem:[%s3760_s14 + $0x4] sm:$0xf] }
0x11fc   :  { %v1952_v38 = vmul.f32 %v1950_v22, %v3590_v47  ;;  %v2215_v47 = vld [vmem:[#allocation14 + $0x258] sm:$0xff]  ;;  %v2031_v17 = vperm.slane %v3619_v42, 0  ;;  %v2220_v22 = vld [vmem:[#allocation14 + $0x280] sm:$0xff]  ;;  %v2032_v31 = vperm.slane %v3619_v42, 1  ;;  %v2033_v32 = vperm.slane %v3619_v42, 2 }
0x11fd   :  { %2277 = vmatpush.msrb.mxu1 %v2215_v47 }
0x11fe   :  { %v1957_v30 = vmul.f32 %v2623_v25, %v1952_v38  ;;  %v2242_v25 = vld [vmem:[#allocation14 + $0x330] sm:$0xff]  ;;  %v2034_v38 = vperm.slane %v3619_v42, 3 }
0x11ff   :  { %2278 = vmatpush.msrb.mxu1 %v2214_v33  ;;  %2328 = vmatpush.msra.mxu3 %v2242_v25 }
0x1200   :  { %v3610_v23 = vadd.f32 %v2624_v58, %v1957_v30  ;;  %v2225_v58 = vld [vmem:[#allocation14 + $0x2a8] sm:$0xff]  ;;  %v2236_v30 = vld [vmem:[#allocation14 + $0x300] sm:$0xff] }
0x1201   :  { %2279 = vmatpush.msrb.mxu1 %v2213_v35  ;;  %2306 = vmatpush.msra.mxu2 %v2225_v58 }
0x1202   :  { %2058 = vmatmul.f32.gmra.mxu1 %v3610_v23  ;;  %2081 = vmatmul.f32.gmra.mxu2 %v3610_v23 }
0x1203   :  { %2104 = vmatmul.f32.gmra.mxu3 %v3610_v23  ;;  %2127 = vmatmul.f32.gmra.mxu0 %v3610_v23 }
0x1204   :  { %2280 = vmatpush.msrb.mxu1 %v2212_v13  ;;  %2329 = vmatpush.msra.mxu3 %v2241_v41 }
0x1205   :  { %2307 = vmatpush.msra.mxu2 %v2224_v63 }
0x1206   :  { %2281 = vmatpush.msrb.mxu1 %v2211_v14  ;;  %2330 = vmatpush.msra.mxu3 %v2240_v39 }
0x1207   :  { %2308 = vmatpush.msra.mxu2 %v2223_v2 }
0x1208   :  { %2282 = vmatpush.msrb.mxu1 %v2210_v46  ;;  %2331 = vmatpush.msra.mxu3 %v2239_v12 }
0x1209   :  { %2309 = vmatpush.msra.mxu2 %v2222_v15 }
0x120a   :  { %2283 = vmatpush.msrb.mxu1 %v2209_v49  ;;  %2332 = vmatpush.msra.mxu3 %v2238_v16 }
0x120b   :  { %2310 = vmatpush.msra.mxu2 %v2221_v19 }
0x120c   :  { %2284 = vmatpush.msrb.mxu1 %v2208_v3  ;;  %2333 = vmatpush.msra.mxu3 %v2237_v21 }
0x120d   :  { %2311 = vmatpush.msra.mxu2 %v2220_v22 }
0x120e   :  { %2285 = vmatpush.msrb.mxu1 %v2207_v43  ;;  %2334 = vmatpush.msra.mxu3 %v2236_v30 }
0x1210   :  { %2286 = vmatpush.msrb.mxu1 %v2206_v55 }
0x1212   :  { %2287 = vmatpush.msrb.mxu1 %v2205_v61 }
0x1214   :  { %2288 = vmatpush.msrb.mxu1 %v2204_v56 }
0x125f   :  { %v2056_v24 = vpop.f32.mrf.mxu1 }
0x1260   :  { %v2057_v26 = vadd.f32 %v2056_v24, %v2031_v17  ;;  %v2125_v28 = vpop.f32.mrf.mxu0 }
0x1261   :  { %v2126_v29 = vadd.f32 %v2125_v28, %v2034_v38 }
0x1262   :  { %v2131_v47 = vmul.f32 %v2057_v26, %v2057_v26 }
0x1263   :  { %v2134_v18 = vmul.f32 %v2126_v29, %v2126_v29 }
0x1264   :  { %v2139_v33 = vmul.f32 %v2131_v47, %v2057_v26 }
0x1265   :  { %v2142_v34 = vmul.f32 %v2134_v18, %v2126_v29  ;;  %v2079_v53 = vpop.f32.mrf.mxu2 }
0x1266   :  { %v2147_v1 = vmul.f32 0.044715, %v2139_v33  ;;  %v2080_v35 = vadd.f32 %v2079_v53, %v2032_v31  ;;  %v2102_v37 = vpop.f32.mrf.mxu3 }
0x1267   :  { %v2150_v4 = vmul.f32 0.044715, %v2142_v34  ;;  %v2103_v5 = vadd.f32 %v2102_v37, %v2033_v32 }
0x1268   :  { %v2155_v13 = vadd.f32 %v2147_v1, %v2057_v26  ;;  %v2132_v6 = vmul.f32 %v2080_v35, %v2080_v35 }
0x1269   :  { %v2158_v62 = vadd.f32 %v2150_v4, %v2126_v29  ;;  %v2133_v44 = vmul.f32 %v2103_v5, %v2103_v5 }
0x126a   :  { %v2163_v14 = vmul.f32 0.7978846, %v2155_v13  ;;  %v2140_v10 = vmul.f32 %v2132_v6, %v2080_v35 }
0x126b   :  { %v2166_v7 = vmul.f32 0.7978846, %v2158_v62  ;;  %v2141_v40 = vmul.f32 %v2133_v44, %v2103_v5 }
0x126c   :  { %2696 = vtanh.f32 %v2163_v14  ;;  %v2148_v46 = vmul.f32 0.044715, %v2140_v10 }
0x126d   :  { %2698 = vtanh.f32 %v2166_v7  ;;  %v2149_v57 = vmul.f32 0.044715, %v2141_v40 }
0x126e   :  { %v2156_v20 = vadd.f32 %v2148_v46, %v2080_v35 }
0x126f   :  { %v2157_v48 = vadd.f32 %v2149_v57, %v2103_v5 }
0x1270   :  { %v2164_v49 = vmul.f32 0.7978846, %v2156_v20 }
0x1271   :  { %v2165_v11 = vmul.f32 0.7978846, %v2157_v48 }
0x1272   :  { %v2697_v36 = vpop.eup %2696  ;;  %2700 = vtanh.f32 %v2164_v49 }
0x1273   :  { %v2699_v50 = vpop.eup %2698  ;;  %2702 = vtanh.f32 %v2165_v11  ;;  %v2179_v3 = vadd.f32 1.0, %v2697_v36  ;;  %v2625_v11 = vld [vmem:[#allocation16 + $0x1] ss:$0 sm:$0xff] }
0x1274   :  { %v2182_v52 = vadd.f32 1.0, %v2699_v50 }
0x1275   :  { %v2187_v54 = vmul.f32 0.5, %v2179_v3 }
0x1276   :  { %v2190_v51 = vmul.f32 0.5, %v2182_v52 }
0x1277   :  { %v2195_v43 = vmul.f32 %v2187_v54, %v2057_v26 }
0x1278   :  { %v2701_v45 = vpop.eup %2700  ;;  %v2198_v25 = vmul.f32 %v2190_v51, %v2126_v29 }
0x1279   :  { %v2703_v9 = vpop.eup %2702  ;;  %2289 = vmatmul.f32.vlgmr.msrb.gmra.mxu1 %v2195_v43  ;;  %v2180_v55 = vadd.f32 1.0, %v2701_v45 }
0x127a   :  { %2358 = vmatmul.f32.vlgmr.msrb.gmra.mxu0 %v2198_v25  ;;  %v2181_v58 = vadd.f32 1.0, %v2703_v9 }
0x127b   :  { %v2188_v41 = vmul.f32 0.5, %v2180_v55 }
0x127c   :  { %v2189_v60 = vmul.f32 0.5, %v2181_v58 }
0x127d   :  { %v2196_v61 = vmul.f32 %v2188_v41, %v2080_v35 }
0x127e   :  { %v2197_v63 = vmul.f32 %v2189_v60, %v2103_v5 }
0x127f   :  { %v2059_v39 = vpop.f32.mrf.mxu1  ;;  %2312 = vmatmul.f32.vlgmr.msra.gmra.mxu2 %v2196_v61 }
0x1280   :  { %v2060_v0 = vadd.f32 %v2059_v39, %v2031_v17  ;;  %v2128_v56 = vpop.f32.mrf.mxu0  ;;  %2335 = vmatmul.f32.vlgmr.msra.gmra.mxu3 %v2197_v63 }
0x1281   :  { %v2129_v2 = vadd.f32 %v2128_v56, %v2034_v38 }
0x1282   :  { %v2135_v12 = vmul.f32 %v2060_v0, %v2060_v0 }
0x1283   :  { %v2138_v59 = vmul.f32 %v2129_v2, %v2129_v2 }
0x1284   :  { %v2143_v15 = vmul.f32 %v2135_v12, %v2060_v0 }
0x1285   :  { %v2146_v16 = vmul.f32 %v2138_v59, %v2129_v2  ;;  %v2082_v19 = vpop.f32.mrf.mxu2 }
0x1286   :  { %v2083_v21 = vadd.f32 %v2082_v19, %v2032_v31  ;;  %v2105_v22 = vpop.f32.mrf.mxu3  ;;  %v2151_v30 = vmul.f32 0.044715, %v2143_v15 }
0x1287   :  { %v2106_v24 = vadd.f32 %v2105_v22, %v2033_v32  ;;  %v2154_v26 = vmul.f32 0.044715, %v2146_v16 }
0x1288   :  { %v2136_v28 = vmul.f32 %v2083_v21, %v2083_v21  ;;  %v2159_v29 = vadd.f32 %v2151_v30, %v2060_v0  ;;  %v2450_v30 = vld [vmem:[%s3765_s19 + $0x78] sm:$0xff] }
0x1289   :  { %v2137_v47 = vmul.f32 %v2106_v24, %v2106_v24  ;;  %v2162_v18 = vadd.f32 %v2154_v26, %v2129_v2  ;;  %2455 = vmatpush.msra.mxu1 %v2450_v30  ;;  %v2449_v26 = vld [vmem:[%s3765_s19 + $0x70] sm:$0xff] }
0x128a   :  { %v2144_v17 = vmul.f32 %v2136_v28, %v2083_v21  ;;  %v2167_v33 = vmul.f32 0.7978846, %v2159_v29  ;;  %v2448_v28 = vld [vmem:[%s3765_s19 + $0x68] sm:$0xff] }
0x128b   :  { %v2145_v34 = vmul.f32 %v2137_v47, %v2106_v24  ;;  %v2170_v53 = vmul.f32 0.7978846, %v2162_v18  ;;  %2456 = vmatpush.msra.mxu1 %v2449_v26  ;;  %v2447_v47 = vld [vmem:[%s3765_s19 + $0x60] sm:$0xff]  ;;  %v2446_v18 = vld [vmem:[%s3765_s19 + $0x58] sm:$0xff] }
0x128c   :  { %2704 = vtanh.f32 %v2167_v33  ;;  %v2152_v42 = vmul.f32 0.044715, %v2144_v17  ;;  %v2445_v33 = vld [vmem:[%s3765_s19 + $0x50] sm:$0xff]  ;;  %v2479_v26 = vld [vmem:[%s3767_s21 + $0x18] sm:$0xff] }
0x128d   :  { %2706 = vtanh.f32 %v2170_v53  ;;  %v2153_v38 = vmul.f32 0.044715, %v2145_v34  ;;  %2457 = vmatpush.msra.mxu1 %v2448_v28  ;;  %v2444_v34 = vld [vmem:[%s3765_s19 + $0x48] sm:$0xff]  ;;  %v2478_v28 = vld [vmem:[%s3767_s21 + $0x10] sm:$0xff] }
0x128e   :  { %v2160_v1 = vadd.f32 %v2152_v42, %v2083_v21  ;;  %v2443_v42 = vld [vmem:[%s3765_s19 + $0x40] sm:$0xff] }
0x128f   :  { %v2161_v35 = vadd.f32 %v2153_v38, %v2106_v24  ;;  %2458 = vmatpush.msra.mxu1 %v2447_v47  ;;  %v2442_v38 = vld [vmem:[%s3765_s19 + $0x38] sm:$0xff]  ;;  %v2476_v47 = vld [vmem:[%s3767_s21] sm:$0xff] }
0x1290   :  { %v2168_v37 = vmul.f32 0.7978846, %v2160_v1  ;;  %v2441_v1 = vld [vmem:[%s3765_s19 + $0x30] sm:$0xff] }
0x1291   :  { %v2169_v31 = vmul.f32 0.7978846, %v2161_v35  ;;  %2459 = vmatpush.msra.mxu1 %v2446_v18  ;;  %v2628_v18 = vld [vmem:[#allocation19] ss:$0 sm:$0xff] }
0x1292   :  { %v2705_v4 = vpop.eup %2704  ;;  %2708 = vtanh.f32 %v2168_v37  ;;  %v2440_v37 = vld [vmem:[%s3765_s19 + $0x28] sm:$0xff] }
0x1293   :  { %v2707_v32 = vpop.eup %2706  ;;  %v2183_v5 = vadd.f32 1.0, %v2705_v4  ;;  %2710 = vtanh.f32 %v2169_v31  ;;  %2460 = vmatpush.msra.mxu1 %v2445_v33  ;;  %v2439_v31 = vld [vmem:[%s3765_s19 + $0x20] sm:$0xff] }
0x1294   :  { %v2186_v13 = vadd.f32 1.0, %v2707_v32 }
0x1295   :  { %v2191_v6 = vmul.f32 0.5, %v2183_v5  ;;  %2461 = vmatpush.msra.mxu1 %v2444_v34 }
0x1296   :  { %v2194_v62 = vmul.f32 0.5, %v2186_v13  ;;  %v2438_v13 = vld [vmem:[%s3765_s19 + $0x18] sm:$0xff] }
0x1297   :  { %v2199_v44 = vmul.f32 %v2191_v6, %v2060_v0  ;;  %2462 = vmatpush.msra.mxu1 %v2443_v42 }
0x1298   :  { %v2709_v14 = vpop.eup %2708  ;;  %v2202_v10 = vmul.f32 %v2194_v62, %v2129_v2  ;;  %v2437_v62 = vld [vmem:[%s3765_s19 + $0x10] sm:$0xff] }
0x1299   :  { %v2711_v7 = vpop.eup %2710  ;;  %2292 = vmatmul.f32.gmra.mxu1 %v2199_v44  ;;  %v2184_v40 = vadd.f32 1.0, %v2709_v14  ;;  %v2436_v14 = vld [vmem:[%s3765_s19 + $0x8] sm:$0xff] }
0x129a   :  { %2361 = vmatmul.f32.gmra.mxu0 %v2202_v10  ;;  %v2185_v46 = vadd.f32 1.0, %v2711_v7  ;;  %2463 = vmatpush.msra.mxu1 %v2442_v38  ;;  %v2435_v7 = vld [vmem:[%s3765_s19] sm:$0xff]  ;;  %s3788_s19 = sld [smem:[#allocation39_spill]] }
0x129b   :  { %v2192_v57 = vmul.f32 0.5, %v2184_v40  ;;  %v2491_v40 = vld [vmem:[%s3767_s21 + $0x78] sm:$0xff] }
0x129c   :  { %v2193_v20 = vmul.f32 0.5, %v2185_v46  ;;  %2464 = vmatpush.msra.mxu1 %v2441_v1  ;;  %v2490_v46 = vld [vmem:[%s3767_s21 + $0x70] sm:$0xff]  ;;  %2496 = vmatpush.msrb.mxu2 %v2491_v40 }
0x129d   :  { %v2200_v48 = vmul.f32 %v2192_v57, %v2083_v21 }
0x129e   :  { %v2201_v49 = vmul.f32 %v2193_v20, %v2106_v24  ;;  %2465 = vmatpush.msra.mxu1 %v2440_v37  ;;  %v2627_v20 = vld [vmem:[#allocation17 + $0x1] ss:$0 sm:$0xff]  ;;  %2497 = vmatpush.msrb.mxu2 %v2490_v46 }
0x129f   :  { %2315 = vmatmul.f32.gmra.mxu2 %v2200_v48 }
0x12a0   :  { %2338 = vmatmul.f32.gmra.mxu3 %v2201_v49  ;;  %2466 = vmatpush.msra.mxu1 %v2439_v31  ;;  %s2525_s13 = sshll.u32 %s3788_s19, 4  ;;  %s2526_s13 = int_to_ptr.hbm [resolvable:$true] %s2525_s13 }
0x12a2   :  { %2467 = vmatpush.msra.mxu1 %v2438_v13 }
0x12a4   :  { %2468 = vmatpush.msra.mxu1 %v2437_v62 }
0x12a6   :  { %2469 = vmatpush.msra.mxu1 %v2436_v14 }
0x12a8   :  { %2470 = vmatpush.msra.mxu1 %v2435_v7 }
0x12f6   :  { %v2290_v36 = vpop.f32.mrf.mxu1 }
0x12f7   :  { %v2291_v50 = vadd.f32 %v2625_v11, %v2290_v36  ;;  %v2359_v43 = vpop.f32.mrf.mxu0 }
0x1302   :  { %v2313_v3 = vpop.f32.mrf.mxu2 }
0x1303   :  { %v2314_v52 = vadd.f32 %v2313_v3, %v2291_v50  ;;  %v2336_v54 = vpop.f32.mrf.mxu3  ;;  %v2488_v50 = vld [vmem:[%s3767_s21 + $0x60] sm:$0xff] }
0x1305   :  { %v2337_v51 = vadd.f32 %v2336_v54, %v2314_v52  ;;  %v2487_v54 = vld [vmem:[%s3767_s21 + $0x58] sm:$0xff] }
0x1307   :  { %v2360_v45 = vadd.f32 %v2359_v43, %v2337_v51  ;;  %v2486_v43 = vld [vmem:[%s3767_s21 + $0x50] sm:$0xff] }
0x1309   :  { %v2365_v25 = vadd.f32 %v2360_v45, %v3602_v8 }
0x130b   :  { %2371 = vadd.xlane.f32.xlu0 %v2365_v25 }
0x1316   :  { %v2293_v9 = vpop.f32.mrf.mxu1 }
0x1317   :  { %v2294_v55 = vadd.f32 %v2625_v11, %v2293_v9  ;;  %v2362_v63 = vpop.f32.mrf.mxu0  ;;  %v2489_v11 = vld [vmem:[%s3767_s21 + $0x68] sm:$0xff] }
0x1318   :  { %2498 = vmatpush.msrb.mxu2 %v2489_v11  ;;  %v2485_v9 = vld [vmem:[%s3767_s21 + $0x48] sm:$0xff] }
0x131a   :  { %2499 = vmatpush.msrb.mxu2 %v2488_v50 }
0x131c   :  { %2500 = vmatpush.msrb.mxu2 %v2487_v54 }
0x131e   :  { %2501 = vmatpush.msrb.mxu2 %v2486_v43 }
0x1320   :  { %2502 = vmatpush.msrb.mxu2 %v2485_v9 }
0x1322   :  { %v2316_v58 = vpop.f32.mrf.mxu2 }
0x1323   :  { %v2317_v41 = vadd.f32 %v2316_v58, %v2294_v55  ;;  %v2339_v60 = vpop.f32.mrf.mxu3  ;;  %v2484_v58 = vld [vmem:[%s3767_s21 + $0x40] sm:$0xff] }
0x1324   :  { %2503 = vmatpush.msrb.mxu2 %v2484_v58 }
0x1325   :  { %v2340_v61 = vadd.f32 %v2339_v60, %v2317_v41 }
0x1327   :  { %v2363_v39 = vadd.f32 %v2362_v63, %v2340_v61  ;;  %v2483_v61 = vld [vmem:[%s3767_s21 + $0x38] sm:$0xff] }
0x1328   :  { %2504 = vmatpush.msrb.mxu2 %v2483_v61 }
0x1329   :  { %v2366_v0 = vadd.f32 %v2363_v39, %v3610_v23  ;;  %v2482_v39 = vld [vmem:[%s3767_s21 + $0x30] sm:$0xff] }
0x132a   :  { %2505 = vmatpush.msrb.mxu2 %v2482_v39 }
0x132b   :  { %2373 = vadd.xlane.f32.xlu2 %v2366_v0 }
0x137e   :  { %v2372_v56 = vpop.xlane.xlu0 %2371 }
0x137f   :  { %v2375_v2 = vmul.f32 %v2372_v56, %v3283_v27 }
0x1381   :  { %v2377_v12 = vsub.f32 %v2365_v25, %v2375_v2  ;;  %v2481_v2 = vld [vmem:[%s3767_s21 + $0x28] sm:$0xff] }
0x1382   :  { %2506 = vmatpush.msrb.mxu2 %v2481_v2 }
0x1383   :  { %v2379_v59 = vmul.f32 %v2377_v12, %v2377_v12 }
0x1385   :  { %2381 = vadd.xlane.f32.xlu1 %v2379_v59 }
0x139e   :  { %v2374_v15 = vpop.xlane.xlu2 %2373 }
0x139f   :  { %v2376_v8 = vmul.f32 %v2374_v15, %v3283_v27 }
0x13a1   :  { %v3637_v16 = vsub.f32 %v2366_v0, %v2376_v8 }
0x13a3   :  { %v2380_v19 = vmul.f32 %v3637_v16, %v3637_v16 }
0x13a5   :  { %2383 = vadd.xlane.f32.xlu0 %v2380_v19 }
0x13f8   :  { %v2382_v21 = vpop.xlane.xlu1 %2381 }
0x13f9   :  { %v2385_v22 = vmul.f32 %v2382_v21, %v3283_v27 }
0x13fb   :  { %v2387_v23 = vadd.f32 1e-12, %v2385_v22 }
0x13fd   :  { %2712 = vrsqrt.f32 %v2387_v23  ;;  %vm2395_vm4 = vweird.f32 %v2387_v23 }
0x1403   :  { %v2713_v24 = vpop.eup %2712 }
0x1404   :  { %v2390_v29 = vmul.f32 %v2713_v24, %v2387_v23  ;;  %vm2396_vm3 = vweird.f32 %v2713_v24 }
0x1405   :  { %vm2397_vm5 = vmor %vm2395_vm4, %vm2396_vm3 }
0x1406   :  { %v2391_v17 = vmul.f32 %v2713_v24, %v2390_v29  ;;  %v2477_v29 = vld [vmem:[%s3767_s21 + $0x8] sm:$0xff] }
0x1408   :  { %v2392_v53 = vmul.f32 0.5, %v2391_v17 }
0x140a   :  { %v2393_v35 = vsub.f32 1.5, %v2392_v53  ;;  %v2629_v53 = vld [vmem:[#allocation20] ss:$0 sm:$0xff] }
0x140c   :  { %v2394_v4 = vmul.f32 %v2713_v24, %v2393_v35 }
0x140e   :  { %v2398_v44 = vsel %vm2397_vm5, %v2713_v24, %v2394_v4  ;;  %v2480_v24 = vld [vmem:[%s3767_s21 + $0x20] sm:$0xff] }
0x140f   :  { %v2409_v10 = vmul.f32 %v2398_v44, %v2377_v12  ;;  %2507 = vmatpush.msrb.mxu2 %v2480_v24 }
0x1411   :  { %2508 = vmatpush.msrb.mxu2 %v2479_v26 }
0x1413   :  { %2509 = vmatpush.msrb.mxu2 %v2478_v28 }
0x1415   :  { %2510 = vmatpush.msrb.mxu2 %v2477_v29 }
0x1417   :  { %2511 = vmatpush.msrb.mxu2 %v2476_v47 }
0x1418   :  { %v2384_v32 = vpop.xlane.xlu0 %2383 }
0x1419   :  { %v2386_v5 = vmul.f32 %v2384_v32, %v3283_v27  ;;  %v2626_v27 = vld [vmem:[%s3763_s17 + $0x1] ss:$0 sm:$0xff] }
0x141a   :  { %v2414_v48 = vmul.f32 %v2626_v27, %v2409_v10 }
0x141b   :  { %v2388_v6 = vadd.f32 1e-12, %v2386_v5 }
0x141c   :  { %v2419_v3 = vadd.f32 %v2627_v20, %v2414_v48 }
0x141d   :  { %2714 = vrsqrt.f32 %v2388_v6  ;;  %vm2405_vm7 = vweird.f32 %v2388_v6 }
0x141e   :  { %v2421_v45 = vrot.slane %v2419_v3, 4 }
0x1420   :  { %v2422_v60 = vadd.f32 %v2421_v45, %v2419_v3 }
0x1422   :  { %v2423_v56 = vrot.slane %v2422_v60, 2 }
0x1423   :  { %v2715_v57 = vpop.eup %2714 }
0x1424   :  { %v2400_v49 = vmul.f32 %v2715_v57, %v2388_v6  ;;  %vm2406_vm6 = vweird.f32 %v2715_v57  ;;  %v2424_v59 = vadd.f32 %v2423_v56, %v2422_v60 }
0x1425   :  { %vm2407_vm8 = vmor %vm2405_vm7, %vm2406_vm6 }
0x1426   :  { %v2401_v36 = vmul.f32 %v2715_v57, %v2400_v49 }
0x1428   :  { %v2402_v52 = vmul.f32 0.5, %v2401_v36 }
0x142a   :  { %v2403_v51 = vsub.f32 1.5, %v2402_v52 }
0x142c   :  { %v2404_v25 = vmul.f32 %v2715_v57, %v2403_v51 }
0x142e   :  { %v2408_v55 = vsel %vm2407_vm8, %v2715_v57, %v2404_v25 }
0x142f   :  { %v2410_v41 = vmul.f32 %v2408_v55, %v3637_v16  ;;  %v2425_v16 = vrot.slane %v2424_v59, 1 }
0x1431   :  { %v2415_v63 = vmul.f32 %v2626_v27, %v2410_v41  ;;  %v2426_v22 = vadd.f32 %v2425_v16, %v2424_v59 }
0x1433   :  { %v2420_v0 = vadd.f32 %v2627_v20, %v2415_v63 }
0x1435   :  { %v2427_v12 = vrot.slane %v2420_v0, 4 }
0x1437   :  { %v2428_v15 = vadd.f32 %v2427_v12, %v2420_v0 }
0x1439   :  { %v2429_v8 = vrot.slane %v2428_v15, 2 }
0x143b   :  { %v2430_v19 = vadd.f32 %v2429_v8, %v2428_v15 }
0x143d   :  { %v2431_v21 = vrot.slane %v2430_v19, 1 }
0x143f   :  { %v2432_v23 = vadd.f32 %v2431_v21, %v2430_v19 }
0x1441   :  { %v2434_v30 = vsel %vm2433_vm9, %v2426_v22, %v2432_v23 }
0x1442   :  { %2471 = vmatmul.f32.vlgmr.msra.gmra.mxu1 %v2434_v30 }
0x14bf   :  { %v2472_v17 = vpop.f32.mrf.mxu1 }
0x14c0   :  { %v2473_v33 = vadd.f32 %v2628_v18, %v2472_v17 }
0x14c2   :  { %2716 = vtanh.f32 %v2473_v33 }
0x14c8   :  { %v2717_v34 = vpop.eup %2716 }
0x14c9   :  { %2512 = vmatmul.f32.vlgmr.msrb.gmra.mxu2 %v2717_v34 }
0x154c   :  { %v2513_v42 = vpop.f32.mrf.mxu2 }
0x154d   :  { %v2514_v38 = vadd.f32 %v2629_v53, %v2513_v42 }
0x154f   :  { %2517 = vst.msk [vmem:[#allocation22] sm:$0x3] %vm2516_vm10, %v2514_v38 }
0x1550   :  { %2528 = dma.vmem_to_hbm [thread:$0]  %s2524_s27, 32, %s2526_s13, [#allocation4]  }
0x1551   :  { %3044 = dma.done.wait [#allocation4], 32  }
0x1552   :  { %3045 = vsyncadd [#allocation4], 4294967264 }
0x1553   :  { %2533 = vsyncpa [#allocation3], 1 }
0x1554   :  { %2534 = vsyncpa [#allocation6], 1 }
0x1555   :  { %2535 = vsyncpa [#allocation9], 1 }
0x1556   :  { %2536 = vsyncpa [#allocation12], 1 }
0x1557   :  { %2537 = vsyncpa [#allocation15], 1 }
0x1558   :  { %2538 = vsyncpa [#allocation18], 1 }
0x1559   :  { %2539 = vsyncpa [#allocation21], 1 }
0x155a   :  { %2540 = vsyncpa [#allocation4], 1 }

</bundles_post_ra>
